<compile_context>
chip_gen: v5e
topology: v5e:2x2
jax: 0.10.0
libtpu: 0.0.40
codegen_flags: <defaults>
</compile_context>

<pallas_src>
import jax
import jax.numpy as jnp
from jax.experimental import pallas as pl
from jax.experimental.pallas import tpu as pltpu

IN_DIM = 512
H1_DIM = 512
H2_DIM = 256


# ---------------------------------------------------------------------------
# Fused MLP-head kernel.
# x_ref : (TB, 512)      one batch slab
# w1_ref: (512, 512)  b1_ref: (1, 512)
# w2_ref: (512, 256)  b2_ref: (1, 256)
# w3_ref: (256, Cp)   b3_ref: (1, Cp)      (Cp = num_classes padded to 128)
# o_ref : (TB, Cp)
# ---------------------------------------------------------------------------
def mlp_head_kernel(x_ref, w1_ref, b1_ref, w2_ref, b2_ref, w3_ref, b3_ref, o_ref):
    x = x_ref[...]

    h1 = jnp.dot(x, w1_ref[...], preferred_element_type=jnp.float32) + b1_ref[...]
    h1 = jnp.maximum(h1, 0.0)          # ReLU; Dropout = identity (inference)

    h2 = jnp.dot(h1, w2_ref[...], preferred_element_type=jnp.float32) + b2_ref[...]
    h2 = jnp.maximum(h2, 0.0)          # ReLU; Dropout = identity (inference)

    o_ref[...] = (
        jnp.dot(h2, w3_ref[...], preferred_element_type=jnp.float32) + b3_ref[...]
    )


def vgg16_label_forward(x, params, num_classes=10, tb=128):
    """Matches VGG16_label.forward: x.view(-1, 512) -> fc. Returns (B, num_classes)."""
    x2 = x.reshape(-1, IN_DIM).astype(jnp.float32)
    B = x2.shape[0]

    # Pad batch up to a multiple of the row tile (zero rows -> discarded later).
    Bp = ((B + tb - 1) // tb) * tb
    if Bp != B:
        x2 = jnp.pad(x2, ((0, Bp - B), (0, 0)))

    # Lane-dense output: pad the class dim up to a multiple of 128.
    cp = ((num_classes + 127) // 128) * 128
    w3p = jnp.pad(params["w3"], ((0, 0), (0, cp - num_classes)))
    b3p = jnp.pad(params["b3"], ((0, cp - num_classes),))

    out = pl.pallas_call(
        mlp_head_kernel,
        out_shape=jax.ShapeDtypeStruct((Bp, cp), jnp.float32),
        grid=(Bp // tb,),
        in_specs=[
            pl.BlockSpec((tb, IN_DIM), lambda i: (i, 0)),          # x slab
            pl.BlockSpec((IN_DIM, H1_DIM), lambda i: (0, 0)),      # w1 (resident)
            pl.BlockSpec((1, H1_DIM), lambda i: (0, 0)),           # b1
            pl.BlockSpec((H1_DIM, H2_DIM), lambda i: (0, 0)),      # w2 (resident)
            pl.BlockSpec((1, H2_DIM), lambda i: (0, 0)),           # b2
            pl.BlockSpec((H2_DIM, cp), lambda i: (0, 0)),          # w3 (resident)
            pl.BlockSpec((1, cp), lambda i: (0, 0)),               # b3
        ],
        out_specs=pl.BlockSpec((tb, cp), lambda i: (i, 0)),
        compiler_params=pltpu.CompilerParams(
            dimension_semantics=("parallel",),
            vmem_limit_bytes=64 * 1024 * 1024,
        ),
    )(
        x2,
        params["w1"], params["b1"].reshape(1, -1),
        params["w2"], params["b2"].reshape(1, -1),
        w3p, b3p.reshape(1, -1),
    )

    return out[:B, :num_classes]


# ---------------------------------------------------------------------------
# Parameter construction + pure-JAX reference for a correctness check.
# ---------------------------------------------------------------------------
def init_params(key, num_classes=10):
    ks = jax.random.split(key, 6)
    p = {
        "w1": 0.05 * jax.random.normal(ks[0], (IN_DIM, H1_DIM), jnp.float32),
        "b1": 0.05 * jax.random.normal(ks[1], (H1_DIM,), jnp.float32),
        "w2": 0.05 * jax.random.normal(ks[2], (H1_DIM, H2_DIM), jnp.float32),
        "b2": 0.05 * jax.random.normal(ks[3], (H2_DIM,), jnp.float32),
        "w3": 0.05 * jax.random.normal(ks[4], (H2_DIM, num_classes), jnp.float32),
        "b3": 0.05 * jax.random.normal(ks[5], (num_classes,), jnp.float32),
    }
    return p


def reference_forward(x, p):
    h = x.reshape(-1, IN_DIM).astype(jnp.float32)
    h = jnp.maximum(h @ p["w1"] + p["b1"], 0.0)   # Dropout -> identity (eval)
    h = jnp.maximum(h @ p["w2"] + p["b2"], 0.0)   # Dropout -> identity (eval)
    return h @ p["w3"] + p["b3"]


if __name__ == "__main__":
    key = jax.random.PRNGKey(0)
    k_in, k_par = jax.random.split(key)

    num_classes = 10
    x = jax.random.normal(k_in, (2, IN_DIM), jnp.float32)   # flattens to (-1, 512)
    params = init_params(k_par, num_classes)

    out = vgg16_label_forward(x, params, num_classes=num_classes)
    out = jax.block_until_ready(out)

    assert out.shape == (2, num_classes), out.shape
    assert out.dtype == jnp.float32

    ref = reference_forward(x, params)
    assert jnp.allclose(out, ref, atol=1e-4, rtol=1e-4), float(
        jnp.max(jnp.abs(out - ref))
    )

    print("KERNEL_OK")
</pallas_src>

<mosaic_0001>
module attributes {stable_mosaic.version = 11 : i64} {
  func.func @mlp_head_kernel(%arg0: i32, %arg1: memref<128x512xf32, #tpu.memory_space<vmem>>, %arg2: memref<512x512xf32, #tpu.memory_space<vmem>>, %arg3: memref<1x512xf32, #tpu.memory_space<vmem>>, %arg4: memref<512x256xf32, #tpu.memory_space<vmem>>, %arg5: memref<1x256xf32, #tpu.memory_space<vmem>>, %arg6: memref<256x128xf32, #tpu.memory_space<vmem>>, %arg7: memref<1x128xf32, #tpu.memory_space<vmem>>, %arg8: memref<128x128xf32, #tpu.memory_space<vmem>>) attributes {dimension_semantics = [#tpu.dimension_semantics<parallel>], iteration_bounds = array<i64: 1>, scalar_prefetch = 0 : i64, scratch_operands = 0 : i64, tpu.core_type = #tpu.core_type<tc>, window_params = [{transform_indices = @transform_0, window_bounds = array<i64: 128, 512>}, {pipeline_mode = #tpu.pipeline_mode<synchronous>, transform_indices = @transform_1, window_bounds = array<i64: 512, 512>}, {pipeline_mode = #tpu.pipeline_mode<synchronous>, transform_indices = @transform_2, window_bounds = array<i64: 1, 512>}, {pipeline_mode = #tpu.pipeline_mode<synchronous>, transform_indices = @transform_3, window_bounds = array<i64: 512, 256>}, {pipeline_mode = #tpu.pipeline_mode<synchronous>, transform_indices = @transform_4, window_bounds = array<i64: 1, 256>}, {pipeline_mode = #tpu.pipeline_mode<synchronous>, transform_indices = @transform_5, window_bounds = array<i64: 256, 128>}, {pipeline_mode = #tpu.pipeline_mode<synchronous>, transform_indices = @transform_6, window_bounds = array<i64: 1, 128>}, {transform_indices = @transform_7, window_bounds = array<i64: 128, 128>}]} {
    %c0 = arith.constant 0 : index
    %c0_0 = arith.constant 0 : index
    %0 = vector.load %arg1[%c0, %c0_0] : memref<128x512xf32, #tpu.memory_space<vmem>>, vector<128x512xf32>
    %c0_1 = arith.constant 0 : index
    %c0_2 = arith.constant 0 : index
    %1 = vector.load %arg2[%c0_1, %c0_2] : memref<512x512xf32, #tpu.memory_space<vmem>>, vector<512x512xf32>
    %cst = arith.constant dense<0.000000e+00> : vector<128x512xf32>
    %2 = tpu.matmul %0, %1, %cst {dimension_numbers = #tpu.dot_dimension_numbers<[1], [0], [0], [1], [0, 0, 1, 1], [], []>} : vector<128x512xf32>, vector<512x512xf32>, vector<128x512xf32> -> vector<128x512xf32>
    %c0_3 = arith.constant 0 : index
    %c0_4 = arith.constant 0 : index
    %3 = vector.load %arg3[%c0_3, %c0_4] : memref<1x512xf32, #tpu.memory_space<vmem>>, vector<1x512xf32>
    %4 = vector.broadcast %3 : vector<1x512xf32> to vector<128x512xf32>
    %5 = arith.addf %2, %4 : vector<128x512xf32>
    %cst_5 = arith.constant 0.000000e+00 : f32
    %6 = vector.broadcast %cst_5 : f32 to vector<128x512xf32>
    %7 = arith.maximumf %5, %6 : vector<128x512xf32>
    %c0_6 = arith.constant 0 : index
    %c0_7 = arith.constant 0 : index
    %8 = vector.load %arg4[%c0_6, %c0_7] : memref<512x256xf32, #tpu.memory_space<vmem>>, vector<512x256xf32>
    %cst_8 = arith.constant dense<0.000000e+00> : vector<128x256xf32>
    %9 = tpu.matmul %7, %8, %cst_8 {dimension_numbers = #tpu.dot_dimension_numbers<[1], [0], [0], [1], [0, 0, 1, 1], [], []>} : vector<128x512xf32>, vector<512x256xf32>, vector<128x256xf32> -> vector<128x256xf32>
    %c0_9 = arith.constant 0 : index
    %c0_10 = arith.constant 0 : index
    %10 = vector.load %arg5[%c0_9, %c0_10] : memref<1x256xf32, #tpu.memory_space<vmem>>, vector<1x256xf32>
    %11 = vector.broadcast %10 : vector<1x256xf32> to vector<128x256xf32>
    %12 = arith.addf %9, %11 : vector<128x256xf32>
    %cst_11 = arith.constant 0.000000e+00 : f32
    %13 = vector.broadcast %cst_11 : f32 to vector<128x256xf32>
    %14 = arith.maximumf %12, %13 : vector<128x256xf32>
    %c0_12 = arith.constant 0 : index
    %c0_13 = arith.constant 0 : index
    %15 = vector.load %arg6[%c0_12, %c0_13] : memref<256x128xf32, #tpu.memory_space<vmem>>, vector<256x128xf32>
    %cst_14 = arith.constant dense<0.000000e+00> : vector<128x128xf32>
    %16 = tpu.matmul %14, %15, %cst_14 {dimension_numbers = #tpu.dot_dimension_numbers<[1], [0], [0], [1], [0, 0, 1, 1], [], []>} : vector<128x256xf32>, vector<256x128xf32>, vector<128x128xf32> -> vector<128x128xf32>
    %c0_15 = arith.constant 0 : index
    %c0_16 = arith.constant 0 : index
    %17 = vector.load %arg7[%c0_15, %c0_16] : memref<1x128xf32, #tpu.memory_space<vmem>>, vector<1x128xf32>
    %18 = vector.broadcast %17 : vector<1x128xf32> to vector<128x128xf32>
    %19 = arith.addf %16, %18 : vector<128x128xf32>
    %c0_17 = arith.constant 0 : index
    %c0_18 = arith.constant 0 : index
    %20 = vector.load %arg8[%c0_17, %c0_18] : memref<128x128xf32, #tpu.memory_space<vmem>>, vector<128x128xf32>
    tpu.vector_store %arg8[%c0_17, %c0_18], %19 {strides = array<i32>} : memref<128x128xf32, #tpu.memory_space<vmem>>, vector<128x128xf32>,
    return
  }
  func.func @transform_0(%arg0: i32) -> (i32, i32) {
    %c0_i32 = arith.constant 0 : i32
    %c0_i32_0 = arith.constant 0 : i32
    return %arg0, %c0_i32 : i32, i32
  }
  func.func @transform_1(%arg0: i32) -> (i32, i32) {
    %c0_i32 = arith.constant 0 : i32
    %c0_i32_0 = arith.constant 0 : i32
    %c0_i32_1 = arith.constant 0 : i32
    return %c0_i32, %c0_i32_0 : i32, i32
  }
  func.func @transform_2(%arg0: i32) -> (i32, i32) {
    %c0_i32 = arith.constant 0 : i32
    %c0_i32_0 = arith.constant 0 : i32
    %c0_i32_1 = arith.constant 0 : i32
    return %c0_i32, %c0_i32_0 : i32, i32
  }
  func.func @transform_3(%arg0: i32) -> (i32, i32) {
    %c0_i32 = arith.constant 0 : i32
    %c0_i32_0 = arith.constant 0 : i32
    %c0_i32_1 = arith.constant 0 : i32
    return %c0_i32, %c0_i32_0 : i32, i32
  }
  func.func @transform_4(%arg0: i32) -> (i32, i32) {
    %c0_i32 = arith.constant 0 : i32
    %c0_i32_0 = arith.constant 0 : i32
    %c0_i32_1 = arith.constant 0 : i32
    return %c0_i32, %c0_i32_0 : i32, i32
  }
  func.func @transform_5(%arg0: i32) -> (i32, i32) {
    %c0_i32 = arith.constant 0 : i32
    %c0_i32_0 = arith.constant 0 : i32
    %c0_i32_1 = arith.constant 0 : i32
    return %c0_i32, %c0_i32_0 : i32, i32
  }
  func.func @transform_6(%arg0: i32) -> (i32, i32) {
    %c0_i32 = arith.constant 0 : i32
    %c0_i32_0 = arith.constant 0 : i32
    %c0_i32_1 = arith.constant 0 : i32
    return %c0_i32, %c0_i32_0 : i32, i32
  }
  func.func @transform_7(%arg0: i32) -> (i32, i32) {
    %c0_i32 = arith.constant 0 : i32
    %c0_i32_0 = arith.constant 0 : i32
    return %arg0, %c0_i32 : i32, i32
  }
}

</mosaic_0001>

<bundles_post_ra>
// kernel: tpu_custom_call.1
= control target key start
LH: loop header
LB: loop body
LE: loop exit
PB: predicated region body
PF: predicated region fallthrough
CT: control target
= control target key end

     0   :  { %12 = vsyncpa [#allocation3], 0  ;;  %s4336_s0 = inlined_call_operand.hbm [shape: f32[128,512], index: 0, kind: input, shape index: {}]   ;;  %s4337_s1 = inlined_call_operand.hbm [shape: f32[512,512], index: 1, kind: input, shape index: {}]   ;;  %s4338_s2 = inlined_call_operand.hbm [shape: f32[1,512], index: 2, kind: input, shape index: {}]   ;;  %s4339_s3 = inlined_call_operand.hbm [shape: f32[512,256], index: 3, kind: input, shape index: {}]   ;;  %s4340_s4 = inlined_call_operand.vmem [shape: f32[1,256], index: 4, kind: input, shape index: {}]   ;;  %s4341_s5 = inlined_call_operand.hbm [shape: f32[256,128], index: 5, kind: input, shape index: {}]   ;;  %s4342_s6 = inlined_call_operand.vmem [shape: f32[1,128], index: 6, kind: input, shape index: {}]   ;;  %s4343_s7 = inlined_call_operand.hbm [shape: f32[128,128], index: 7, kind: output, shape index: {}]  }
   0x1   :  { %13 = vsyncpa [#allocation6], 0 }
   0x2   :  { %14 = vsyncpa [#allocation9], 0 }
   0x3   :  { %15 = vsyncpa [#allocation4], 0  ;;  %s33_s26 = sshll.u32 %s4337_s1, 4  ;;  %s2688_s27 = smov [#allocation5]   ;;  %s34_s26 = int_to_ptr.hbm [resolvable:$true] %s33_s26 }
   0x4   :  { %s35_s28 = sshll.u32 %s2688_s27, 4  ;;  %s57_s8 = sshll.u32 %s4339_s3, 4  ;;  %s36_s28 = int_to_ptr.vmem [resolvable:$true] %s35_s28  ;;  %s58_s8 = int_to_ptr.hbm [resolvable:$true] %s57_s8 }
   0x5   :  { %s2689_s9 = smov 512   ;;  %s2690_s10 = smov 32  }
   0x6   :  { %41 = dma.hbm_to_vmem [thread:$0]  %s34_s26, 32768, %s36_s28, [#allocation6], %s2689_s9, %s2689_s9, %s2690_s10  }
   0x7   :  { %s2691_s11 = smov [#allocation8]   ;;  %s2692_s13 = smov 256  }
   0x8   :  { %s59_s12 = sshll.u32 %s2691_s11, 4  ;;  %s2693_s14 = smov 16   ;;  %s60_s12 = int_to_ptr.vmem [resolvable:$true] %s59_s12 }
   0x9   :  { %65 = dma.hbm_to_vmem [thread:$0]  %s58_s8, 16384, %s60_s12, [#allocation9], %s2692_s13, %s2692_s13, %s2693_s14  }
   0xa   :  { %s20_s16 = sshll.u32 %s4336_s0, 4  ;;  %s2694_s17 = smov [#allocation2]   ;;  %s21_s16 = int_to_ptr.hbm [resolvable:$true] %s20_s16 }
   0xb   :  { %s22_s18 = sshll.u32 %s2694_s17, 4  ;;  %s47_s20 = sshll.u32 %s4338_s2, 4  ;;  %s23_s18 = int_to_ptr.vmem [resolvable:$true] %s22_s18  ;;  %s48_s20 = int_to_ptr.hbm [resolvable:$true] %s47_s20 }
   0xc   :  { %28 = dma.hbm_to_vmem [thread:$0]  %s21_s16, 8192, %s23_s18, [#allocation3], %s2689_s9, %s2689_s9, %s2690_s10  }
   0xd   :  { %s2695_s21 = smov [#allocation7]   ;;  %s72_s25 = sshll.u32 %s4341_s5, 4  ;;  %s73_s25 = int_to_ptr.hbm [resolvable:$true] %s72_s25 }
   0xe   :  { %s49_s22 = sshll.u32 %s2695_s21, 4  ;;  %s2696_s0 = smov [#allocation10]   ;;  %s50_s22 = int_to_ptr.vmem [resolvable:$true] %s49_s22 }
   0xf   :  { %52 = dma.hbm_to_vmem [thread:$0]  %s48_s20, 64, %s50_s22, [#allocation6]  }
  0x10   :  { %s74_s26 = sshll.u32 %s2696_s0, 4  ;;  %s2697_s27 = smov 128   ;;  %s75_s26 = int_to_ptr.vmem [resolvable:$true] %s74_s26 }
  0x11   :  { %s2698_s28 = smov 8  }
  0x12   :  { %80 = dma.hbm_to_vmem [thread:$0]  %s73_s25, 4096, %s75_s26, [#allocation9], %s2697_s27, %s2697_s27, %s2698_s28  }
  0x13   :  { %2680 = dma.done.wait [#allocation3], 8192  }
  0x14   :  { %2681 = vsyncadd [#allocation3], 4294959104 }
  0x15   :  { %2682 = dma.done.wait [#allocation6], 32832  }
  0x16   :  { %2683 = vsyncadd [#allocation6], 4294934464 }
  0x17   :  { %2684 = dma.done.wait [#allocation9], 20480  }
  0x18   :  { %2685 = vsyncadd [#allocation9], 4294946816  ;;  %v227_v0 = vld [vmem:[#allocation5 + $0x1e0] sm:$0xff]  ;;  %v2762_v34 = vld [vmem:[#allocation2 + $0x8] sm:$0xff]  ;;  %s2411_s10 = sshll.u32 %s4343_s7, 4  ;;  %s2412_s10 = int_to_ptr.hbm [resolvable:$true] %s2411_s10 }
  0x19   :  { %v291_v1 = vld [vmem:[#allocation5 + $0x3e0] sm:$0xff]  ;;  %433 = vmatpush.msra.mxu0 %v227_v0  ;;  %2426 = vmatpush.msra.mxu2 %v227_v0  ;;  %v2765_v36 = vld [vmem:[#allocation2 + $0x108] sm:$0xff] }
  0x1a   :  { %v223_v2 = vld [vmem:[#allocation5 + $0x1c0] sm:$0xff]  ;;  %498 = vmatpush.msra.mxu1 %v291_v1  ;;  %2442 = vmatpush.msra.mxu3 %v291_v1  ;;  %v228_v39 = vld [vmem:[#allocation5 + $0x1e8] sm:$0xff] }
  0x1b   :  { %v287_v3 = vld [vmem:[#allocation5 + $0x3c0] sm:$0xff]  ;;  %434 = vmatpush.msra.mxu0 %v223_v2  ;;  %2427 = vmatpush.msra.mxu2 %v223_v2  ;;  %v292_v40 = vld [vmem:[#allocation5 + $0x3e8] sm:$0xff] }
  0x1c   :  { %v219_v4 = vld [vmem:[#allocation5 + $0x1a0] sm:$0xff]  ;;  %499 = vmatpush.msra.mxu1 %v287_v3  ;;  %2443 = vmatpush.msra.mxu3 %v287_v3  ;;  %v224_v43 = vld [vmem:[#allocation5 + $0x1c8] sm:$0xff] }
  0x1d   :  { %v283_v5 = vld [vmem:[#allocation5 + $0x3a0] sm:$0xff]  ;;  %435 = vmatpush.msra.mxu0 %v219_v4  ;;  %2428 = vmatpush.msra.mxu2 %v219_v4  ;;  %v288_v44 = vld [vmem:[#allocation5 + $0x3c8] sm:$0xff] }
  0x1e   :  { %v215_v6 = vld [vmem:[#allocation5 + $0x180] sm:$0xff]  ;;  %500 = vmatpush.msra.mxu1 %v283_v5  ;;  %2444 = vmatpush.msra.mxu3 %v283_v5  ;;  %v220_v45 = vld [vmem:[#allocation5 + $0x1a8] sm:$0xff] }
  0x1f   :  { %v279_v7 = vld [vmem:[#allocation5 + $0x380] sm:$0xff]  ;;  %436 = vmatpush.msra.mxu0 %v215_v6  ;;  %2429 = vmatpush.msra.mxu2 %v215_v6  ;;  %v2774_v49 = vld [vmem:[#allocation2 + $0x28] sm:$0xff] }
  0x20   :  { %v211_v8 = vld [vmem:[#allocation5 + $0x160] sm:$0xff]  ;;  %501 = vmatpush.msra.mxu1 %v279_v7  ;;  %2445 = vmatpush.msra.mxu3 %v279_v7  ;;  %v2777_v52 = vld [vmem:[#allocation2 + $0x128] sm:$0xff] }
  0x21   :  { %v275_v9 = vld [vmem:[#allocation5 + $0x360] sm:$0xff]  ;;  %437 = vmatpush.msra.mxu0 %v211_v8  ;;  %2430 = vmatpush.msra.mxu2 %v211_v8  ;;  %v284_v53 = vld [vmem:[#allocation5 + $0x3a8] sm:$0xff] }
  0x22   :  { %v207_v10 = vld [vmem:[#allocation5 + $0x140] sm:$0xff]  ;;  %502 = vmatpush.msra.mxu1 %v275_v9  ;;  %2446 = vmatpush.msra.mxu3 %v275_v9  ;;  %v216_v56 = vld [vmem:[#allocation5 + $0x188] sm:$0xff] }
  0x23   :  { %v271_v11 = vld [vmem:[#allocation5 + $0x340] sm:$0xff]  ;;  %438 = vmatpush.msra.mxu0 %v207_v10  ;;  %2431 = vmatpush.msra.mxu2 %v207_v10  ;;  %v280_v57 = vld [vmem:[#allocation5 + $0x388] sm:$0xff] }
  0x24   :  { %v203_v12 = vld [vmem:[#allocation5 + $0x120] sm:$0xff]  ;;  %503 = vmatpush.msra.mxu1 %v271_v11  ;;  %2447 = vmatpush.msra.mxu3 %v271_v11  ;;  %v212_v60 = vld [vmem:[#allocation5 + $0x168] sm:$0xff] }
  0x25   :  { %v267_v13 = vld [vmem:[#allocation5 + $0x320] sm:$0xff]  ;;  %439 = vmatpush.msra.mxu0 %v203_v12  ;;  %2432 = vmatpush.msra.mxu2 %v203_v12  ;;  %v276_v61 = vld [vmem:[#allocation5 + $0x368] sm:$0xff] }
  0x26   :  { %v199_v14 = vld [vmem:[#allocation5 + $0x100] sm:$0xff]  ;;  %504 = vmatpush.msra.mxu1 %v267_v13  ;;  %2448 = vmatpush.msra.mxu3 %v267_v13  ;;  %v2786_v1 = vld [vmem:[#allocation2 + $0x48] sm:$0xff] }
  0x27   :  { %v263_v15 = vld [vmem:[#allocation5 + $0x300] sm:$0xff]  ;;  %440 = vmatpush.msra.mxu0 %v199_v14  ;;  %2433 = vmatpush.msra.mxu2 %v199_v14  ;;  %v2789_v4 = vld [vmem:[#allocation2 + $0x148] sm:$0xff] }
  0x28   :  { %v195_v16 = vld [vmem:[#allocation5 + $0xe0] sm:$0xff]  ;;  %505 = vmatpush.msra.mxu1 %v263_v15  ;;  %2449 = vmatpush.msra.mxu3 %v263_v15  ;;  %v208_v5 = vld [vmem:[#allocation5 + $0x148] sm:$0xff] }
  0x29   :  { %v259_v17 = vld [vmem:[#allocation5 + $0x2e0] sm:$0xff]  ;;  %441 = vmatpush.msra.mxu0 %v195_v16  ;;  %2434 = vmatpush.msra.mxu2 %v195_v16  ;;  %v272_v8 = vld [vmem:[#allocation5 + $0x348] sm:$0xff] }
  0x2a   :  { %v191_v18 = vld [vmem:[#allocation5 + $0xc0] sm:$0xff]  ;;  %506 = vmatpush.msra.mxu1 %v259_v17  ;;  %2450 = vmatpush.msra.mxu3 %v259_v17  ;;  %v204_v9 = vld [vmem:[#allocation5 + $0x128] sm:$0xff] }
  0x2b   :  { %v255_v19 = vld [vmem:[#allocation5 + $0x2c0] sm:$0xff]  ;;  %442 = vmatpush.msra.mxu0 %v191_v18  ;;  %2435 = vmatpush.msra.mxu2 %v191_v18  ;;  %v268_v12 = vld [vmem:[#allocation5 + $0x328] sm:$0xff] }
  0x2c   :  { %v187_v20 = vld [vmem:[#allocation5 + $0xa0] sm:$0xff]  ;;  %507 = vmatpush.msra.mxu1 %v255_v19  ;;  %2451 = vmatpush.msra.mxu3 %v255_v19  ;;  %v200_v13 = vld [vmem:[#allocation5 + $0x108] sm:$0xff] }
  0x2d   :  { %v251_v21 = vld [vmem:[#allocation5 + $0x2a0] sm:$0xff]  ;;  %443 = vmatpush.msra.mxu0 %v187_v20  ;;  %2436 = vmatpush.msra.mxu2 %v187_v20  ;;  %v2798_v17 = vld [vmem:[#allocation2 + $0x68] sm:$0xff] }
  0x2e   :  { %v183_v22 = vld [vmem:[#allocation5 + $0x80] sm:$0xff]  ;;  %508 = vmatpush.msra.mxu1 %v251_v21  ;;  %2452 = vmatpush.msra.mxu3 %v251_v21  ;;  %v2801_v20 = vld [vmem:[#allocation2 + $0x168] sm:$0xff] }
  0x2f   :  { %v247_v23 = vld [vmem:[#allocation5 + $0x280] sm:$0xff]  ;;  %444 = vmatpush.msra.mxu0 %v183_v22  ;;  %2437 = vmatpush.msra.mxu2 %v183_v22  ;;  %v264_v21 = vld [vmem:[#allocation5 + $0x308] sm:$0xff] }
  0x30   :  { %v179_v24 = vld [vmem:[#allocation5 + $0x60] sm:$0xff]  ;;  %509 = vmatpush.msra.mxu1 %v247_v23  ;;  %2453 = vmatpush.msra.mxu3 %v247_v23 }
  0x31   :  { %v243_v25 = vld [vmem:[#allocation5 + $0x260] sm:$0xff]  ;;  %445 = vmatpush.msra.mxu0 %v179_v24  ;;  %2438 = vmatpush.msra.mxu2 %v179_v24  ;;  %v196_v24 = vld [vmem:[#allocation5 + $0xe8] sm:$0xff] }
  0x32   :  { %v175_v26 = vld [vmem:[#allocation5 + $0x40] sm:$0xff]  ;;  %510 = vmatpush.msra.mxu1 %v243_v25  ;;  %2454 = vmatpush.msra.mxu3 %v243_v25  ;;  %v260_v25 = vld [vmem:[#allocation5 + $0x2e8] sm:$0xff] }
  0x33   :  { %v239_v27 = vld [vmem:[#allocation5 + $0x240] sm:$0xff]  ;;  %446 = vmatpush.msra.mxu0 %v175_v26  ;;  %2439 = vmatpush.msra.mxu2 %v175_v26 }
  0x34   :  { %v171_v28 = vld [vmem:[#allocation5 + $0x20] sm:$0xff]  ;;  %511 = vmatpush.msra.mxu1 %v239_v27  ;;  %2455 = vmatpush.msra.mxu3 %v239_v27 }
  0x35   :  { %v235_v29 = vld [vmem:[#allocation5 + $0x220] sm:$0xff]  ;;  %447 = vmatpush.msra.mxu0 %v171_v28  ;;  %2440 = vmatpush.msra.mxu2 %v171_v28  ;;  %v192_v28 = vld [vmem:[#allocation5 + $0xc8] sm:$0xff] }
  0x36   :  { %v167_v30 = vld [vmem:[#allocation5] sm:$0xff]  ;;  %512 = vmatpush.msra.mxu1 %v235_v29  ;;  %2456 = vmatpush.msra.mxu3 %v235_v29  ;;  %v256_v29 = vld [vmem:[#allocation5 + $0x2c8] sm:$0xff] }
  0x37   :  { %v231_v31 = vld [vmem:[#allocation5 + $0x200] sm:$0xff]  ;;  %448 = vmatpush.msra.mxu0 %v167_v30  ;;  %2441 = vmatpush.msra.mxu2 %v167_v30 }
  0x38   :  { %v2758_v32 = vld [vmem:[#allocation2] sm:$0xff]  ;;  %513 = vmatpush.msra.mxu1 %v231_v31  ;;  %2457 = vmatpush.msra.mxu3 %v231_v31 }
  0x39   :  { %v2760_v33 = vld [vmem:[#allocation2 + $0x100] sm:$0xff]  ;;  %449 = vmatmul.f32.vlgmr.msra.gmra.mxu0 %v2758_v32  ;;  %514 = vmatmul.f32.vlgmr.msra.gmra.mxu1 %v2762_v34 }
  0x3a   :  { %v355_v35 = vld [vmem:[#allocation5 + $0x5e0] sm:$0xff]  ;;  %473 = vmatmul.f32.vlgmr.msra.gmra.mxu2 %v2760_v33  ;;  %538 = vmatmul.f32.vlgmr.msra.gmra.mxu3 %v2765_v36 }
  0x3b   :  { %v419_v37 = vld [vmem:[#allocation5 + $0x7e0] sm:$0xff]  ;;  %563 = vmatpush.msrb.mxu2 %v355_v35  ;;  %693 = vmatpush.msrb.mxu0 %v228_v39  ;;  %v252_v39 = vld [vmem:[#allocation5 + $0x2a8] sm:$0xff] }
  0x3c   :  { %v351_v38 = vld [vmem:[#allocation5 + $0x5c0] sm:$0xff]  ;;  %628 = vmatpush.msrb.mxu3 %v419_v37  ;;  %758 = vmatpush.msrb.mxu1 %v292_v40  ;;  %v2810_v37 = vld [vmem:[#allocation2 + $0x88] sm:$0xff] }
  0x3d   :  { %v415_v41 = vld [vmem:[#allocation5 + $0x7c0] sm:$0xff]  ;;  %564 = vmatpush.msrb.mxu2 %v351_v38  ;;  %694 = vmatpush.msrb.mxu0 %v224_v43  ;;  %v188_v38 = vld [vmem:[#allocation5 + $0xa8] sm:$0xff] }
  0x3e   :  { %v347_v42 = vld [vmem:[#allocation5 + $0x5a0] sm:$0xff]  ;;  %629 = vmatpush.msrb.mxu3 %v415_v41  ;;  %759 = vmatpush.msrb.mxu1 %v288_v44  ;;  %v2813_v40 = vld [vmem:[#allocation2 + $0x188] sm:$0xff] }
  0x3f   :  { %v2770_v46 = vld [vmem:[#allocation2 + $0x20] sm:$0xff]  ;;  %565 = vmatpush.msrb.mxu2 %v347_v42  ;;  %695 = vmatpush.msrb.mxu0 %v220_v45  ;;  %v184_v43 = vld [vmem:[#allocation5 + $0x88] sm:$0xff] }
  0x40   :  { %v411_v47 = vld [vmem:[#allocation5 + $0x7a0] sm:$0xff]  ;;  %760 = vmatpush.msrb.mxu1 %v284_v53  ;;  %v248_v44 = vld [vmem:[#allocation5 + $0x288] sm:$0xff] }
  0x41   :  { %v2772_v48 = vld [vmem:[#allocation2 + $0x120] sm:$0xff]  ;;  %452 = vmatmul.f32.gmra.mxu0 %v2770_v46  ;;  %630 = vmatpush.msrb.mxu3 %v411_v47  ;;  %v180_v47 = vld [vmem:[#allocation5 + $0x68] sm:$0xff] }
  0x42   :  { %v343_v50 = vld [vmem:[#allocation5 + $0x580] sm:$0xff]  ;;  %476 = vmatmul.f32.gmra.mxu2 %v2772_v48  ;;  %517 = vmatmul.f32.gmra.mxu1 %v2774_v49  ;;  %v356_v53 = vld [vmem:[#allocation5 + $0x5e8] sm:$0xff] }
  0x43   :  { %v407_v51 = vld [vmem:[#allocation5 + $0x780] sm:$0xff]  ;;  %566 = vmatpush.msrb.mxu2 %v343_v50  ;;  %541 = vmatmul.f32.gmra.mxu3 %v2777_v52 }
  0x44   :  { %v339_v54 = vld [vmem:[#allocation5 + $0x560] sm:$0xff]  ;;  %631 = vmatpush.msrb.mxu3 %v407_v51  ;;  %696 = vmatpush.msrb.mxu0 %v216_v56  ;;  %v244_v51 = vld [vmem:[#allocation5 + $0x268] sm:$0xff] }
  0x45   :  { %v403_v55 = vld [vmem:[#allocation5 + $0x760] sm:$0xff]  ;;  %567 = vmatpush.msrb.mxu2 %v339_v54  ;;  %761 = vmatpush.msrb.mxu1 %v280_v57  ;;  %v2822_v57 = vld [vmem:[#allocation2 + $0xa8] sm:$0xff] }
  0x46   :  { %v335_v58 = vld [vmem:[#allocation5 + $0x540] sm:$0xff]  ;;  %632 = vmatpush.msrb.mxu3 %v403_v55  ;;  %697 = vmatpush.msrb.mxu0 %v212_v60  ;;  %v2825_v60 = vld [vmem:[#allocation2 + $0x1a8] sm:$0xff] }
  0x47   :  { %v399_v59 = vld [vmem:[#allocation5 + $0x740] sm:$0xff]  ;;  %568 = vmatpush.msrb.mxu2 %v335_v58  ;;  %762 = vmatpush.msrb.mxu1 %v276_v61  ;;  %v176_v58 = vld [vmem:[#allocation5 + $0x48] sm:$0xff] }
  0x48   :  { %v2782_v62 = vld [vmem:[#allocation2 + $0x40] sm:$0xff]  ;;  %633 = vmatpush.msrb.mxu3 %v399_v59  ;;  %698 = vmatpush.msrb.mxu0 %v208_v5  ;;  %v240_v59 = vld [vmem:[#allocation5 + $0x248] sm:$0xff] }
  0x49   :  { %v331_v63 = vld [vmem:[#allocation5 + $0x520] sm:$0xff]  ;;  %455 = vmatmul.f32.gmra.mxu0 %v2782_v62  ;;  %763 = vmatpush.msrb.mxu1 %v272_v8  ;;  %v172_v61 = vld [vmem:[#allocation5 + $0x28] sm:$0xff] }
  0x4a   :  { %v2784_v0 = vld [vmem:[#allocation2 + $0x140] sm:$0xff]  ;;  %569 = vmatpush.msrb.mxu2 %v331_v63  ;;  %520 = vmatmul.f32.gmra.mxu1 %v2786_v1  ;;  %v236_v63 = vld [vmem:[#allocation5 + $0x228] sm:$0xff] }
  0x4b   :  { %v395_v2 = vld [vmem:[#allocation5 + $0x720] sm:$0xff]  ;;  %479 = vmatmul.f32.gmra.mxu2 %v2784_v0  ;;  %544 = vmatmul.f32.gmra.mxu3 %v2789_v4  ;;  %v168_v5 = vld [vmem:[#allocation5 + $0x8] sm:$0xff] }
  0x4c   :  { %v327_v3 = vld [vmem:[#allocation5 + $0x500] sm:$0xff]  ;;  %634 = vmatpush.msrb.mxu3 %v395_v2  ;;  %699 = vmatpush.msrb.mxu0 %v204_v9  ;;  %v352_v2 = vld [vmem:[#allocation5 + $0x5c8] sm:$0xff] }
  0x4d   :  { %v391_v6 = vld [vmem:[#allocation5 + $0x700] sm:$0xff]  ;;  %570 = vmatpush.msrb.mxu2 %v327_v3  ;;  %764 = vmatpush.msrb.mxu1 %v268_v12  ;;  %v420_v3 = vld [vmem:[#allocation5 + $0x7e8] sm:$0xff] }
  0x4e   :  { %v323_v7 = vld [vmem:[#allocation5 + $0x4e0] sm:$0xff]  ;;  %635 = vmatpush.msrb.mxu3 %v391_v6  ;;  %700 = vmatpush.msrb.mxu0 %v200_v13  ;;  %v232_v6 = vld [vmem:[#allocation5 + $0x208] sm:$0xff] }
  0x4f   :  { %v387_v10 = vld [vmem:[#allocation5 + $0x6e0] sm:$0xff]  ;;  %571 = vmatpush.msrb.mxu2 %v323_v7  ;;  %765 = vmatpush.msrb.mxu1 %v264_v21  ;;  %v416_v7 = vld [vmem:[#allocation5 + $0x7c8] sm:$0xff] }
  0x50   :  { %v319_v11 = vld [vmem:[#allocation5 + $0x4c0] sm:$0xff]  ;;  %636 = vmatpush.msrb.mxu3 %v387_v10  ;;  %701 = vmatpush.msrb.mxu0 %v196_v24  ;;  %v2834_v10 = vld [vmem:[#allocation2 + $0xc8] sm:$0xff]  ;;  %v2854_v24 = vld [vmem:[#allocation2 + $0x10] sm:$0xff] }
  0x51   :  { %v2794_v14 = vld [vmem:[#allocation2 + $0x60] sm:$0xff]  ;;  %572 = vmatpush.msrb.mxu2 %v319_v11  ;;  %766 = vmatpush.msrb.mxu1 %v260_v25  ;;  %v2837_v11 = vld [vmem:[#allocation2 + $0x1c8] sm:$0xff]  ;;  %v2857_v25 = vld [vmem:[#allocation2 + $0x18] sm:$0xff] }
  0x52   :  { %v383_v15 = vld [vmem:[#allocation5 + $0x6c0] sm:$0xff]  ;;  %458 = vmatmul.f32.gmra.mxu0 %v2794_v14  ;;  %523 = vmatmul.f32.gmra.mxu1 %v2798_v17  ;;  %v348_v12 = vld [vmem:[#allocation5 + $0x5a8] sm:$0xff] }
  0x53   :  { %v2796_v16 = vld [vmem:[#allocation2 + $0x160] sm:$0xff]  ;;  %637 = vmatpush.msrb.mxu3 %v383_v15  ;;  %702 = vmatpush.msrb.mxu0 %v192_v28  ;;  %v412_v13 = vld [vmem:[#allocation5 + $0x7a8] sm:$0xff]  ;;  %v2862_v28 = vld [vmem:[#allocation2 + $0x30] sm:$0xff] }
  0x54   :  { %v315_v18 = vld [vmem:[#allocation5 + $0x4a0] sm:$0xff]  ;;  %482 = vmatmul.f32.gmra.mxu2 %v2796_v16  ;;  %547 = vmatmul.f32.gmra.mxu3 %v2801_v20  ;;  %v2849_v21 = vld [vmem:[#allocation2 + $0x1e8] sm:$0xff] }
  0x55   :  { %v379_v19 = vld [vmem:[#allocation5 + $0x6a0] sm:$0xff]  ;;  %573 = vmatpush.msrb.mxu2 %v315_v18  ;;  %767 = vmatpush.msrb.mxu1 %v256_v29  ;;  %v2865_v29 = vld [vmem:[#allocation2 + $0x38] sm:$0xff] }
  0x56   :  { %v311_v22 = vld [vmem:[#allocation5 + $0x480] sm:$0xff]  ;;  %638 = vmatpush.msrb.mxu3 %v379_v19  ;;  %703 = vmatpush.msrb.mxu0 %v188_v38  ;;  %v2846_v19 = vld [vmem:[#allocation2 + $0xe8] sm:$0xff] }
  0x57   :  { %v375_v23 = vld [vmem:[#allocation5 + $0x680] sm:$0xff]  ;;  %574 = vmatpush.msrb.mxu2 %v311_v22  ;;  %768 = vmatpush.msrb.mxu1 %v252_v39  ;;  %v344_v22 = vld [vmem:[#allocation5 + $0x588] sm:$0xff]  ;;  %v2870_v39 = vld [vmem:[#allocation2 + $0x50] sm:$0xff] }
  0x58   :  { %v307_v26 = vld [vmem:[#allocation5 + $0x460] sm:$0xff]  ;;  %639 = vmatpush.msrb.mxu3 %v375_v23  ;;  %704 = vmatpush.msrb.mxu0 %v184_v43  ;;  %v408_v23 = vld [vmem:[#allocation5 + $0x788] sm:$0xff] }
  0x59   :  { %v371_v27 = vld [vmem:[#allocation5 + $0x660] sm:$0xff]  ;;  %575 = vmatpush.msrb.mxu2 %v307_v26  ;;  %769 = vmatpush.msrb.mxu1 %v248_v44  ;;  %v340_v26 = vld [vmem:[#allocation5 + $0x568] sm:$0xff]  ;;  %v2878_v44 = vld [vmem:[#allocation2 + $0x70] sm:$0xff] }
  0x5a   :  { %v2806_v30 = vld [vmem:[#allocation2 + $0x80] sm:$0xff]  ;;  %640 = vmatpush.msrb.mxu3 %v371_v27  ;;  %526 = vmatmul.f32.gmra.mxu1 %v2810_v37  ;;  %v404_v27 = vld [vmem:[#allocation5 + $0x768] sm:$0xff] }
  0x5b   :  { %v303_v31 = vld [vmem:[#allocation5 + $0x440] sm:$0xff]  ;;  %461 = vmatmul.f32.gmra.mxu0 %v2806_v30  ;;  %770 = vmatpush.msrb.mxu1 %v244_v51  ;;  %v400_v38 = vld [vmem:[#allocation5 + $0x748] sm:$0xff]  ;;  %v2886_v51 = vld [vmem:[#allocation2 + $0x90] sm:$0xff] }
  0x5c   :  { %v2808_v35 = vld [vmem:[#allocation2 + $0x180] sm:$0xff]  ;;  %576 = vmatpush.msrb.mxu2 %v303_v31  ;;  %550 = vmatmul.f32.gmra.mxu3 %v2813_v40  ;;  %v336_v31 = vld [vmem:[#allocation5 + $0x548] sm:$0xff] }
  0x5d   :  { %v299_v41 = vld [vmem:[#allocation5 + $0x420] sm:$0xff]  ;;  %485 = vmatmul.f32.gmra.mxu2 %v2808_v35  ;;  %705 = vmatpush.msrb.mxu0 %v180_v47  ;;  %v396_v43 = vld [vmem:[#allocation5 + $0x728] sm:$0xff] }
  0x5e   :  { %v367_v42 = vld [vmem:[#allocation5 + $0x640] sm:$0xff]  ;;  %577 = vmatpush.msrb.mxu2 %v299_v41  ;;  %771 = vmatpush.msrb.mxu1 %v240_v59  ;;  %v2873_v41 = vld [vmem:[#allocation2 + $0x58] sm:$0xff]  ;;  %v328_v47 = vld [vmem:[#allocation5 + $0x508] sm:$0xff] }
  0x5f   :  { %v295_v45 = vld [vmem:[#allocation5 + $0x400] sm:$0xff]  ;;  %641 = vmatpush.msrb.mxu3 %v367_v42  ;;  %706 = vmatpush.msrb.mxu0 %v176_v58  ;;  %v332_v42 = vld [vmem:[#allocation5 + $0x528] sm:$0xff]  ;;  %v2894_v59 = vld [vmem:[#allocation2 + $0xb0] sm:$0xff] }
  0x60   :  { %v363_v50 = vld [vmem:[#allocation5 + $0x620] sm:$0xff]  ;;  %578 = vmatpush.msrb.mxu2 %v295_v45  ;;  %772 = vmatpush.msrb.mxu1 %v236_v63  ;;  %v2881_v45 = vld [vmem:[#allocation2 + $0x78] sm:$0xff]  ;;  %v388_v58 = vld [vmem:[#allocation5 + $0x6e8] sm:$0xff] }
  0x61   :  { %v2818_v54 = vld [vmem:[#allocation2 + $0xa0] sm:$0xff]  ;;  %642 = vmatpush.msrb.mxu3 %v363_v50  ;;  %707 = vmatpush.msrb.mxu0 %v172_v61  ;;  %v392_v50 = vld [vmem:[#allocation5 + $0x708] sm:$0xff]  ;;  %v2897_v61 = vld [vmem:[#allocation2 + $0xb8] sm:$0xff] }
  0x62   :  { %v359_v55 = vld [vmem:[#allocation5 + $0x600] sm:$0xff]  ;;  %823 = vmatpush.msra.mxu2 %v356_v53  ;;  %529 = vmatmul.f32.gmra.mxu1 %v2822_v57  ;;  %v2889_v53 = vld [vmem:[#allocation2 + $0x98] sm:$0xff]  ;;  %v320_v63 = vld [vmem:[#allocation5 + $0x4c8] sm:$0xff] }
  0x63   :  { %v2820_v56 = vld [vmem:[#allocation2 + $0x1a0] sm:$0xff]  ;;  %464 = vmatmul.f32.gmra.mxu0 %v2818_v54  ;;  %643 = vmatpush.msrb.mxu3 %v359_v55  ;;  %v324_v55 = vld [vmem:[#allocation5 + $0x4e8] sm:$0xff] }
  0x64   :  { %553 = vmatmul.f32.gmra.mxu3 %v2825_v60  ;;  %824 = vmatpush.msra.mxu2 %v352_v2  ;;  %v2830_v8 = vld [vmem:[#allocation2 + $0xc0] sm:$0xff]  ;;  %v384_v2 = vld [vmem:[#allocation5 + $0x6c8] sm:$0xff] }
  0x65   :  { %488 = vmatmul.f32.gmra.mxu2 %v2820_v56  ;;  %888 = vmatpush.msra.mxu3 %v420_v3  ;;  %v2832_v9 = vld [vmem:[#allocation2 + $0x1c0] sm:$0xff]  ;;  %v2902_v3 = vld [vmem:[#allocation2 + $0xd0] sm:$0xff] }
  0x66   :  { %708 = vmatpush.msrb.mxu0 %v168_v5  ;;  %773 = vmatpush.msrb.mxu1 %v232_v6  ;;  %v2842_v15 = vld [vmem:[#allocation2 + $0xe0] sm:$0xff]  ;;  %v2905_v5 = vld [vmem:[#allocation2 + $0xd8] sm:$0xff]  ;;  %v316_v6 = vld [vmem:[#allocation5 + $0x4a8] sm:$0xff] }
  0x67   :  { %889 = vmatpush.msra.mxu3 %v416_v7  ;;  %825 = vmatpush.msra.mxu2 %v348_v12  ;;  %v2844_v18 = vld [vmem:[#allocation2 + $0x1e0] sm:$0xff]  ;;  %v380_v7 = vld [vmem:[#allocation5 + $0x6a8] sm:$0xff]  ;;  %v2910_v12 = vld [vmem:[#allocation2 + $0xf0] sm:$0xff] }
  0x69   :  { %890 = vmatpush.msra.mxu3 %v412_v13  ;;  %826 = vmatpush.msra.mxu2 %v344_v22  ;;  %v2913_v13 = vld [vmem:[#allocation2 + $0xf8] sm:$0xff]  ;;  %v312_v22 = vld [vmem:[#allocation5 + $0x488] sm:$0xff] }
  0x6a   :  { %532 = vmatmul.f32.gmra.mxu1 %v2834_v10 }
  0x6b   :  { %467 = vmatmul.f32.gmra.mxu0 %v2830_v8  ;;  %891 = vmatpush.msra.mxu3 %v408_v23  ;;  %v376_v23 = vld [vmem:[#allocation5 + $0x688] sm:$0xff] }
  0x6c   :  { %556 = vmatmul.f32.gmra.mxu3 %v2837_v11  ;;  %827 = vmatpush.msra.mxu2 %v340_v26 }
  0x6d   :  { %491 = vmatmul.f32.gmra.mxu2 %v2832_v9  ;;  %892 = vmatpush.msra.mxu3 %v404_v27  ;;  %v2920_v27 = vld [vmem:[#allocation7] sm:$0xf] }
  0x6e   :  { %828 = vmatpush.msra.mxu2 %v336_v31  ;;  %4475 = vst [vmem:[#allocation16_spill] sm:$0xff] %v2920_v27 }
  0x6f   :  { %893 = vmatpush.msra.mxu3 %v400_v38  ;;  %v2924_v38 = vld [vmem:[#allocation2 + $0x110] sm:$0xff] }
  0x70   :  { %829 = vmatpush.msra.mxu2 %v332_v42  ;;  %4476 = vst [vmem:[#allocation17_spill] sm:$0xff] %v2924_v38  ;;  %v2927_v42 = vld [vmem:[#allocation2 + $0x118] sm:$0xff] }
  0x71   :  { %894 = vmatpush.msra.mxu3 %v396_v43  ;;  %4477 = vst [vmem:[#allocation18_spill] sm:$0xff] %v2927_v42  ;;  %v2930_v43 = vperm.slane %v2920_v27, 0  ;;  %v217_v27 = vld [vmem:[#allocation5 + $0x190] sm:$0xff] }
  0x72   :  { %535 = vmatmul.f32.gmra.mxu1 %v2846_v19  ;;  %830 = vmatpush.msra.mxu2 %v328_v47  ;;  %v308_v47 = vld [vmem:[#allocation5 + $0x468] sm:$0xff] }
  0x73   :  { %470 = vmatmul.f32.gmra.mxu0 %v2842_v15  ;;  %895 = vmatpush.msra.mxu3 %v392_v50  ;;  %v229_v50 = vld [vmem:[#allocation5 + $0x1f0] sm:$0xff] }
  0x74   :  { %559 = vmatmul.f32.gmra.mxu3 %v2849_v21  ;;  %831 = vmatpush.msra.mxu2 %v324_v55  ;;  %v293_v55 = vld [vmem:[#allocation5 + $0x3f0] sm:$0xff] }
  0x75   :  { %494 = vmatmul.f32.gmra.mxu2 %v2844_v18  ;;  %896 = vmatpush.msra.mxu3 %v388_v58  ;;  %v372_v58 = vld [vmem:[#allocation5 + $0x668] sm:$0xff] }
  0x76   :  { %832 = vmatpush.msra.mxu2 %v320_v63  ;;  %953 = vmatpush.msra.mxu0 %v229_v50  ;;  %v225_v63 = vld [vmem:[#allocation5 + $0x1d0] sm:$0xff] }
  0x77   :  { %897 = vmatpush.msra.mxu3 %v384_v2  ;;  %1018 = vmatpush.msra.mxu1 %v293_v55  ;;  %v2940_v50 = vld [vmem:[#allocation2 + $0x130] sm:$0xff] }
  0x78   :  { %833 = vmatpush.msra.mxu2 %v316_v6  ;;  %954 = vmatpush.msra.mxu0 %v225_v63  ;;  %4478 = vst [vmem:[#allocation19_spill] sm:$0xff] %v2940_v50  ;;  %v304_v63 = vld [vmem:[#allocation5 + $0x448] sm:$0xff] }
  0x79   :  { %898 = vmatpush.msra.mxu3 %v380_v7 }
  0x7a   :  { %774 = vmatmul.f32.vlgmr.msrb.gmra.mxu1 %v2762_v34  ;;  %834 = vmatpush.msra.mxu2 %v312_v22  ;;  %v285_v22 = vld [vmem:[#allocation5 + $0x3b0] sm:$0xff] }
  0x7b   :  { %709 = vmatmul.f32.vlgmr.msrb.gmra.mxu0 %v2758_v32  ;;  %899 = vmatpush.msra.mxu3 %v376_v23 }
  0x7c   :  { %644 = vmatmul.f32.vlgmr.msrb.gmra.mxu3 %v2857_v25  ;;  %835 = vmatpush.msra.mxu2 %v308_v47 }
  0x7d   :  { %579 = vmatmul.f32.vlgmr.msrb.gmra.mxu2 %v2854_v24  ;;  %900 = vmatpush.msra.mxu3 %v372_v58  ;;  %v2945_v58 = vld [vmem:[#allocation2 + $0x138] sm:$0xff] }
  0x7e   :  { %4480 = vst [vmem:[#allocation21_spill] sm:$0xff] %v2945_v58  ;;  %836 = vmatpush.msra.mxu2 %v304_v63  ;;  %v205_v63 = vld [vmem:[#allocation5 + $0x130] sm:$0xff] }
  0x82   :  { %777 = vmatmul.f32.gmra.mxu1 %v2774_v49 }
  0x83   :  { %712 = vmatmul.f32.gmra.mxu0 %v2770_v46 }
  0x84   :  { %647 = vmatmul.f32.gmra.mxu3 %v2865_v29 }
  0x85   :  { %582 = vmatmul.f32.gmra.mxu2 %v2862_v28 }
  0x8a   :  { %780 = vmatmul.f32.gmra.mxu1 %v2786_v1 }
  0x8b   :  { %715 = vmatmul.f32.gmra.mxu0 %v2782_v62 }
  0x8c   :  { %650 = vmatmul.f32.gmra.mxu3 %v2873_v41 }
  0x8d   :  { %585 = vmatmul.f32.gmra.mxu2 %v2870_v39 }
  0x92   :  { %783 = vmatmul.f32.gmra.mxu1 %v2798_v17 }
  0x93   :  { %718 = vmatmul.f32.gmra.mxu0 %v2794_v14 }
  0x94   :  { %653 = vmatmul.f32.gmra.mxu3 %v2881_v45 }
  0x95   :  { %588 = vmatmul.f32.gmra.mxu2 %v2878_v44 }
  0x9a   :  { %786 = vmatmul.f32.gmra.mxu1 %v2810_v37 }
  0x9b   :  { %721 = vmatmul.f32.gmra.mxu0 %v2806_v30 }
  0x9c   :  { %656 = vmatmul.f32.gmra.mxu3 %v2889_v53 }
  0x9d   :  { %591 = vmatmul.f32.gmra.mxu2 %v2886_v51 }
  0xa2   :  { %789 = vmatmul.f32.gmra.mxu1 %v2822_v57 }
  0xa3   :  { %724 = vmatmul.f32.gmra.mxu0 %v2818_v54 }
  0xa4   :  { %659 = vmatmul.f32.gmra.mxu3 %v2897_v61 }
  0xa5   :  { %594 = vmatmul.f32.gmra.mxu2 %v2894_v59 }
  0xaa   :  { %792 = vmatmul.f32.gmra.mxu1 %v2834_v10 }
  0xab   :  { %727 = vmatmul.f32.gmra.mxu0 %v2830_v8 }
  0xac   :  { %662 = vmatmul.f32.gmra.mxu3 %v2905_v5 }
  0xad   :  { %597 = vmatmul.f32.gmra.mxu2 %v2902_v3 }
  0xb2   :  { %795 = vmatmul.f32.gmra.mxu1 %v2846_v19 }
  0xb3   :  { %730 = vmatmul.f32.gmra.mxu0 %v2842_v15 }
  0xb4   :  { %665 = vmatmul.f32.gmra.mxu3 %v2913_v13 }
  0xb5   :  { %600 = vmatmul.f32.gmra.mxu2 %v2910_v12 }
  0xb6   :  { %v2918_v26 = vpop.f32.mrf.mxu0  ;;  %v2922_v31 = vpop.f32.mrf.mxu1 }
  0xba   :  { %798 = vmatmul.f32.gmra.mxu1 %v2765_v36  ;;  %v221_v36 = vld [vmem:[#allocation5 + $0x1b0] sm:$0xff] }
  0xbb   :  { %733 = vmatmul.f32.gmra.mxu0 %v2760_v33  ;;  %v289_v33 = vld [vmem:[#allocation5 + $0x3d0] sm:$0xff] }
  0xbc   :  { %668 = vmatmul.f32.gmra.mxu3 %v2927_v42  ;;  %1019 = vmatpush.msra.mxu1 %v289_v33  ;;  %v281_v42 = vld [vmem:[#allocation5 + $0x390] sm:$0xff] }
  0xbd   :  { %603 = vmatmul.f32.gmra.mxu2 %v2924_v38  ;;  %v474_v2 = vpop.f32.mrf.mxu2  ;;  %v539_v47 = vpop.f32.mrf.mxu3  ;;  %955 = vmatpush.msra.mxu0 %v221_v36  ;;  %v213_v33 = vld [vmem:[#allocation5 + $0x170] sm:$0xff] }
  0xbe   :  { %v475_v6 = vadd.f32 %v474_v2, %v2930_v43  ;;  %v2936_v7 = vpop.f32.mrf.mxu0  ;;  %1020 = vmatpush.msra.mxu1 %v285_v22  ;;  %v277_v2 = vld [vmem:[#allocation5 + $0x370] sm:$0xff] }
  0xbf   :  { %v2938_v23 = vpop.f32.mrf.mxu1  ;;  %956 = vmatpush.msra.mxu0 %v217_v27  ;;  %v209_v36 = vld [vmem:[#allocation5 + $0x150] sm:$0xff] }
  0xc0   :  { %v2942_v55 = vadd.f32 %v539_v47, %v475_v6  ;;  %1021 = vmatpush.msra.mxu1 %v281_v42  ;;  %v368_v6 = vld [vmem:[#allocation5 + $0x648] sm:$0xff]  ;;  %v273_v22 = vld [vmem:[#allocation5 + $0x350] sm:$0xff] }
  0xc1   :  { %957 = vmatpush.msra.mxu0 %v213_v33  ;;  %901 = vmatpush.msra.mxu3 %v368_v6  ;;  %v2955_v27 = vld [vmem:[#allocation2 + $0x150] sm:$0xff]  ;;  %v2960_v33 = vld [vmem:[#allocation2 + $0x158] sm:$0xff]  ;;  %v300_v6 = vld [vmem:[#allocation5 + $0x428] sm:$0xff] }
  0xc2   :  { %4479 = vst [vmem:[#allocation20_spill] sm:$0xff] %v2942_v55  ;;  %801 = vmatmul.f32.gmra.mxu1 %v2777_v52  ;;  %v269_v52 = vld [vmem:[#allocation5 + $0x330] sm:$0xff]  ;;  %837 = vmatpush.msra.mxu2 %v300_v6 }
  0xc3   :  { %736 = vmatmul.f32.gmra.mxu0 %v2772_v48  ;;  %1022 = vmatpush.msra.mxu1 %v277_v2  ;;  %4481 = vst [vmem:[#allocation22_spill] sm:$0xff] %v2955_v27  ;;  %v201_v2 = vld [vmem:[#allocation5 + $0x110] sm:$0xff] }
  0xc4   :  { %671 = vmatmul.f32.gmra.mxu3 %v2945_v58  ;;  %958 = vmatpush.msra.mxu0 %v209_v36  ;;  %v265_v58 = vld [vmem:[#allocation5 + $0x310] sm:$0xff]  ;;  %4483 = vst [vmem:[#allocation24_spill] sm:$0xff] %v2960_v33  ;;  %v364_v36 = vld [vmem:[#allocation5 + $0x628] sm:$0xff] }
  0xc5   :  { %606 = vmatmul.f32.gmra.mxu2 %v2940_v50  ;;  %v477_v47 = vpop.f32.mrf.mxu2  ;;  %1023 = vmatpush.msra.mxu1 %v273_v22  ;;  %v257_v22 = vld [vmem:[#allocation5 + $0x2d0] sm:$0xff] }
  0xc6   :  { %v478_v48 = vadd.f32 %v477_v47, %v2930_v43  ;;  %v2951_v55 = vpop.f32.mrf.mxu0  ;;  %v542_v38 = vpop.f32.mrf.mxu3  ;;  %v261_v47 = vld [vmem:[#allocation5 + $0x2f0] sm:$0xff]  ;;  %959 = vmatpush.msra.mxu0 %v205_v63  ;;  %902 = vmatpush.msra.mxu3 %v364_v36  ;;  %v296_v36 = vld [vmem:[#allocation5 + $0x408] sm:$0xff] }
  0xc7   :  { %v2953_v50 = vpop.f32.mrf.mxu1  ;;  %1024 = vmatpush.msra.mxu1 %v269_v52  ;;  %v2970_v63 = vld [vmem:[#allocation2 + $0x170] sm:$0xff]  ;;  %838 = vmatpush.msra.mxu2 %v296_v36 }
  0xc8   :  { %v2957_v42 = vadd.f32 %v542_v38, %v478_v48  ;;  %v197_v38 = vld [vmem:[#allocation5 + $0xf0] sm:$0xff]  ;;  %960 = vmatpush.msra.mxu0 %v201_v2  ;;  %4484 = vst [vmem:[#allocation25_spill] sm:$0xff] %v2970_v63  ;;  %v2975_v2 = vld [vmem:[#allocation2 + $0x178] sm:$0xff] }
  0xc9   :  { %1025 = vmatpush.msra.mxu1 %v265_v58  ;;  %v193_v6 = vld [vmem:[#allocation5 + $0xd0] sm:$0xff]  ;;  %4486 = vst [vmem:[#allocation27_spill] sm:$0xff] %v2975_v2 }
  0xca   :  { %4482 = vst [vmem:[#allocation23_spill] sm:$0xff] %v2957_v42  ;;  %804 = vmatmul.f32.gmra.mxu1 %v2789_v4  ;;  %v253_v4 = vld [vmem:[#allocation5 + $0x2b0] sm:$0xff]  ;;  %961 = vmatpush.msra.mxu0 %v197_v38  ;;  %v360_v38 = vld [vmem:[#allocation5 + $0x608] sm:$0xff] }
  0xcb   :  { %739 = vmatmul.f32.gmra.mxu0 %v2784_v0  ;;  %1026 = vmatpush.msra.mxu1 %v261_v47  ;;  %v189_v47 = vld [vmem:[#allocation5 + $0xb0] sm:$0xff] }
  0xcc   :  { %674 = vmatmul.f32.gmra.mxu3 %v2960_v33  ;;  %v249_v33 = vld [vmem:[#allocation5 + $0x290] sm:$0xff]  ;;  %962 = vmatpush.msra.mxu0 %v193_v6 }
  0xcd   :  { %609 = vmatmul.f32.gmra.mxu2 %v2955_v27  ;;  %1027 = vmatpush.msra.mxu1 %v257_v22  ;;  %v241_v22 = vld [vmem:[#allocation5 + $0x250] sm:$0xff] }
  0xce   :  { %v480_v48 = vpop.f32.mrf.mxu2  ;;  %v545_v42 = vpop.f32.mrf.mxu3  ;;  %963 = vmatpush.msra.mxu0 %v189_v47  ;;  %903 = vmatpush.msra.mxu3 %v360_v38  ;;  %v2985_v6 = vld [vmem:[#allocation2 + $0x190] sm:$0xff]  ;;  %v2990_v47 = vld [vmem:[#allocation2 + $0x198] sm:$0xff] }
  0xcf   :  { %v481_v0 = vadd.f32 %v480_v48, %v2930_v43  ;;  %v2966_v52 = vpop.f32.mrf.mxu0  ;;  %v2968_v27 = vpop.f32.mrf.mxu1  ;;  %1028 = vmatpush.msra.mxu1 %v253_v4  ;;  %v245_v48 = vld [vmem:[#allocation5 + $0x270] sm:$0xff] }
  0xd0   :  { %v181_v36 = vld [vmem:[#allocation5 + $0x70] sm:$0xff] }
  0xd1   :  { %v2972_v58 = vadd.f32 %v545_v42, %v481_v0  ;;  %1029 = vmatpush.msra.mxu1 %v249_v33  ;;  %v185_v42 = vld [vmem:[#allocation5 + $0x90] sm:$0xff] }
  0xd2   :  { %807 = vmatmul.f32.gmra.mxu1 %v2801_v20  ;;  %v237_v20 = vld [vmem:[#allocation5 + $0x230] sm:$0xff]  ;;  %964 = vmatpush.msra.mxu0 %v185_v42 }
  0xd3   :  { %4485 = vst [vmem:[#allocation26_spill] sm:$0xff] %v2972_v58  ;;  %742 = vmatmul.f32.gmra.mxu0 %v2796_v16  ;;  %1030 = vmatpush.msra.mxu1 %v245_v48  ;;  %v177_v48 = vld [vmem:[#allocation5 + $0x50] sm:$0xff] }
  0xd4   :  { %677 = vmatmul.f32.gmra.mxu3 %v2975_v2  ;;  %v233_v2 = vld [vmem:[#allocation5 + $0x210] sm:$0xff]  ;;  %965 = vmatpush.msra.mxu0 %v181_v36 }
  0xd5   :  { %612 = vmatmul.f32.gmra.mxu2 %v2970_v63  ;;  %1031 = vmatpush.msra.mxu1 %v241_v22  ;;  %v357_v38 = vld [vmem:[#allocation5 + $0x5f0] sm:$0xff] }
  0xd6   :  { %v173_v42 = vld [vmem:[#allocation5 + $0x30] sm:$0xff]  ;;  %1083 = vmatpush.msrb.mxu2 %v357_v38  ;;  %966 = vmatpush.msra.mxu0 %v177_v48  ;;  %v3005_v38 = vld [vmem:[#allocation2 + $0x1b8] sm:$0xff] }
  0xd7   :  { %v483_v0 = vpop.f32.mrf.mxu2  ;;  %v2983_v63 = vpop.f32.mrf.mxu1  ;;  %1032 = vmatpush.msra.mxu1 %v237_v20  ;;  %4489 = vst [vmem:[#allocation30_spill] sm:$0xff] %v3005_v38  ;;  %v353_v48 = vld [vmem:[#allocation5 + $0x5d0] sm:$0xff] }
  0xd8   :  { %v484_v16 = vadd.f32 %v483_v0, %v2930_v43  ;;  %v2981_v4 = vpop.f32.mrf.mxu0  ;;  %v548_v58 = vpop.f32.mrf.mxu3  ;;  %967 = vmatpush.msra.mxu0 %v173_v42  ;;  %1084 = vmatpush.msrb.mxu2 %v353_v48  ;;  %v413_v48 = vld [vmem:[#allocation5 + $0x7b0] sm:$0xff] }
  0xd9   :  { %1033 = vmatpush.msra.mxu1 %v233_v2  ;;  %v169_v2 = vld [vmem:[#allocation5 + $0x10] sm:$0xff] }
  0xda   :  { %v2987_v33 = vadd.f32 %v548_v58, %v484_v16  ;;  %810 = vmatmul.f32.gmra.mxu1 %v2813_v40  ;;  %v421_v58 = vld [vmem:[#allocation5 + $0x7f0] sm:$0xff]  ;;  %968 = vmatpush.msra.mxu0 %v169_v2 }
  0xdb   :  { %745 = vmatmul.f32.gmra.mxu0 %v2808_v35  ;;  %1148 = vmatpush.msrb.mxu3 %v421_v58  ;;  %v3000_v40 = vld [vmem:[#allocation2 + $0x1b0] sm:$0xff] }
  0xdc   :  { %680 = vmatmul.f32.gmra.mxu3 %v2990_v47  ;;  %4487 = vst [vmem:[#allocation28_spill] sm:$0xff] %v3000_v40  ;;  %v417_v58 = vld [vmem:[#allocation5 + $0x7d0] sm:$0xff] }
  0xdd   :  { %615 = vmatmul.f32.gmra.mxu2 %v2985_v6  ;;  %1149 = vmatpush.msrb.mxu3 %v417_v58  ;;  %v349_v2 = vld [vmem:[#allocation5 + $0x5b0] sm:$0xff] }
  0xde   :  { %1085 = vmatpush.msrb.mxu2 %v349_v2  ;;  %v345_v2 = vld [vmem:[#allocation5 + $0x590] sm:$0xff] }
  0xdf   :  { %v2998_v16 = vpop.f32.mrf.mxu1  ;;  %1150 = vmatpush.msrb.mxu3 %v413_v48  ;;  %v409_v48 = vld [vmem:[#allocation5 + $0x790] sm:$0xff] }
  0xe0   :  { %v486_v22 = vpop.f32.mrf.mxu2  ;;  %v2996_v0 = vpop.f32.mrf.mxu0  ;;  %1086 = vmatpush.msrb.mxu2 %v345_v2  ;;  %v341_v2 = vld [vmem:[#allocation5 + $0x570] sm:$0xff] }
  0xe1   :  { %v487_v35 = vadd.f32 %v486_v22, %v2930_v43  ;;  %v551_v20 = vpop.f32.mrf.mxu3  ;;  %1151 = vmatpush.msrb.mxu3 %v409_v48 }
  0xe2   :  { %813 = vmatmul.f32.gmra.mxu1 %v2825_v60  ;;  %v3020_v60 = vld [vmem:[#allocation2 + $0x1d8] sm:$0xff]  ;;  %1087 = vmatpush.msrb.mxu2 %v341_v2 }
  0xe3   :  { %v3002_v36 = vadd.f32 %v551_v20, %v487_v35  ;;  %748 = vmatmul.f32.gmra.mxu0 %v2820_v56  ;;  %4491 = vst [vmem:[#allocation32_spill] sm:$0xff] %v3020_v60 }
  0xe4   :  { %683 = vmatmul.f32.gmra.mxu3 %v3005_v38 }
  0xe5   :  { %4488 = vst [vmem:[#allocation29_spill] sm:$0xff] %v3002_v36  ;;  %618 = vmatmul.f32.gmra.mxu2 %v3000_v40  ;;  %v3015_v36 = vld [vmem:[#allocation2 + $0x1d0] sm:$0xff] }
  0xe7   :  { %v3013_v20 = vpop.f32.mrf.mxu1 }
  0xe8   :  { %v489_v22 = vpop.f32.mrf.mxu2  ;;  %v3011_v35 = vpop.f32.mrf.mxu0 }
  0xe9   :  { %v490_v42 = vadd.f32 %v489_v22, %v2930_v43  ;;  %v554_v56 = vpop.f32.mrf.mxu3 }
  0xea   :  { %816 = vmatmul.f32.gmra.mxu1 %v2837_v11  ;;  %v3035_v11 = vld [vmem:[#allocation2 + $0x1f8] sm:$0xff] }
  0xeb   :  { %v3017_v40 = vadd.f32 %v554_v56, %v490_v42  ;;  %751 = vmatmul.f32.gmra.mxu0 %v2832_v9  ;;  %v3030_v56 = vld [vmem:[#allocation2 + $0x1f0] sm:$0xff] }
  0xec   :  { %686 = vmatmul.f32.gmra.mxu3 %v3020_v60  ;;  %4492 = vst [vmem:[#allocation33_spill] sm:$0xff] %v3030_v56  ;;  %v451_v60 = vadd.f32 %v2918_v26, %v2930_v43  ;;  %v405_v26 = vld [vmem:[#allocation5 + $0x770] sm:$0xff] }
  0xed   :  { %4490 = vst [vmem:[#allocation31_spill] sm:$0xff] %v3017_v40  ;;  %621 = vmatmul.f32.gmra.mxu2 %v3015_v36  ;;  %1152 = vmatpush.msrb.mxu3 %v405_v26 }
  0xef   :  { %v3028_v42 = vpop.f32.mrf.mxu1 }
  0xf0   :  { %v492_v58 = vpop.f32.mrf.mxu2  ;;  %v3026_v38 = vpop.f32.mrf.mxu0 }
  0xf1   :  { %v493_v22 = vadd.f32 %v492_v58, %v2930_v43  ;;  %v557_v9 = vpop.f32.mrf.mxu3 }
  0xf2   :  { %819 = vmatmul.f32.gmra.mxu1 %v2849_v21  ;;  %v516_v21 = vadd.f32 %v2922_v31, %v451_v60  ;;  %v457_v60 = vadd.f32 %v2951_v55, %v2930_v43 }
  0xf3   :  { %v3032_v40 = vadd.f32 %v557_v9, %v493_v22  ;;  %754 = vmatmul.f32.gmra.mxu0 %v2844_v18 }
  0xf4   :  { %689 = vmatmul.f32.gmra.mxu3 %v3035_v11 }
  0xf5   :  { %4493 = vst [vmem:[#allocation34_spill] sm:$0xff] %v3032_v40  ;;  %624 = vmatmul.f32.gmra.mxu2 %v3030_v56 }
  0xf7   :  { %v3045_v40 = vpop.f32.mrf.mxu1 }
  0xf8   :  { %v495_v58 = vpop.f32.mrf.mxu2  ;;  %v3043_v9 = vpop.f32.mrf.mxu0  ;;  %4494 = vst [vmem:[#allocation35_spill] sm:$0xff] %v3045_v40 }
  0xf9   :  { %v496_v22 = vadd.f32 %v495_v58, %v2930_v43  ;;  %v560_v18 = vpop.f32.mrf.mxu3  ;;  %v454_v58 = vadd.f32 %v2936_v7, %v2930_v43 }
  0xfa   :  { %1034 = vmatmul.f32.vlgmr.msra.gmra.mxu1 %v2762_v34 }
  0xfb   :  { %v3047_v56 = vadd.f32 %v560_v18, %v496_v22  ;;  %969 = vmatmul.f32.vlgmr.msra.gmra.mxu0 %v2758_v32  ;;  %v519_v34 = vadd.f32 %v2938_v23, %v454_v58 }
  0xfc   :  { %904 = vmatmul.f32.vlgmr.msra.gmra.mxu3 %v2857_v25  ;;  %v401_v25 = vld [vmem:[#allocation5 + $0x750] sm:$0xff] }
  0xfd   :  { %839 = vmatmul.f32.vlgmr.msra.gmra.mxu2 %v2854_v24  ;;  %v337_v24 = vld [vmem:[#allocation5 + $0x550] sm:$0xff]  ;;  %1153 = vmatpush.msrb.mxu3 %v401_v25 }
  0xfe   :  { %1088 = vmatpush.msrb.mxu2 %v337_v24 }
  0xff   :  { %v3058_v40 = vpop.f32.mrf.mxu1 }
 0x100   :  { %v580_v48 = vpop.f32.mrf.mxu2  ;;  %v3056_v18 = vpop.f32.mrf.mxu0 }
 0x101   :  { %v581_v22 = vadd.f32 %v580_v48, %v516_v21  ;;  %v645_v32 = vpop.f32.mrf.mxu3  ;;  %v460_v48 = vadd.f32 %v2966_v52, %v2930_v43 }
 0x102   :  { %1037 = vmatmul.f32.gmra.mxu1 %v2774_v49  ;;  %v522_v49 = vadd.f32 %v2953_v50, %v457_v60  ;;  %v466_v60 = vadd.f32 %v2996_v0, %v2930_v43 }
 0x103   :  { %v3060_v31 = vadd.f32 %v645_v32, %v581_v22  ;;  %972 = vmatmul.f32.gmra.mxu0 %v2770_v46 }
 0x104   :  { %907 = vmatmul.f32.gmra.mxu3 %v2865_v29  ;;  %v397_v29 = vld [vmem:[#allocation5 + $0x730] sm:$0xff] }
 0x105   :  { %842 = vmatmul.f32.gmra.mxu2 %v2862_v28  ;;  %v333_v28 = vld [vmem:[#allocation5 + $0x530] sm:$0xff]  ;;  %1154 = vmatpush.msrb.mxu3 %v397_v29 }
 0x106   :  { %1089 = vmatpush.msrb.mxu2 %v333_v28  ;;  %v469_v28 = vadd.f32 %v3011_v35, %v2930_v43 }
 0x107   :  { %v3071_v26 = vpop.f32.mrf.mxu1 }
 0x108   :  { %v583_v7 = vpop.f32.mrf.mxu2  ;;  %v3069_v2 = vpop.f32.mrf.mxu0 }
 0x109   :  { %v584_v21 = vadd.f32 %v583_v7, %v519_v34  ;;  %v648_v46 = vpop.f32.mrf.mxu3  ;;  %v463_v34 = vadd.f32 %v2981_v4, %v2930_v43 }
 0x10a   :  { %1040 = vmatmul.f32.gmra.mxu1 %v2786_v1  ;;  %v525_v1 = vadd.f32 %v2968_v27, %v460_v48 }
 0x10b   :  { %v3073_v23 = vadd.f32 %v648_v46, %v584_v21  ;;  %975 = vmatmul.f32.gmra.mxu0 %v2782_v62 }
 0x10c   :  { %910 = vmatmul.f32.gmra.mxu3 %v2873_v41  ;;  %v393_v41 = vld [vmem:[#allocation5 + $0x710] sm:$0xff] }
 0x10d   :  { %4495 = vst [vmem:[#allocation36_spill] sm:$0xff] %v3073_v23  ;;  %845 = vmatmul.f32.gmra.mxu2 %v2870_v39  ;;  %v329_v39 = vld [vmem:[#allocation5 + $0x510] sm:$0xff]  ;;  %1155 = vmatpush.msrb.mxu3 %v393_v41 }
 0x10e   :  { %1090 = vmatpush.msrb.mxu2 %v329_v39  ;;  %v3292_v23 = vld [vmem:[#allocation2 + $0x30] sm:$0xff] }
 0x10f   :  { %v3084_v32 = vpop.f32.mrf.mxu1 }
 0x110   :  { %v586_v55 = vpop.f32.mrf.mxu2  ;;  %v3082_v22 = vpop.f32.mrf.mxu0 }
 0x111   :  { %v587_v58 = vadd.f32 %v586_v55, %v522_v49  ;;  %v651_v62 = vpop.f32.mrf.mxu3 }
 0x112   :  { %1043 = vmatmul.f32.gmra.mxu1 %v2798_v17  ;;  %v528_v17 = vadd.f32 %v2983_v63, %v463_v34 }
 0x113   :  { %v3086_v50 = vadd.f32 %v651_v62, %v587_v58  ;;  %978 = vmatmul.f32.gmra.mxu0 %v2794_v14  ;;  %v472_v58 = vadd.f32 %v3026_v38, %v2930_v43 }
 0x114   :  { %913 = vmatmul.f32.gmra.mxu3 %v2881_v45  ;;  %v389_v45 = vld [vmem:[#allocation5 + $0x6f0] sm:$0xff] }
 0x115   :  { %4496 = vst [vmem:[#allocation37_spill] sm:$0xff] %v3086_v50  ;;  %848 = vmatmul.f32.gmra.mxu2 %v2878_v44  ;;  %v325_v44 = vld [vmem:[#allocation5 + $0x4f0] sm:$0xff]  ;;  %1156 = vmatpush.msrb.mxu3 %v389_v45  ;;  %v226_v45 = vld [vmem:[#allocation5 + $0x1d8] sm:$0xff] }
 0x116   :  { %1091 = vmatpush.msrb.mxu2 %v325_v44  ;;  %v373_v44 = vld [vmem:[#allocation5 + $0x670] sm:$0xff] }
 0x117   :  { %v3097_v7 = vpop.f32.mrf.mxu1 }
 0x118   :  { %v589_v52 = vpop.f32.mrf.mxu2  ;;  %v3095_v25 = vpop.f32.mrf.mxu0 }
 0x119   :  { %v590_v24 = vadd.f32 %v589_v52, %v525_v1  ;;  %v654_v14 = vpop.f32.mrf.mxu3 }
 0x11a   :  { %1046 = vmatmul.f32.gmra.mxu1 %v2810_v37  ;;  %v531_v37 = vadd.f32 %v2998_v16, %v466_v60 }
 0x11b   :  { %v3099_v27 = vadd.f32 %v654_v14, %v590_v24  ;;  %981 = vmatmul.f32.gmra.mxu0 %v2806_v30  ;;  %v230_v24 = vld [vmem:[#allocation5 + $0x1f8] sm:$0xff] }
 0x11c   :  { %916 = vmatmul.f32.gmra.mxu3 %v2889_v53  ;;  %v385_v53 = vld [vmem:[#allocation5 + $0x6d0] sm:$0xff]  ;;  %v294_v14 = vld [vmem:[#allocation5 + $0x3f8] sm:$0xff]  ;;  %1213 = vmatpush.msrb.mxu0 %v230_v24 }
 0x11d   :  { %4497 = vst [vmem:[#allocation38_spill] sm:$0xff] %v3099_v27  ;;  %851 = vmatmul.f32.gmra.mxu2 %v2886_v51  ;;  %v321_v51 = vld [vmem:[#allocation5 + $0x4d0] sm:$0xff]  ;;  %1157 = vmatpush.msrb.mxu3 %v385_v53  ;;  %v286_v53 = vld [vmem:[#allocation5 + $0x3b8] sm:$0xff] }
 0x11e   :  { %1092 = vmatpush.msrb.mxu2 %v321_v51  ;;  %1278 = vmatpush.msrb.mxu1 %v294_v14  ;;  %v222_v51 = vld [vmem:[#allocation5 + $0x1b8] sm:$0xff] }
 0x11f   :  { %v3110_v49 = vpop.f32.mrf.mxu1  ;;  %1214 = vmatpush.msrb.mxu0 %v226_v45  ;;  %v270_v24 = vld [vmem:[#allocation5 + $0x338] sm:$0xff] }
 0x120   :  { %v592_v4 = vpop.f32.mrf.mxu2  ;;  %v3108_v46 = vpop.f32.mrf.mxu0  ;;  %v206_v45 = vld [vmem:[#allocation5 + $0x138] sm:$0xff] }
 0x121   :  { %v593_v21 = vadd.f32 %v592_v4, %v528_v17  ;;  %v657_v30 = vpop.f32.mrf.mxu3  ;;  %v4503_v17 = vld [vmem:[#allocation18_spill] sm:$0xff]  ;;  %1215 = vmatpush.msrb.mxu0 %v222_v51 }
 0x122   :  { %1049 = vmatmul.f32.gmra.mxu1 %v2822_v57  ;;  %v534_v57 = vadd.f32 %v3013_v20, %v469_v28  ;;  %v290_v4 = vld [vmem:[#allocation5 + $0x3d8] sm:$0xff] }
 0x123   :  { %v3112_v63 = vadd.f32 %v657_v30, %v593_v21  ;;  %984 = vmatmul.f32.gmra.mxu0 %v2818_v54  ;;  %v4504_v21 = vld [vmem:[#allocation20_spill] sm:$0xff]  ;;  %1279 = vmatpush.msrb.mxu1 %v290_v4  ;;  %v266_v4 = vld [vmem:[#allocation5 + $0x318] sm:$0xff] }
 0x124   :  { %919 = vmatmul.f32.gmra.mxu3 %v2897_v61  ;;  %v381_v61 = vld [vmem:[#allocation5 + $0x6b0] sm:$0xff]  ;;  %v202_v51 = vld [vmem:[#allocation5 + $0x118] sm:$0xff] }
 0x125   :  { %4498 = vst [vmem:[#allocation39_spill] sm:$0xff] %v3112_v63  ;;  %854 = vmatmul.f32.gmra.mxu2 %v2894_v59  ;;  %v317_v59 = vld [vmem:[#allocation5 + $0x4b0] sm:$0xff]  ;;  %1158 = vmatpush.msrb.mxu3 %v381_v61  ;;  %v4506_v61 = vld [vmem:[#allocation19_spill] sm:$0xff] }
 0x126   :  { %1093 = vmatpush.msrb.mxu2 %v317_v59  ;;  %1280 = vmatpush.msrb.mxu1 %v286_v53  ;;  %v3166_v59 = vld [vmem:[#allocation2 + $0x120] sm:$0xff]  ;;  %v301_v53 = vld [vmem:[#allocation5 + $0x430] sm:$0xff] }
 0x127   :  { %v3123_v48 = vpop.f32.mrf.mxu1  ;;  %v2487_v63 = vld [vmem:[#allocation2] sm:$0xff] }
 0x128   :  { %v595_v0 = vpop.f32.mrf.mxu2  ;;  %v3121_v55 = vpop.f32.mrf.mxu0 }
 0x129   :  { %v596_v29 = vadd.f32 %v595_v0, %v531_v37  ;;  %v660_v54 = vpop.f32.mrf.mxu3 }
 0x12a   :  { %1052 = vmatmul.f32.gmra.mxu1 %v2834_v10  ;;  %v537_v10 = vadd.f32 %v3028_v42, %v472_v58  ;;  %v3151_v42 = vld [vmem:[#allocation2 + $0x100] sm:$0xff]  ;;  %v305_v58 = vld [vmem:[#allocation5 + $0x450] sm:$0xff] }
 0x12b   :  { %v3125_v16 = vadd.f32 %v660_v54, %v596_v29  ;;  %987 = vmatmul.f32.gmra.mxu0 %v2830_v8  ;;  %v218_v54 = vld [vmem:[#allocation5 + $0x198] sm:$0xff] }
 0x12c   :  { %922 = vmatmul.f32.gmra.mxu3 %v2905_v5  ;;  %v377_v5 = vld [vmem:[#allocation5 + $0x690] sm:$0xff]  ;;  %1216 = vmatpush.msrb.mxu0 %v218_v54  ;;  %v4511_v54 = vld [vmem:[#allocation24_spill] sm:$0xff] }
 0x12d   :  { %4499 = vst [vmem:[#allocation40_spill] sm:$0xff] %v3125_v16  ;;  %857 = vmatmul.f32.gmra.mxu2 %v2902_v3  ;;  %v313_v3 = vld [vmem:[#allocation5 + $0x490] sm:$0xff]  ;;  %1159 = vmatpush.msrb.mxu3 %v377_v5  ;;  %v210_v5 = vld [vmem:[#allocation5 + $0x158] sm:$0xff] }
 0x12e   :  { %1094 = vmatpush.msrb.mxu2 %v313_v3  ;;  %v369_v3 = vld [vmem:[#allocation5 + $0x650] sm:$0xff] }
 0x12f   :  { %v3136_v39 = vpop.f32.mrf.mxu1  ;;  %1160 = vmatpush.msrb.mxu3 %v373_v44 }
 0x130   :  { %v598_v35 = vpop.f32.mrf.mxu2  ;;  %v3134_v1 = vpop.f32.mrf.mxu0 }
 0x131   :  { %v599_v62 = vadd.f32 %v598_v35, %v534_v57  ;;  %v663_v8 = vpop.f32.mrf.mxu3  ;;  %v282_v57 = vld [vmem:[#allocation5 + $0x398] sm:$0xff]  ;;  %v3170_v35 = vld [vmem:[#allocation2 + $0x128] sm:$0xff]  ;;  %1161 = vmatpush.msrb.mxu3 %v369_v3 }
 0x132   :  { %1055 = vmatmul.f32.gmra.mxu1 %v2846_v19  ;;  %v4502_v19 = vld [vmem:[#allocation17_spill] sm:$0xff] }
 0x133   :  { %v3138_v20 = vadd.f32 %v663_v8, %v599_v62  ;;  %990 = vmatmul.f32.gmra.mxu0 %v2842_v15  ;;  %v214_v62 = vld [vmem:[#allocation5 + $0x178] sm:$0xff]  ;;  %1281 = vmatpush.msrb.mxu1 %v282_v57 }
 0x134   :  { %925 = vmatmul.f32.gmra.mxu3 %v2913_v13  ;;  %v309_v13 = vld [vmem:[#allocation5 + $0x470] sm:$0xff]  ;;  %v278_v8 = vld [vmem:[#allocation5 + $0x378] sm:$0xff]  ;;  %1217 = vmatpush.msrb.mxu0 %v214_v62 }
 0x135   :  { %4500 = vst [vmem:[#allocation41_spill] sm:$0xff] %v3138_v20  ;;  %860 = vmatmul.f32.gmra.mxu2 %v2910_v12  ;;  %v3155_v12 = vld [vmem:[#allocation2 + $0x108] sm:$0xff]  ;;  %1282 = vmatpush.msrb.mxu1 %v278_v8  ;;  %v198_v57 = vld [vmem:[#allocation5 + $0xf8] sm:$0xff] }
 0x136   :  { %1095 = vmatpush.msrb.mxu2 %v309_v13  ;;  %1218 = vmatpush.msrb.mxu0 %v210_v5  ;;  %v4512_v8 = vld [vmem:[#allocation26_spill] sm:$0xff]  ;;  %v3263_v20 = vld [vmem:[#allocation2 + $0x1e8] sm:$0xff] }
 0x137   :  { %v3147_v34 = vpop.f32.mrf.mxu1  ;;  %v254_v5 = vld [vmem:[#allocation5 + $0x2b8] sm:$0xff] }
 0x138   :  { %v601_v43 = vpop.f32.mrf.mxu2  ;;  %v3145_v41 = vpop.f32.mrf.mxu0  ;;  %1096 = vmatpush.msrb.mxu2 %v305_v58  ;;  %1219 = vmatpush.msrb.mxu0 %v206_v45  ;;  %v258_v58 = vld [vmem:[#allocation5 + $0x2d8] sm:$0xff]  ;;  %v4514_v45 = vld [vmem:[#allocation25_spill] sm:$0xff] }
 0x139   :  { %v602_v38 = vadd.f32 %v601_v43, %v537_v10  ;;  %v666_v52 = vpop.f32.mrf.mxu3  ;;  %v4507_v10 = vld [vmem:[#allocation21_spill] sm:$0xff]  ;;  %v274_v43 = vld [vmem:[#allocation5 + $0x358] sm:$0xff] }
 0x13a   :  { %1058 = vmatmul.f32.gmra.mxu1 %v3155_v12  ;;  %1097 = vmatpush.msrb.mxu2 %v301_v53  ;;  %v246_v53 = vld [vmem:[#allocation5 + $0x278] sm:$0xff] }
 0x13b   :  { %v3149_v15 = vadd.f32 %v666_v52, %v602_v38  ;;  %993 = vmatmul.f32.gmra.mxu0 %v3151_v42  ;;  %v4508_v52 = vld [vmem:[#allocation23_spill] sm:$0xff]  ;;  %1283 = vmatpush.msrb.mxu1 %v274_v43 }
 0x13c   :  { %928 = vmatmul.f32.gmra.mxu3 %v4503_v17  ;;  %1220 = vmatpush.msrb.mxu0 %v202_v51  ;;  %v297_v51 = vld [vmem:[#allocation5 + $0x410] sm:$0xff] }
 0x13d   :  { %4501 = vst [vmem:[#allocation42_spill] sm:$0xff] %v3149_v15  ;;  %863 = vmatmul.f32.gmra.mxu2 %v4502_v19  ;;  %1284 = vmatpush.msrb.mxu1 %v270_v24  ;;  %v250_v24 = vld [vmem:[#allocation5 + $0x298] sm:$0xff]  ;;  %v4526_v15 = vld [vmem:[#allocation16_spill] sm:$0xff] }
 0x13e   :  { %1221 = vmatpush.msrb.mxu0 %v198_v57  ;;  %1098 = vmatpush.msrb.mxu2 %v297_v51  ;;  %v361_v57 = vld [vmem:[#allocation5 + $0x610] sm:$0xff]  ;;  %v3211_v51 = vld [vmem:[#allocation2 + $0x180] sm:$0xff] }
 0x13f   :  { %v3162_v28 = vpop.f32.mrf.mxu1  ;;  %1285 = vmatpush.msrb.mxu1 %v266_v4  ;;  %v3200_v4 = vld [vmem:[#allocation2 + $0x168] sm:$0xff] }
 0x140   :  { %v604_v60 = vpop.f32.mrf.mxu2  ;;  %v3160_v37 = vpop.f32.mrf.mxu0 }
 0x141   :  { %v605_v30 = vadd.f32 %v604_v60, %v4504_v21  ;;  %v669_v0 = vpop.f32.mrf.mxu3  ;;  %v3181_v60 = vld [vmem:[#allocation2 + $0x140] sm:$0xff]  ;;  %v4510_v21 = vld [vmem:[#allocation22_spill] sm:$0xff] }
 0x142   :  { %1061 = vmatmul.f32.gmra.mxu1 %v3170_v35 }
 0x143   :  { %v3164_v29 = vadd.f32 %v669_v0, %v605_v30  ;;  %996 = vmatmul.f32.gmra.mxu0 %v3166_v59  ;;  %v3185_v30 = vld [vmem:[#allocation2 + $0x148] sm:$0xff]  ;;  %v262_v0 = vld [vmem:[#allocation5 + $0x2f8] sm:$0xff] }
 0x144   :  { %931 = vmatmul.f32.gmra.mxu3 %v4507_v10  ;;  %1286 = vmatpush.msrb.mxu1 %v262_v0  ;;  %v4515_v0 = vld [vmem:[#allocation27_spill] sm:$0xff] }
 0x145   :  { %4505 = vst [vmem:[#allocation17_spill] sm:$0xff] %v3164_v29  ;;  %866 = vmatmul.f32.gmra.mxu2 %v4506_v61  ;;  %v365_v61 = vld [vmem:[#allocation5 + $0x630] sm:$0xff] }
 0x146   :  { %1162 = vmatpush.msrb.mxu3 %v365_v61  ;;  %1287 = vmatpush.msrb.mxu1 %v258_v58  ;;  %v242_v61 = vld [vmem:[#allocation5 + $0x258] sm:$0xff]  ;;  %4532 = vst [vmem:[#allocation27_spill] sm:$0xff] %v3292_v23 }
 0x147   :  { %v3177_v17 = vpop.f32.mrf.mxu1 }
 0x148   :  { %v607_v38 = vpop.f32.mrf.mxu2  ;;  %v3175_v13 = vpop.f32.mrf.mxu0  ;;  %1288 = vmatpush.msrb.mxu1 %v254_v5  ;;  %1163 = vmatpush.msrb.mxu3 %v361_v57 }
 0x149   :  { %v608_v19 = vadd.f32 %v607_v38, %v4508_v52  ;;  %v672_v14 = vpop.f32.mrf.mxu3 }
 0x14a   :  { %1064 = vmatmul.f32.gmra.mxu1 %v3185_v30 }
 0x14b   :  { %v3179_v44 = vadd.f32 %v672_v14, %v608_v19  ;;  %999 = vmatmul.f32.gmra.mxu0 %v3181_v60  ;;  %v194_v19 = vld [vmem:[#allocation5 + $0xd8] sm:$0xff]  ;;  %v3196_v14 = vld [vmem:[#allocation2 + $0x160] sm:$0xff]  ;;  %1289 = vmatpush.msrb.mxu1 %v250_v24 }
 0x14c   :  { %934 = vmatmul.f32.gmra.mxu3 %v4511_v54  ;;  %1222 = vmatpush.msrb.mxu0 %v194_v19  ;;  %v186_v54 = vld [vmem:[#allocation5 + $0x98] sm:$0xff] }
 0x14d   :  { %4509 = vst [vmem:[#allocation18_spill] sm:$0xff] %v3179_v44  ;;  %869 = vmatmul.f32.gmra.mxu2 %v4510_v21  ;;  %v190_v21 = vld [vmem:[#allocation5 + $0xb8] sm:$0xff]  ;;  %1290 = vmatpush.msrb.mxu1 %v246_v53 }
 0x14e   :  { %1223 = vmatpush.msrb.mxu0 %v190_v21  ;;  %v182_v24 = vld [vmem:[#allocation5 + $0x78] sm:$0xff] }
 0x14f   :  { %v3192_v38 = vpop.f32.mrf.mxu1  ;;  %1291 = vmatpush.msrb.mxu1 %v242_v61  ;;  %v178_v21 = vld [vmem:[#allocation5 + $0x58] sm:$0xff]  ;;  %v4517_v61 = vld [vmem:[#allocation29_spill] sm:$0xff] }
 0x150   :  { %v610_v62 = vpop.f32.mrf.mxu2  ;;  %v3190_v3 = vpop.f32.mrf.mxu0  ;;  %1224 = vmatpush.msrb.mxu0 %v186_v54  ;;  %v358_v53 = vld [vmem:[#allocation5 + $0x5f8] sm:$0xff] }
 0x151   :  { %v611_v10 = vadd.f32 %v610_v62, %v4512_v8  ;;  %v675_v43 = vpop.f32.mrf.mxu3  ;;  %1343 = vmatpush.msra.mxu2 %v358_v53  ;;  %v422_v54 = vld [vmem:[#allocation5 + $0x7f8] sm:$0xff]  ;;  %v3230_v53 = vld [vmem:[#allocation2 + $0x1a8] sm:$0xff] }
 0x152   :  { %1067 = vmatmul.f32.gmra.mxu1 %v3200_v4  ;;  %1225 = vmatpush.msrb.mxu0 %v182_v24  ;;  %v170_v24 = vld [vmem:[#allocation5 + $0x18] sm:$0xff] }
 0x153   :  { %v3194_v52 = vadd.f32 %v675_v43, %v611_v10  ;;  %1002 = vmatmul.f32.gmra.mxu0 %v3196_v14  ;;  %v238_v10 = vld [vmem:[#allocation5 + $0x238] sm:$0xff]  ;;  %1408 = vmatpush.msra.mxu3 %v422_v54 }
 0x154   :  { %937 = vmatmul.f32.gmra.mxu3 %v4515_v0  ;;  %1292 = vmatpush.msrb.mxu1 %v238_v10  ;;  %v174_v0 = vld [vmem:[#allocation5 + $0x38] sm:$0xff] }
 0x155   :  { %4513 = vst [vmem:[#allocation20_spill] sm:$0xff] %v3194_v52  ;;  %872 = vmatmul.f32.gmra.mxu2 %v4514_v45  ;;  %v234_v45 = vld [vmem:[#allocation5 + $0x218] sm:$0xff]  ;;  %1226 = vmatpush.msrb.mxu0 %v178_v21  ;;  %v3241_v52 = vld [vmem:[#allocation2 + $0x1c0] sm:$0xff] }
 0x156   :  { %1293 = vmatpush.msrb.mxu1 %v234_v45  ;;  %v3226_v45 = vld [vmem:[#allocation2 + $0x1a0] sm:$0xff]  ;;  %v354_v21 = vld [vmem:[#allocation5 + $0x5d8] sm:$0xff] }
 0x157   :  { %v3207_v43 = vpop.f32.mrf.mxu1  ;;  %1227 = vmatpush.msrb.mxu0 %v174_v0  ;;  %1344 = vmatpush.msra.mxu2 %v354_v21  ;;  %v4520_v54 = vld [vmem:[#allocation30_spill] sm:$0xff] }
 0x158   :  { %v613_v58 = vpop.f32.mrf.mxu2  ;;  %v3205_v8 = vpop.f32.mrf.mxu0  ;;  %v350_v21 = vld [vmem:[#allocation5 + $0x5b8] sm:$0xff] }
 0x159   :  { %v614_v62 = vadd.f32 %v613_v58, %v2987_v33  ;;  %v678_v5 = vpop.f32.mrf.mxu3  ;;  %v3215_v33 = vld [vmem:[#allocation2 + $0x188] sm:$0xff]  ;;  %1228 = vmatpush.msrb.mxu0 %v170_v24  ;;  %1345 = vmatpush.msra.mxu2 %v350_v21  ;;  %v3260_v21 = vperm.slane %v4526_v15, 1 }
 0x15a   :  { %1070 = vmatmul.f32.gmra.mxu1 %v3215_v33  ;;  %v3245_v24 = vld [vmem:[#allocation2 + $0x1c8] sm:$0xff] }
 0x15b   :  { %v3209_v19 = vadd.f32 %v678_v5, %v614_v62  ;;  %1005 = vmatmul.f32.gmra.mxu0 %v3211_v51 }
 0x15c   :  { %940 = vmatmul.f32.gmra.mxu3 %v2990_v47  ;;  %v4519_v47 = vld [vmem:[#allocation28_spill] sm:$0xff] }
 0x15d   :  { %4516 = vst [vmem:[#allocation19_spill] sm:$0xff] %v3209_v19  ;;  %875 = vmatmul.f32.gmra.mxu2 %v2985_v6 }
 0x15f   :  { %v3222_v10 = vpop.f32.mrf.mxu1 }
 0x160   :  { %v616_v57 = vpop.f32.mrf.mxu2  ;;  %v3220_v62 = vpop.f32.mrf.mxu0 }
 0x161   :  { %v617_v58 = vadd.f32 %v616_v57, %v4517_v61  ;;  %v681_v6 = vpop.f32.mrf.mxu3  ;;  %v418_v57 = vld [vmem:[#allocation5 + $0x7d8] sm:$0xff] }
 0x162   :  { %1073 = vmatmul.f32.gmra.mxu1 %v3230_v53  ;;  %1409 = vmatpush.msra.mxu3 %v418_v57  ;;  %v4521_v61 = vld [vmem:[#allocation31_spill] sm:$0xff] }
 0x163   :  { %v3224_v5 = vadd.f32 %v681_v6, %v617_v58  ;;  %1008 = vmatmul.f32.gmra.mxu0 %v3226_v45  ;;  %v414_v57 = vld [vmem:[#allocation5 + $0x7b8] sm:$0xff] }
 0x164   :  { %943 = vmatmul.f32.gmra.mxu3 %v4520_v54  ;;  %v4523_v54 = vld [vmem:[#allocation32_spill] sm:$0xff] }
 0x165   :  { %4518 = vst [vmem:[#allocation21_spill] sm:$0xff] %v3224_v5  ;;  %878 = vmatmul.f32.gmra.mxu2 %v4519_v47  ;;  %1410 = vmatpush.msra.mxu3 %v414_v57  ;;  %v346_v57 = vld [vmem:[#allocation5 + $0x598] sm:$0xff] }
 0x166   :  { %1346 = vmatpush.msra.mxu2 %v346_v57  ;;  %v4529_v57 = vld [vmem:[#allocation35_spill] sm:$0xff] }
 0x167   :  { %v3237_v19 = vpop.f32.mrf.mxu1 }
 0x168   :  { %v619_v0 = vpop.f32.mrf.mxu2  ;;  %v3235_v6 = vpop.f32.mrf.mxu0 }
 0x169   :  { %v620_v58 = vadd.f32 %v619_v0, %v4521_v61  ;;  %v684_v5 = vpop.f32.mrf.mxu3  ;;  %v4524_v61 = vld [vmem:[#allocation34_spill] sm:$0xff] }
 0x16a   :  { %1076 = vmatmul.f32.gmra.mxu1 %v3245_v24 }
 0x16b   :  { %v3239_v47 = vadd.f32 %v684_v5, %v620_v58  ;;  %1011 = vmatmul.f32.gmra.mxu0 %v3241_v52 }
 0x16c   :  { %946 = vmatmul.f32.gmra.mxu3 %v4523_v54  ;;  %v4527_v54 = vld [vmem:[#allocation33_spill] sm:$0xff] }
 0x16d   :  { %4522 = vst [vmem:[#allocation23_spill] sm:$0xff] %v3239_v47  ;;  %881 = vmatmul.f32.gmra.mxu2 %v3015_v36  ;;  %v3256_v36 = vld [vmem:[#allocation2 + $0x1e0] sm:$0xff] }
 0x16f   :  { %v3252_v44 = vpop.f32.mrf.mxu1 }
 0x170   :  { %v622_v0 = vpop.f32.mrf.mxu2  ;;  %v3250_v58 = vpop.f32.mrf.mxu0 }
 0x171   :  { %v623_v5 = vadd.f32 %v622_v0, %v4524_v61  ;;  %v687_v47 = vpop.f32.mrf.mxu3  ;;  %v410_v0 = vld [vmem:[#allocation5 + $0x798] sm:$0xff]  ;;  %v711_v61 = vadd.f32 %v3043_v9, %v3260_v21 }
 0x172   :  { %1079 = vmatmul.f32.gmra.mxu1 %v3263_v20  ;;  %1411 = vmatpush.msra.mxu3 %v410_v0  ;;  %v2489_v0 = vld [vmem:[#allocation2 + $0x8] sm:$0xff]  ;;  %v342_v9 = vld [vmem:[#allocation5 + $0x578] sm:$0xff] }
 0x173   :  { %v3254_v29 = vadd.f32 %v687_v47, %v623_v5  ;;  %1014 = vmatmul.f32.gmra.mxu0 %v3256_v36  ;;  %v776_v27 = vadd.f32 %v4529_v57, %v711_v61  ;;  %1347 = vmatpush.msra.mxu2 %v342_v9 }
 0x174   :  { %949 = vmatmul.f32.gmra.mxu3 %v3035_v11  ;;  %v3277_v11 = vld [vmem:[#allocation2 + $0x10] sm:$0xff] }
 0x175   :  { %4525 = vst [vmem:[#allocation22_spill] sm:$0xff] %v3254_v29  ;;  %884 = vmatmul.f32.gmra.mxu2 %v4527_v54 }
 0x177   :  { %v3272_v54 = vpop.f32.mrf.mxu1 }
 0x178   :  { %v625_v47 = vpop.f32.mrf.mxu2  ;;  %v3270_v15 = vpop.f32.mrf.mxu0 }
 0x179   :  { %v626_v5 = vadd.f32 %v625_v47, %v3047_v56  ;;  %v690_v29 = vpop.f32.mrf.mxu3  ;;  %v3280_v56 = vld [vmem:[#allocation2 + $0x18] sm:$0xff] }
 0x17a   :  { %1294 = vmatmul.f32.vlgmr.msrb.gmra.mxu1 %v2489_v0  ;;  %4530 = vst [vmem:[#allocation26_spill] sm:$0xff] %v3280_v56  ;;  %v406_v47 = vld [vmem:[#allocation5 + $0x778] sm:$0xff]  ;;  %v2491_v0 = vld [vmem:[#allocation2 + $0x20] sm:$0xff] }
 0x17b   :  { %v3274_v16 = vadd.f32 %v690_v29, %v626_v5  ;;  %1229 = vmatmul.f32.vlgmr.msrb.gmra.mxu0 %v2487_v63  ;;  %1412 = vmatpush.msra.mxu3 %v406_v47  ;;  %v714_v63 = vadd.f32 %v3056_v18, %v3260_v21  ;;  %v2493_v47 = vld [vmem:[#allocation2 + $0x28] sm:$0xff]  ;;  %v3295_v18 = vld [vmem:[#allocation2 + $0x38] sm:$0xff] }
 0x17c   :  { %1164 = vmatmul.f32.vlgmr.msrb.gmra.mxu3 %v3280_v56  ;;  %v338_v56 = vld [vmem:[#allocation5 + $0x558] sm:$0xff]  ;;  %4533 = vst [vmem:[#allocation29_spill] sm:$0xff] %v3295_v18 }
 0x17d   :  { %4528 = vst [vmem:[#allocation24_spill] sm:$0xff] %v3274_v16  ;;  %1099 = vmatmul.f32.vlgmr.msrb.gmra.mxu2 %v3277_v11  ;;  %v779_v9 = vadd.f32 %v3058_v40, %v714_v63 }
 0x17e   :  { %1348 = vmatpush.msra.mxu2 %v338_v56 }
 0x17f   :  { %v3287_v57 = vpop.f32.mrf.mxu1 }
 0x180   :  { %v840_v50 = vpop.f32.mrf.mxu2  ;;  %v3285_v61 = vpop.f32.mrf.mxu0  ;;  %4531 = vst [vmem:[#allocation25_spill] sm:$0xff] %v3287_v57  ;;  %v3307_v57 = vld [vmem:[#allocation2 + $0x50] sm:$0xff] }
 0x181   :  { %v841_v29 = vadd.f32 %v840_v50, %v776_v27  ;;  %v905_v5 = vpop.f32.mrf.mxu3  ;;  %v402_v50 = vld [vmem:[#allocation5 + $0x758] sm:$0xff]  ;;  %4535 = vst [vmem:[#allocation30_spill] sm:$0xff] %v3307_v57 }
 0x182   :  { %1297 = vmatmul.f32.gmra.mxu1 %v2493_v47  ;;  %1413 = vmatpush.msra.mxu3 %v402_v50  ;;  %v2495_v47 = vld [vmem:[#allocation2 + $0x40] sm:$0xff]  ;;  %v2497_v50 = vld [vmem:[#allocation2 + $0x48] sm:$0xff] }
 0x183   :  { %v3289_v16 = vadd.f32 %v905_v5, %v841_v29  ;;  %1232 = vmatmul.f32.gmra.mxu0 %v2491_v0  ;;  %v717_v29 = vadd.f32 %v3069_v2, %v3260_v21  ;;  %v3310_v2 = vld [vmem:[#allocation2 + $0x58] sm:$0xff] }
 0x184   :  { %1167 = vmatmul.f32.gmra.mxu3 %v3295_v18  ;;  %v334_v18 = vld [vmem:[#allocation5 + $0x538] sm:$0xff]  ;;  %4536 = vst [vmem:[#allocation31_spill] sm:$0xff] %v3310_v2 }
 0x185   :  { %1102 = vmatmul.f32.gmra.mxu2 %v3292_v23  ;;  %v782_v56 = vadd.f32 %v3071_v26, %v717_v29 }
 0x186   :  { %1349 = vmatpush.msra.mxu2 %v334_v18 }
 0x187   :  { %v3302_v0 = vpop.f32.mrf.mxu1 }
 0x188   :  { %v843_v27 = vpop.f32.mrf.mxu2  ;;  %v3300_v40 = vpop.f32.mrf.mxu0  ;;  %4534 = vst [vmem:[#allocation28_spill] sm:$0xff] %v3302_v0  ;;  %v3322_v0 = vld [vmem:[#allocation2 + $0x70] sm:$0xff] }
 0x189   :  { %v844_v5 = vadd.f32 %v843_v27, %v779_v9  ;;  %v908_v63 = vpop.f32.mrf.mxu3  ;;  %v398_v9 = vld [vmem:[#allocation5 + $0x738] sm:$0xff]  ;;  %4538 = vst [vmem:[#allocation34_spill] sm:$0xff] %v3322_v0 }
 0x18a   :  { %1300 = vmatmul.f32.gmra.mxu1 %v2497_v50  ;;  %1414 = vmatpush.msra.mxu3 %v398_v9  ;;  %v2499_v50 = vld [vmem:[#allocation2 + $0x60] sm:$0xff]  ;;  %v2501_v9 = vld [vmem:[#allocation2 + $0x68] sm:$0xff] }
 0x18b   :  { %v3304_v23 = vadd.f32 %v908_v63, %v844_v5  ;;  %1235 = vmatmul.f32.gmra.mxu0 %v2495_v47  ;;  %v720_v5 = vadd.f32 %v3082_v22, %v3260_v21  ;;  %v3325_v22 = vld [vmem:[#allocation2 + $0x78] sm:$0xff] }
 0x18c   :  { %1170 = vmatmul.f32.gmra.mxu3 %v3310_v2  ;;  %v330_v2 = vld [vmem:[#allocation5 + $0x518] sm:$0xff]  ;;  %4539 = vst [vmem:[#allocation16_spill] sm:$0xff] %v3325_v22 }
 0x18d   :  { %1105 = vmatmul.f32.gmra.mxu2 %v3307_v57  ;;  %v785_v18 = vadd.f32 %v3084_v32, %v720_v5 }
 0x18e   :  { %1350 = vmatpush.msra.mxu2 %v330_v2 }
 0x18f   :  { %v3317_v47 = vpop.f32.mrf.mxu1 }
 0x190   :  { %v846_v27 = vpop.f32.mrf.mxu2  ;;  %v3315_v26 = vpop.f32.mrf.mxu0  ;;  %4537 = vst [vmem:[#allocation32_spill] sm:$0xff] %v3317_v47  ;;  %v3337_v47 = vld [vmem:[#allocation2 + $0x90] sm:$0xff] }
 0x191   :  { %v847_v63 = vadd.f32 %v846_v27, %v782_v56  ;;  %v911_v29 = vpop.f32.mrf.mxu3  ;;  %v394_v56 = vld [vmem:[#allocation5 + $0x718] sm:$0xff]  ;;  %4541 = vst [vmem:[#allocation35_spill] sm:$0xff] %v3337_v47 }
 0x192   :  { %1303 = vmatmul.f32.gmra.mxu1 %v2501_v9  ;;  %1415 = vmatpush.msra.mxu3 %v394_v56  ;;  %v2503_v9 = vld [vmem:[#allocation2 + $0x80] sm:$0xff]  ;;  %v2505_v56 = vld [vmem:[#allocation2 + $0x88] sm:$0xff] }
 0x193   :  { %v3319_v57 = vadd.f32 %v911_v29, %v847_v63  ;;  %1238 = vmatmul.f32.gmra.mxu0 %v2499_v50  ;;  %v723_v63 = vadd.f32 %v3095_v25, %v3260_v21  ;;  %v3340_v25 = vld [vmem:[#allocation2 + $0x98] sm:$0xff] }
 0x194   :  { %1173 = vmatmul.f32.gmra.mxu3 %v3325_v22  ;;  %v326_v22 = vld [vmem:[#allocation5 + $0x4f8] sm:$0xff]  ;;  %4542 = vst [vmem:[#allocation43_spill] sm:$0xff] %v3340_v25 }
 0x195   :  { %1108 = vmatmul.f32.gmra.mxu2 %v3322_v0  ;;  %v788_v2 = vadd.f32 %v3097_v7, %v723_v63 }
 0x196   :  { %1351 = vmatpush.msra.mxu2 %v326_v22 }
 0x197   :  { %v3332_v50 = vpop.f32.mrf.mxu1 }
 0x198   :  { %v849_v27 = vpop.f32.mrf.mxu2  ;;  %v3330_v32 = vpop.f32.mrf.mxu0  ;;  %4540 = vst [vmem:[#allocation33_spill] sm:$0xff] %v3332_v50  ;;  %v3352_v50 = vld [vmem:[#allocation2 + $0xb0] sm:$0xff] }
 0x199   :  { %v850_v29 = vadd.f32 %v849_v27, %v785_v18  ;;  %v914_v5 = vpop.f32.mrf.mxu3  ;;  %v390_v18 = vld [vmem:[#allocation5 + $0x6f8] sm:$0xff]  ;;  %4545 = vst [vmem:[#allocation46_spill] sm:$0xff] %v3352_v50 }
 0x19a   :  { %1306 = vmatmul.f32.gmra.mxu1 %v2505_v56  ;;  %1416 = vmatpush.msra.mxu3 %v390_v18  ;;  %v2507_v56 = vld [vmem:[#allocation2 + $0xa0] sm:$0xff]  ;;  %v2509_v18 = vld [vmem:[#allocation2 + $0xa8] sm:$0xff] }
 0x19b   :  { %v3334_v0 = vadd.f32 %v914_v5, %v850_v29  ;;  %1241 = vmatmul.f32.gmra.mxu0 %v2503_v9  ;;  %v726_v29 = vadd.f32 %v3108_v46, %v3260_v21  ;;  %v3355_v46 = vld [vmem:[#allocation2 + $0xb8] sm:$0xff] }
 0x19c   :  { %1176 = vmatmul.f32.gmra.mxu3 %v3340_v25  ;;  %v322_v25 = vld [vmem:[#allocation5 + $0x4d8] sm:$0xff]  ;;  %4546 = vst [vmem:[#allocation47_spill] sm:$0xff] %v3355_v46 }
 0x19d   :  { %1111 = vmatmul.f32.gmra.mxu2 %v3337_v47  ;;  %v791_v22 = vadd.f32 %v3110_v49, %v726_v29 }
 0x19e   :  { %1352 = vmatpush.msra.mxu2 %v322_v25 }
 0x19f   :  { %v3347_v9 = vpop.f32.mrf.mxu1 }
 0x1a0   :  { %v852_v27 = vpop.f32.mrf.mxu2  ;;  %v3345_v7 = vpop.f32.mrf.mxu0  ;;  %4543 = vst [vmem:[#allocation44_spill] sm:$0xff] %v3347_v9  ;;  %v3367_v9 = vld [vmem:[#allocation2 + $0xd0] sm:$0xff] }
 0x1a1   :  { %v853_v5 = vadd.f32 %v852_v27, %v788_v2  ;;  %v917_v63 = vpop.f32.mrf.mxu3  ;;  %v386_v2 = vld [vmem:[#allocation5 + $0x6d8] sm:$0xff]  ;;  %4549 = vst [vmem:[#allocation50_spill] sm:$0xff] %v3367_v9 }
 0x1a2   :  { %1309 = vmatmul.f32.gmra.mxu1 %v2509_v18  ;;  %1417 = vmatpush.msra.mxu3 %v386_v2  ;;  %v2511_v18 = vld [vmem:[#allocation2 + $0xc0] sm:$0xff]  ;;  %v2513_v2 = vld [vmem:[#allocation2 + $0xc8] sm:$0xff] }
 0x1a3   :  { %v3349_v47 = vadd.f32 %v917_v63, %v853_v5  ;;  %1244 = vmatmul.f32.gmra.mxu0 %v2507_v56  ;;  %v729_v5 = vadd.f32 %v3121_v55, %v3260_v21  ;;  %v3370_v55 = vld [vmem:[#allocation2 + $0xd8] sm:$0xff] }
 0x1a4   :  { %1179 = vmatmul.f32.gmra.mxu3 %v3355_v46  ;;  %v318_v46 = vld [vmem:[#allocation5 + $0x4b8] sm:$0xff]  ;;  %4550 = vst [vmem:[#allocation51_spill] sm:$0xff] %v3370_v55 }
 0x1a5   :  { %4544 = vst [vmem:[#allocation45_spill] sm:$0xff] %v3349_v47  ;;  %1114 = vmatmul.f32.gmra.mxu2 %v3352_v50  ;;  %v794_v25 = vadd.f32 %v3123_v48, %v729_v5 }
 0x1a6   :  { %1353 = vmatpush.msra.mxu2 %v318_v46 }
 0x1a7   :  { %v3364_v50 = vpop.f32.mrf.mxu1 }
 0x1a8   :  { %v855_v27 = vpop.f32.mrf.mxu2  ;;  %v3360_v49 = vpop.f32.mrf.mxu0  ;;  %4548 = vst [vmem:[#allocation49_spill] sm:$0xff] %v3364_v50  ;;  %v3382_v50 = vld [vmem:[#allocation2 + $0xf0] sm:$0xff] }
 0x1a9   :  { %v856_v63 = vadd.f32 %v855_v27, %v791_v22  ;;  %v920_v29 = vpop.f32.mrf.mxu3  ;;  %v382_v22 = vld [vmem:[#allocation5 + $0x6b8] sm:$0xff]  ;;  %4552 = vst [vmem:[#allocation53_spill] sm:$0xff] %v3382_v50 }
 0x1aa   :  { %1312 = vmatmul.f32.gmra.mxu1 %v2513_v2  ;;  %1418 = vmatpush.msra.mxu3 %v382_v22  ;;  %v2517_v22 = vld [vmem:[#allocation2 + $0xe8] sm:$0xff] }
 0x1ab   :  { %v3362_v56 = vadd.f32 %v920_v29, %v856_v63  ;;  %1247 = vmatmul.f32.gmra.mxu0 %v2511_v18  ;;  %v732_v63 = vadd.f32 %v3134_v1, %v3260_v21  ;;  %v3385_v1 = vld [vmem:[#allocation2 + $0xf8] sm:$0xff] }
 0x1ac   :  { %1182 = vmatmul.f32.gmra.mxu3 %v3370_v55  ;;  %v314_v55 = vld [vmem:[#allocation5 + $0x498] sm:$0xff]  ;;  %4553 = vst [vmem:[#allocation54_spill] sm:$0xff] %v3385_v1 }
 0x1ad   :  { %4547 = vst [vmem:[#allocation48_spill] sm:$0xff] %v3362_v56  ;;  %1117 = vmatmul.f32.gmra.mxu2 %v3367_v9  ;;  %v2515_v9 = vld [vmem:[#allocation2 + $0xe0] sm:$0xff]  ;;  %v797_v46 = vadd.f32 %v3136_v39, %v732_v63  ;;  %v735_v39 = vadd.f32 %v3145_v41, %v3260_v21 }
 0x1ae   :  { %1354 = vmatpush.msra.mxu2 %v314_v55 }
 0x1af   :  { %v3380_v2 = vpop.f32.mrf.mxu1  ;;  %v800_v55 = vadd.f32 %v3147_v34, %v735_v39  ;;  %v1565_v34 = vld [vmem:[#allocation8 + $0xe0] sm:$0xff] }
 0x1b0   :  { %v858_v27 = vpop.f32.mrf.mxu2  ;;  %v3375_v48 = vpop.f32.mrf.mxu0 }
 0x1b1   :  { %v859_v29 = vadd.f32 %v858_v27, %v794_v25  ;;  %v923_v5 = vpop.f32.mrf.mxu3  ;;  %v378_v25 = vld [vmem:[#allocation5 + $0x698] sm:$0xff] }
 0x1b2   :  { %1315 = vmatmul.f32.gmra.mxu1 %v2517_v22  ;;  %1419 = vmatpush.msra.mxu3 %v378_v25  ;;  %v3396_v22 = vld [vmem:[#allocation2 + $0x110] sm:$0xff]  ;;  %v310_v25 = vld [vmem:[#allocation5 + $0x478] sm:$0xff] }
 0x1b3   :  { %v3377_v18 = vadd.f32 %v923_v5, %v859_v29  ;;  %1250 = vmatmul.f32.gmra.mxu0 %v2515_v9  ;;  %1355 = vmatpush.msra.mxu2 %v310_v25  ;;  %v1595_v25 = vld [vmem:[#allocation8 + $0x1d0] sm:$0xff] }
 0x1b4   :  { %1185 = vmatmul.f32.gmra.mxu3 %v3385_v1  ;;  %v1567_v1 = vld [vmem:[#allocation8 + $0xf0] sm:$0xff] }
 0x1b5   :  { %4551 = vst [vmem:[#allocation52_spill] sm:$0xff] %v3377_v18  ;;  %1120 = vmatmul.f32.gmra.mxu2 %v3382_v50  ;;  %v1599_v50 = vld [vmem:[#allocation8 + $0x1f0] sm:$0xff]  ;;  %1671 = vmatpush.msra.mxu0 %v1567_v1 }
 0x1b6   :  { %1736 = vmatpush.msra.mxu1 %v1599_v50  ;;  %v1563_v1 = vld [vmem:[#allocation8 + $0xd0] sm:$0xff]  ;;  %v1561_v50 = vld [vmem:[#allocation8 + $0xc0] sm:$0xff] }
 0x1b7   :  { %v3400_v41 = vpop.f32.mrf.mxu1  ;;  %1672 = vmatpush.msra.mxu0 %v1565_v34  ;;  %v3413_v34 = vld [vmem:[#allocation2 + $0x130] sm:$0xff] }
 0x1b8   :  { %v861_v27 = vpop.f32.mrf.mxu2  ;;  %v3390_v63 = vpop.f32.mrf.mxu0  ;;  %4556 = vst [vmem:[#allocation57_spill] sm:$0xff] %v3400_v41 }
 0x1b9   :  { %v862_v9 = vadd.f32 %v861_v27, %v797_v46  ;;  %4554 = vst [vmem:[#allocation55_spill] sm:$0xff] %v3390_v63  ;;  %v926_v29 = vpop.f32.mrf.mxu3  ;;  %v3402_v46 = vld [vmem:[#allocation2 + $0x118] sm:$0xff]  ;;  %v1597_v27 = vld [vmem:[#allocation8 + $0x1e0] sm:$0xff]  ;;  %1673 = vmatpush.msra.mxu0 %v1563_v1 }
 0x1ba   :  { %1318 = vmatmul.f32.gmra.mxu1 %v3155_v12  ;;  %4557 = vst [vmem:[#allocation58_spill] sm:$0xff] %v3402_v46  ;;  %v738_v12 = vadd.f32 %v3160_v37, %v3260_v21  ;;  %v306_v37 = vld [vmem:[#allocation5 + $0x458] sm:$0xff] }
 0x1bb   :  { %v3392_v5 = vadd.f32 %v926_v29, %v862_v9  ;;  %1253 = vmatmul.f32.gmra.mxu0 %v3151_v42  ;;  %v374_v42 = vld [vmem:[#allocation5 + $0x678] sm:$0xff]  ;;  %1737 = vmatpush.msra.mxu1 %v1597_v27 }
 0x1bc   :  { %1188 = vmatmul.f32.gmra.mxu3 %v3402_v46  ;;  %v1593_v46 = vld [vmem:[#allocation8 + $0x1c0] sm:$0xff]  ;;  %v1591_v27 = vld [vmem:[#allocation8 + $0x1b0] sm:$0xff]  ;;  %1674 = vmatpush.msra.mxu0 %v1561_v50 }
 0x1bd   :  { %4555 = vst [vmem:[#allocation56_spill] sm:$0xff] %v3392_v5  ;;  %1123 = vmatmul.f32.gmra.mxu2 %v3396_v22  ;;  %1420 = vmatpush.msra.mxu3 %v374_v42  ;;  %v803_v42 = vadd.f32 %v3162_v28, %v738_v12  ;;  %v741_v12 = vadd.f32 %v3175_v13, %v3260_v21  ;;  %v3430_v13 = vld [vmem:[#allocation2 + $0x150] sm:$0xff] }
 0x1be   :  { %1738 = vmatpush.msra.mxu1 %v1595_v25  ;;  %1356 = vmatpush.msra.mxu2 %v306_v37 }
 0x1c0   :  { %v864_v39 = vpop.f32.mrf.mxu2  ;;  %v3407_v29 = vpop.f32.mrf.mxu0  ;;  %1739 = vmatpush.msra.mxu1 %v1593_v46  ;;  %v1587_v46 = vld [vmem:[#allocation8 + $0x190] sm:$0xff] }
 0x1c1   :  { %v865_v9 = vadd.f32 %v864_v39, %v800_v55  ;;  %4558 = vst [vmem:[#allocation59_spill] sm:$0xff] %v3407_v29  ;;  %v929_v41 = vpop.f32.mrf.mxu3  ;;  %v1559_v55 = vld [vmem:[#allocation8 + $0xb0] sm:$0xff] }
 0x1c2   :  { %1321 = vmatmul.f32.gmra.mxu1 %v3170_v35  ;;  %v370_v39 = vld [vmem:[#allocation5 + $0x658] sm:$0xff]  ;;  %1675 = vmatpush.msra.mxu0 %v1559_v55  ;;  %v3422_v35 = vpop.f32.mrf.mxu1  ;;  %v806_v55 = vadd.f32 %v3177_v17, %v741_v12  ;;  %v744_v12 = vadd.f32 %v3190_v3, %v3260_v21  ;;  %v3447_v3 = vld [vmem:[#allocation2 + $0x170] sm:$0xff] }
 0x1c3   :  { %v3409_v63 = vadd.f32 %v929_v41, %v865_v9  ;;  %1256 = vmatmul.f32.gmra.mxu0 %v3166_v59  ;;  %v3417_v41 = vld [vmem:[#allocation2 + $0x138] sm:$0xff]  ;;  %v1557_v59 = vld [vmem:[#allocation8 + $0xa0] sm:$0xff]  ;;  %1740 = vmatpush.msra.mxu1 %v1591_v27  ;;  %4561 = vst [vmem:[#allocation62_spill] sm:$0xff] %v3422_v35 }
 0x1c4   :  { %4560 = vst [vmem:[#allocation61_spill] sm:$0xff] %v3417_v41  ;;  %1191 = vmatmul.f32.gmra.mxu3 %v3417_v41  ;;  %v1589_v9 = vld [vmem:[#allocation8 + $0x1a0] sm:$0xff]  ;;  %1676 = vmatpush.msra.mxu0 %v1557_v59  ;;  %v1555_v29 = vld [vmem:[#allocation8 + $0x90] sm:$0xff] }
 0x1c5   :  { %4559 = vst [vmem:[#allocation60_spill] sm:$0xff] %v3409_v63  ;;  %1126 = vmatmul.f32.gmra.mxu2 %v3413_v34  ;;  %1421 = vmatpush.msra.mxu3 %v370_v39  ;;  %v1585_v41 = vld [vmem:[#allocation8 + $0x180] sm:$0xff]  ;;  %v302_v27 = vld [vmem:[#allocation5 + $0x438] sm:$0xff] }
 0x1c6   :  { %1741 = vmatpush.msra.mxu1 %v1589_v9  ;;  %v1583_v39 = vld [vmem:[#allocation8 + $0x170] sm:$0xff]  ;;  %1677 = vmatpush.msra.mxu0 %v1555_v29 }
 0x1c7   :  { %v3434_v59 = vld [vmem:[#allocation2 + $0x158] sm:$0xff]  ;;  %1357 = vmatpush.msra.mxu2 %v302_v27  ;;  %v1549_v27 = vld [vmem:[#allocation8 + $0x60] sm:$0xff] }
 0x1c8   :  { %v867_v28 = vpop.f32.mrf.mxu2  ;;  %v3424_v25 = vpop.f32.mrf.mxu0  ;;  %1742 = vmatpush.msra.mxu1 %v1587_v46  ;;  %v366_v9 = vld [vmem:[#allocation5 + $0x638] sm:$0xff] }
 0x1c9   :  { %v868_v1 = vadd.f32 %v867_v28, %v803_v42  ;;  %4562 = vst [vmem:[#allocation63_spill] sm:$0xff] %v3424_v25  ;;  %v932_v50 = vpop.f32.mrf.mxu3  ;;  %v1553_v42 = vld [vmem:[#allocation8 + $0x80] sm:$0xff]  ;;  %1422 = vmatpush.msra.mxu3 %v366_v9  ;;  %v1579_v29 = vld [vmem:[#allocation8 + $0x150] sm:$0xff] }
 0x1ca   :  { %1324 = vmatmul.f32.gmra.mxu1 %v3185_v30  ;;  %v1581_v28 = vld [vmem:[#allocation8 + $0x160] sm:$0xff]  ;;  %1678 = vmatpush.msra.mxu0 %v1553_v42  ;;  %v3441_v46 = vpop.f32.mrf.mxu1  ;;  %v809_v42 = vadd.f32 %v3192_v38, %v744_v12  ;;  %v3451_v9 = vld [vmem:[#allocation2 + $0x178] sm:$0xff]  ;;  %v747_v12 = vadd.f32 %v3205_v8, %v3260_v21  ;;  %v3464_v8 = vld [vmem:[#allocation2 + $0x190] sm:$0xff] }
 0x1cb   :  { %v3426_v37 = vadd.f32 %v932_v50, %v868_v1  ;;  %1259 = vmatmul.f32.gmra.mxu0 %v3181_v60  ;;  %1743 = vmatpush.msra.mxu1 %v1585_v41  ;;  %v1551_v60 = vld [vmem:[#allocation8 + $0x70] sm:$0xff]  ;;  %4565 = vst [vmem:[#allocation66_spill] sm:$0xff] %v3441_v46  ;;  %v1577_v25 = vld [vmem:[#allocation8 + $0x140] sm:$0xff] }
 0x1cc   :  { %1194 = vmatmul.f32.gmra.mxu3 %v3434_v59  ;;  %1679 = vmatpush.msra.mxu0 %v1551_v60  ;;  %v1575_v60 = vld [vmem:[#allocation8 + $0x130] sm:$0xff] }
 0x1cd   :  { %4563 = vst [vmem:[#allocation64_spill] sm:$0xff] %v3426_v37  ;;  %1129 = vmatmul.f32.gmra.mxu2 %v3430_v13  ;;  %1744 = vmatpush.msra.mxu1 %v1583_v39  ;;  %v298_v39 = vld [vmem:[#allocation5 + $0x418] sm:$0xff] }
 0x1ce   :  { %1680 = vmatpush.msra.mxu0 %v1549_v27  ;;  %1358 = vmatpush.msra.mxu2 %v298_v39  ;;  %v1543_v27 = vld [vmem:[#allocation8 + $0x30] sm:$0xff]  ;;  %v1569_v39 = vld [vmem:[#allocation8 + $0x100] sm:$0xff] }
 0x1cf   :  { %1745 = vmatpush.msra.mxu1 %v1581_v28  ;;  %v1545_v28 = vld [vmem:[#allocation8 + $0x40] sm:$0xff] }
 0x1d0   :  { %v870_v17 = vpop.f32.mrf.mxu2  ;;  %v3439_v1 = vpop.f32.mrf.mxu0 }
 0x1d1   :  { %v871_v30 = vadd.f32 %v870_v17, %v806_v55  ;;  %4564 = vst [vmem:[#allocation65_spill] sm:$0xff] %v3439_v1  ;;  %v935_v41 = vpop.f32.mrf.mxu3  ;;  %1746 = vmatpush.msra.mxu1 %v1579_v29  ;;  %v1547_v55 = vld [vmem:[#allocation8 + $0x50] sm:$0xff]  ;;  %v1573_v17 = vld [vmem:[#allocation8 + $0x120] sm:$0xff] }
 0x1d2   :  { %1327 = vmatmul.f32.gmra.mxu1 %v3200_v4  ;;  %1681 = vmatpush.msra.mxu0 %v1547_v55  ;;  %v1571_v29 = vld [vmem:[#allocation8 + $0x110] sm:$0xff]  ;;  %v812_v55 = vadd.f32 %v3207_v43, %v747_v12  ;;  %v750_v43 = vadd.f32 %v3220_v62, %v3260_v21 }
 0x1d3   :  { %v3443_v50 = vadd.f32 %v935_v41, %v871_v30  ;;  %1262 = vmatmul.f32.gmra.mxu0 %v3196_v14  ;;  %1747 = vmatpush.msra.mxu1 %v1577_v25  ;;  %v362_v14 = vld [vmem:[#allocation5 + $0x618] sm:$0xff] }
 0x1d4   :  { %1197 = vmatmul.f32.gmra.mxu3 %v3451_v9  ;;  %1682 = vmatpush.msra.mxu0 %v1545_v28  ;;  %v3468_v28 = vld [vmem:[#allocation2 + $0x198] sm:$0xff] }
 0x1d5   :  { %4566 = vst [vmem:[#allocation67_spill] sm:$0xff] %v3443_v50  ;;  %1132 = vmatmul.f32.gmra.mxu2 %v3447_v3  ;;  %1748 = vmatpush.msra.mxu1 %v1575_v60  ;;  %v3462_v60 = vpop.f32.mrf.mxu1 }
 0x1d6   :  { %1423 = vmatpush.msra.mxu3 %v362_v14  ;;  %4569 = vst [vmem:[#allocation70_spill] sm:$0xff] %v3462_v60  ;;  %1683 = vmatpush.msra.mxu0 %v1543_v27  ;;  %v1539_v14 = vld [vmem:[#allocation8 + $0x10] sm:$0xff] }
 0x1d7   :  { %1749 = vmatpush.msra.mxu1 %v1573_v17  ;;  %v1631_v27 = vld [vmem:[#allocation8 + $0x2f0] sm:$0xff] }
 0x1d8   :  { %v873_v38 = vpop.f32.mrf.mxu2  ;;  %v3456_v30 = vpop.f32.mrf.mxu0  ;;  %1801 = vmatpush.msrb.mxu2 %v1631_v27 }
 0x1d9   :  { %v874_v4 = vadd.f32 %v873_v38, %v809_v42  ;;  %4567 = vst [vmem:[#allocation68_spill] sm:$0xff] %v3456_v30  ;;  %v938_v25 = vpop.f32.mrf.mxu3  ;;  %1750 = vmatpush.msra.mxu1 %v1571_v29  ;;  %v1541_v42 = vld [vmem:[#allocation8 + $0x20] sm:$0xff]  ;;  %v815_v29 = vadd.f32 %v3222_v10, %v750_v43  ;;  %v753_v10 = vadd.f32 %v3235_v6, %v3260_v21  ;;  %v4592_v30 = vld [vmem:[#allocation34_spill] sm:$0xff] }
 0x1da   :  { %1330 = vmatmul.f32.gmra.mxu1 %v3215_v33  ;;  %1684 = vmatpush.msra.mxu0 %v1541_v42  ;;  %v1537_v33 = vld [vmem:[#allocation8] sm:$0xff] }
 0x1db   :  { %v3458_v41 = vadd.f32 %v938_v25, %v874_v4  ;;  %1265 = vmatmul.f32.gmra.mxu0 %v3211_v51  ;;  %1751 = vmatpush.msra.mxu1 %v1569_v39  ;;  %v3479_v25 = vld [vmem:[#allocation2 + $0x1b0] sm:$0xff]  ;;  %v3485_v39 = vld [vmem:[#allocation2 + $0x1b8] sm:$0xff]  ;;  %v1661_v6 = vld [vmem:[#allocation8 + $0x3e0] sm:$0xff] }
 0x1dc   :  { %1200 = vmatmul.f32.gmra.mxu3 %v3468_v28  ;;  %1685 = vmatpush.msra.mxu0 %v1539_v14 }
 0x1dd   :  { %4568 = vst [vmem:[#allocation69_spill] sm:$0xff] %v3458_v41  ;;  %1135 = vmatmul.f32.gmra.mxu2 %v3464_v8  ;;  %v3483_v62 = vpop.f32.mrf.mxu1 }
 0x1de   :  { %1686 = vmatpush.msra.mxu0 %v1537_v33  ;;  %4572 = vst [vmem:[#allocation73_spill] sm:$0xff] %v3483_v62  ;;  %v3500_v33 = vld [vmem:[#allocation2 + $0x1d8] sm:$0xff] }
 0x1e0   :  { %v876_v51 = vpop.f32.mrf.mxu2  ;;  %v3475_v4 = vpop.f32.mrf.mxu0 }
 0x1e1   :  { %v877_v17 = vadd.f32 %v876_v51, %v812_v55  ;;  %v941_v38 = vpop.f32.mrf.mxu3  ;;  %4571 = vst [vmem:[#allocation72_spill] sm:$0xff] %v3475_v4  ;;  %v1663_v55 = vld [vmem:[#allocation8 + $0x3f0] sm:$0xff] }
 0x1e2   :  { %1333 = vmatmul.f32.gmra.mxu1 %v3230_v53  ;;  %1866 = vmatpush.msrb.mxu3 %v1663_v55  ;;  %v818_v53 = vadd.f32 %v3237_v19, %v753_v10  ;;  %v3511_v10 = vld [vmem:[#allocation7] sm:$0xf] }
 0x1e3   :  { %v3473_v12 = vadd.f32 %v941_v38, %v877_v17  ;;  %1268 = vmatmul.f32.gmra.mxu0 %v3226_v45  ;;  %v3496_v17 = vld [vmem:[#allocation2 + $0x1d0] sm:$0xff]  ;;  %v1629_v38 = vld [vmem:[#allocation8 + $0x2e0] sm:$0xff] }
 0x1e4   :  { %1203 = vmatmul.f32.gmra.mxu3 %v3485_v39  ;;  %1802 = vmatpush.msrb.mxu2 %v1629_v38 }
 0x1e5   :  { %4570 = vst [vmem:[#allocation71_spill] sm:$0xff] %v3473_v12  ;;  %1138 = vmatmul.f32.gmra.mxu2 %v3479_v25  ;;  %1867 = vmatpush.msrb.mxu3 %v1661_v6  ;;  %v3505_v19 = vpop.f32.mrf.mxu1 }
 0x1e6   :  { %4575 = vst [vmem:[#allocation76_spill] sm:$0xff] %v3505_v19 }
 0x1e8   :  { %v879_v42 = vpop.f32.mrf.mxu2  ;;  %v3494_v43 = vpop.f32.mrf.mxu0 }
 0x1e9   :  { %v880_v45 = vadd.f32 %v879_v42, %v815_v29  ;;  %v944_v14 = vpop.f32.mrf.mxu3  ;;  %4574 = vst [vmem:[#allocation75_spill] sm:$0xff] %v3494_v43 }
 0x1ea   :  { %1336 = vmatmul.f32.gmra.mxu1 %v3245_v24 }
 0x1eb   :  { %v3490_v51 = vadd.f32 %v944_v14, %v880_v45  ;;  %1271 = vmatmul.f32.gmra.mxu0 %v3241_v52  ;;  %v756_v52 = vadd.f32 %v3250_v58, %v3260_v21  ;;  %v3514_v45 = vperm.slane %v3511_v10, 2  ;;  %v3516_v14 = vld [vmem:[#allocation2 + $0x1f0] sm:$0xff] }
 0x1ec   :  { %1206 = vmatmul.f32.gmra.mxu3 %v3500_v33  ;;  %v1627_v58 = vld [vmem:[#allocation8 + $0x2d0] sm:$0xff] }
 0x1ed   :  { %4573 = vst [vmem:[#allocation74_spill] sm:$0xff] %v3490_v51  ;;  %1141 = vmatmul.f32.gmra.mxu2 %v3496_v17  ;;  %v821_v24 = vadd.f32 %v3252_v44, %v756_v52  ;;  %v1659_v44 = vld [vmem:[#allocation8 + $0x3d0] sm:$0xff]  ;;  %v971_v38 = vadd.f32 %v3270_v15, %v3514_v45  ;;  %v1625_v15 = vld [vmem:[#allocation8 + $0x2c0] sm:$0xff] }
 0x1ee   :  { %1803 = vmatpush.msrb.mxu2 %v1627_v58  ;;  %1868 = vmatpush.msrb.mxu3 %v1659_v44  ;;  %v1657_v44 = vld [vmem:[#allocation8 + $0x3c0] sm:$0xff] }
 0x1ef   :  { %v1036_v58 = vadd.f32 %v3272_v54, %v971_v38 }
 0x1f0   :  { %v882_v29 = vpop.f32.mrf.mxu2  ;;  %v3520_v21 = vpop.f32.mrf.mxu0  ;;  %1804 = vmatpush.msrb.mxu2 %v1625_v15  ;;  %1869 = vmatpush.msrb.mxu3 %v1657_v44  ;;  %v4582_v15 = vld [vmem:[#allocation25_spill] sm:$0xff]  ;;  %v4584_v44 = vld [vmem:[#allocation27_spill] sm:$0xff] }
 0x1f1   :  { %v883_v27 = vadd.f32 %v882_v29, %v818_v53  ;;  %v947_v55 = vpop.f32.mrf.mxu3  ;;  %4577 = vst [vmem:[#allocation78_spill] sm:$0xff] %v3520_v21  ;;  %v3522_v53 = vld [vmem:[#allocation2 + $0x1f8] sm:$0xff]  ;;  %v4389_v29 = vmax.f32 %v3060_v31, 0.0  ;;  %v4581_v21 = vld [vmem:[#allocation36_spill] sm:$0xff] }
 0x1f2   :  { %1339 = vmatmul.f32.gmra.mxu1 %v3263_v20  ;;  %v4390_v20 = vmax.f32 %v3289_v16, 0.0  ;;  %v4391_v54 = vmax.f32 %v4581_v21, 0.0 }
 0x1f3   :  { %v3507_v42 = vadd.f32 %v947_v55, %v883_v27  ;;  %1274 = vmatmul.f32.gmra.mxu0 %v3256_v36  ;;  %v3529_v27 = vpop.f32.mrf.mxu1 }
 0x1f4   :  { %1209 = vmatmul.f32.gmra.mxu3 %v3522_v53  ;;  %4578 = vst [vmem:[#allocation79_spill] sm:$0xff] %v3529_v27 }
 0x1f5   :  { %4576 = vst [vmem:[#allocation77_spill] sm:$0xff] %v3507_v42  ;;  %1144 = vmatmul.f32.gmra.mxu2 %v3516_v14 }
 0x1f8   :  { %v885_v36 = vpop.f32.mrf.mxu2 }
 0x1f9   :  { %v886_v6 = vadd.f32 %v885_v36, %v821_v24  ;;  %v950_v52 = vpop.f32.mrf.mxu3  ;;  %v4580_v24 = vld [vmem:[#allocation26_spill] sm:$0xff] }
 0x1fa   :  { %1752 = vmatmul.f32.vlgmr.msra.gmra.mxu1 %v4390_v20 }
 0x1fb   :  { %v3531_v55 = vadd.f32 %v950_v52, %v886_v6  ;;  %1687 = vmatmul.f32.vlgmr.msra.gmra.mxu0 %v4389_v29  ;;  %v974_v6 = vadd.f32 %v3285_v61, %v3514_v45  ;;  %v3542_v52 = vpop.f32.mrf.mxu0  ;;  %v3551_v20 = vpop.f32.mrf.mxu1  ;;  %v1623_v61 = vld [vmem:[#allocation8 + $0x2b0] sm:$0xff] }
 0x1fc   :  { %1424 = vmatmul.f32.vlgmr.msra.gmra.mxu3 %v4580_v24  ;;  %4583 = vst [vmem:[#allocation26_spill] sm:$0xff] %v3551_v20  ;;  %1805 = vmatpush.msrb.mxu2 %v1623_v61  ;;  %v4394_v20 = vmax.f32 %v3319_v57, 0.0  ;;  %v4587_v61 = vld [vmem:[#allocation28_spill] sm:$0xff] }
 0x1fd   :  { %4579 = vst [vmem:[#allocation80_spill] sm:$0xff] %v3531_v55  ;;  %1359 = vmatmul.f32.vlgmr.msra.gmra.mxu2 %v3277_v11  ;;  %v4392_v11 = vmax.f32 %v3304_v23, 0.0  ;;  %v1039_v24 = vadd.f32 %v4582_v15, %v974_v6 }
 0x200   :  { %v1100_v36 = vpop.f32.mrf.mxu2 }
 0x201   :  { %v1101_v29 = vadd.f32 %v1100_v36, %v1036_v58  ;;  %v1165_v38 = vpop.f32.mrf.mxu3  ;;  %v4585_v58 = vld [vmem:[#allocation29_spill] sm:$0xff]  ;;  %v1655_v36 = vld [vmem:[#allocation8 + $0x3b0] sm:$0xff] }
 0x202   :  { %1755 = vmatmul.f32.gmra.mxu1 %v4392_v11  ;;  %1870 = vmatpush.msrb.mxu3 %v1655_v36  ;;  %v4588_v11 = vld [vmem:[#allocation30_spill] sm:$0xff]  ;;  %v1653_v36 = vld [vmem:[#allocation8 + $0x3a0] sm:$0xff] }
 0x203   :  { %v3546_v27 = vadd.f32 %v1165_v38, %v1101_v29  ;;  %1690 = vmatmul.f32.gmra.mxu0 %v4391_v54  ;;  %v977_v29 = vadd.f32 %v3300_v40, %v3514_v45  ;;  %v4586_v54 = vld [vmem:[#allocation37_spill] sm:$0xff]  ;;  %v1621_v40 = vld [vmem:[#allocation8 + $0x2a0] sm:$0xff] }
 0x204   :  { %1427 = vmatmul.f32.gmra.mxu3 %v4585_v58  ;;  %v4393_v6 = vmax.f32 %v4586_v54, 0.0  ;;  %1806 = vmatpush.msrb.mxu2 %v1621_v40  ;;  %v4591_v40 = vld [vmem:[#allocation32_spill] sm:$0xff] }
 0x205   :  { %1362 = vmatmul.f32.gmra.mxu2 %v4584_v44  ;;  %v3561_v44 = vpop.f32.mrf.mxu0  ;;  %v1042_v58 = vadd.f32 %v4587_v61, %v977_v29  ;;  %1871 = vmatpush.msrb.mxu3 %v1653_v36 }
 0x208   :  { %v1103_v43 = vpop.f32.mrf.mxu2 }
 0x209   :  { %v1104_v38 = vadd.f32 %v1103_v43, %v1039_v24  ;;  %v1168_v15 = vpop.f32.mrf.mxu3  ;;  %v3571_v43 = vpop.f32.mrf.mxu1  ;;  %v4589_v24 = vld [vmem:[#allocation31_spill] sm:$0xff] }
 0x20a   :  { %1758 = vmatmul.f32.gmra.mxu1 %v4394_v20 }
 0x20b   :  { %v3563_v19 = vadd.f32 %v1168_v15, %v1104_v38  ;;  %1693 = vmatmul.f32.gmra.mxu0 %v4393_v6  ;;  %v980_v38 = vadd.f32 %v3315_v26, %v3514_v45  ;;  %v4590_v6 = vld [vmem:[#allocation38_spill] sm:$0xff] }
 0x20c   :  { %1430 = vmatmul.f32.gmra.mxu3 %v4589_v24  ;;  %v4395_v29 = vmax.f32 %v4590_v6, 0.0  ;;  %v1619_v26 = vld [vmem:[#allocation8 + $0x290] sm:$0xff] }
 0x20d   :  { %1365 = vmatmul.f32.gmra.mxu2 %v4588_v11  ;;  %v4396_v11 = vmax.f32 %v3334_v0, 0.0  ;;  %v1045_v20 = vadd.f32 %v4591_v40, %v980_v38  ;;  %v3583_v24 = vpop.f32.mrf.mxu0  ;;  %v4594_v40 = vld [vmem:[#allocation39_spill] sm:$0xff] }
 0x20e   :  { %1807 = vmatpush.msrb.mxu2 %v1619_v26  ;;  %v4595_v26 = vld [vmem:[#allocation33_spill] sm:$0xff] }
 0x210   :  { %v1106_v4 = vpop.f32.mrf.mxu2 }
 0x211   :  { %v1107_v15 = vadd.f32 %v1106_v4, %v1042_v58  ;;  %v1171_v61 = vpop.f32.mrf.mxu3  ;;  %v4593_v4 = vld [vmem:[#allocation16_spill] sm:$0xff]  ;;  %v1651_v58 = vld [vmem:[#allocation8 + $0x390] sm:$0xff] }
 0x212   :  { %1761 = vmatmul.f32.gmra.mxu1 %v4396_v11  ;;  %1872 = vmatpush.msrb.mxu3 %v1651_v58  ;;  %v4596_v11 = vld [vmem:[#allocation35_spill] sm:$0xff] }
 0x213   :  { %v3578_v62 = vadd.f32 %v1171_v61, %v1107_v15  ;;  %1696 = vmatmul.f32.gmra.mxu0 %v4395_v29  ;;  %v983_v15 = vadd.f32 %v3330_v32, %v3514_v45  ;;  %v3591_v61 = vpop.f32.mrf.mxu1  ;;  %v4397_v29 = vmax.f32 %v4594_v40, 0.0  ;;  %v1617_v32 = vld [vmem:[#allocation8 + $0x280] sm:$0xff]  ;;  %v4597_v58 = vld [vmem:[#allocation43_spill] sm:$0xff] }
 0x214   :  { %1433 = vmatmul.f32.gmra.mxu3 %v4593_v4  ;;  %1808 = vmatpush.msrb.mxu2 %v1617_v32  ;;  %v4599_v32 = vld [vmem:[#allocation44_spill] sm:$0xff] }
 0x215   :  { %1368 = vmatmul.f32.gmra.mxu2 %v4592_v30  ;;  %v4398_v30 = vmax.f32 %v3349_v47, 0.0  ;;  %v1048_v4 = vadd.f32 %v4595_v26, %v983_v15  ;;  %v4600_v47 = vld [vmem:[#allocation46_spill] sm:$0xff] }
 0x218   :  { %v1109_v36 = vpop.f32.mrf.mxu2 }
 0x219   :  { %v1110_v38 = vadd.f32 %v1109_v36, %v1045_v20  ;;  %v1174_v60 = vpop.f32.mrf.mxu3  ;;  %v3603_v20 = vpop.f32.mrf.mxu0  ;;  %v1649_v36 = vld [vmem:[#allocation8 + $0x380] sm:$0xff] }
 0x21a   :  { %1764 = vmatmul.f32.gmra.mxu1 %v4398_v30  ;;  %1873 = vmatpush.msrb.mxu3 %v1649_v36 }
 0x21b   :  { %v3595_v1 = vadd.f32 %v1174_v60, %v1110_v38  ;;  %1699 = vmatmul.f32.gmra.mxu0 %v4397_v29  ;;  %v986_v60 = vadd.f32 %v3345_v7, %v3514_v45  ;;  %v4598_v29 = vld [vmem:[#allocation40_spill] sm:$0xff]  ;;  %v3610_v35 = vpop.f32.mrf.mxu1  ;;  %v1615_v7 = vld [vmem:[#allocation8 + $0x270] sm:$0xff] }
 0x21c   :  { %1436 = vmatmul.f32.gmra.mxu3 %v4597_v58  ;;  %v4400_v15 = vmax.f32 %v4598_v29, 0.0  ;;  %1809 = vmatpush.msrb.mxu2 %v1615_v7  ;;  %v4602_v29 = vld [vmem:[#allocation41_spill] sm:$0xff] }
 0x21d   :  { %1371 = vmatmul.f32.gmra.mxu2 %v4596_v11  ;;  %v4403_v11 = vmax.f32 %v3362_v56, 0.0  ;;  %v1051_v58 = vadd.f32 %v4599_v32, %v986_v60  ;;  %v4405_v60 = vmax.f32 %v4602_v29, 0.0  ;;  %v4603_v7 = vld [vmem:[#allocation49_spill] sm:$0xff]  ;;  %v4411_v29 = vmax.f32 %v3392_v5, 0.0 }
 0x220   :  { %v1112_v46 = vpop.f32.mrf.mxu2 }
 0x221   :  { %v1113_v38 = vadd.f32 %v1112_v46, %v1048_v4  ;;  %v1177_v26 = vpop.f32.mrf.mxu3  ;;  %v4601_v46 = vld [vmem:[#allocation47_spill] sm:$0xff]  ;;  %v1647_v4 = vld [vmem:[#allocation8 + $0x370] sm:$0xff] }
 0x222   :  { %1767 = vmatmul.f32.gmra.mxu1 %v4403_v11  ;;  %1874 = vmatpush.msrb.mxu3 %v1647_v4  ;;  %v4604_v4 = vld [vmem:[#allocation50_spill] sm:$0xff] }
 0x223   :  { %v3612_v30 = vadd.f32 %v1177_v26, %v1113_v38  ;;  %1702 = vmatmul.f32.gmra.mxu0 %v4400_v15  ;;  %v989_v38 = vadd.f32 %v3360_v49, %v3514_v45  ;;  %v3623_v26 = vpop.f32.mrf.mxu0  ;;  %v3632_v11 = vpop.f32.mrf.mxu1  ;;  %v1613_v49 = vld [vmem:[#allocation8 + $0x260] sm:$0xff] }
 0x224   :  { %1439 = vmatmul.f32.gmra.mxu3 %v4601_v46  ;;  %1810 = vmatpush.msrb.mxu2 %v1613_v49 }
 0x225   :  { %1374 = vmatmul.f32.gmra.mxu2 %v4600_v47  ;;  %v4408_v47 = vmax.f32 %v3377_v18, 0.0  ;;  %v1054_v46 = vadd.f32 %v4603_v7, %v989_v38 }
 0x228   :  { %v1115_v36 = vpop.f32.mrf.mxu2 }
 0x229   :  { %v1116_v15 = vadd.f32 %v1115_v36, %v1051_v58  ;;  %v1180_v32 = vpop.f32.mrf.mxu3  ;;  %v4605_v58 = vld [vmem:[#allocation51_spill] sm:$0xff]  ;;  %v1645_v36 = vld [vmem:[#allocation8 + $0x360] sm:$0xff] }
 0x22a   :  { %1770 = vmatmul.f32.gmra.mxu1 %v4408_v47  ;;  %1875 = vmatpush.msrb.mxu3 %v1645_v36  ;;  %v1643_v36 = vld [vmem:[#allocation8 + $0x350] sm:$0xff] }
 0x22b   :  { %v3627_v56 = vadd.f32 %v1180_v32, %v1116_v15  ;;  %1705 = vmatmul.f32.gmra.mxu0 %v4405_v60  ;;  %v992_v15 = vadd.f32 %v3375_v48, %v3514_v45  ;;  %v4606_v60 = vld [vmem:[#allocation42_spill] sm:$0xff] }
 0x22c   :  { %1442 = vmatmul.f32.gmra.mxu3 %v4605_v58  ;;  %v4410_v38 = vmax.f32 %v4606_v60, 0.0  ;;  %v4608_v58 = vld [vmem:[#allocation53_spill] sm:$0xff]  ;;  %v1611_v48 = vld [vmem:[#allocation8 + $0x250] sm:$0xff] }
 0x22d   :  { %1377 = vmatmul.f32.gmra.mxu2 %v4604_v4  ;;  %v3642_v4 = vpop.f32.mrf.mxu0  ;;  %v1057_v49 = vadd.f32 %v3380_v2, %v992_v15  ;;  %1876 = vmatpush.msrb.mxu3 %v1643_v36  ;;  %v4413_v2 = vmax.f32 %v3409_v63, 0.0  ;;  %v1566_v36 = vld [vmem:[#allocation8 + $0xe8] sm:$0xff]  ;;  %v4614_v63 = vld [vmem:[#allocation18_spill] sm:$0xff] }
 0x22e   :  { %1811 = vmatpush.msrb.mxu2 %v1611_v48  ;;  %v1609_v48 = vld [vmem:[#allocation8 + $0x240] sm:$0xff] }
 0x230   :  { %v1118_v40 = vpop.f32.mrf.mxu2  ;;  %1812 = vmatpush.msrb.mxu2 %v1609_v48  ;;  %v4418_v48 = vmax.f32 %v3426_v37, 0.0 }
 0x231   :  { %v1119_v32 = vadd.f32 %v1118_v40, %v1054_v46  ;;  %v1183_v7 = vpop.f32.mrf.mxu3  ;;  %v3652_v40 = vpop.f32.mrf.mxu1  ;;  %v4609_v46 = vld [vmem:[#allocation54_spill] sm:$0xff] }
 0x232   :  { %1773 = vmatmul.f32.gmra.mxu1 %v4411_v29 }
 0x233   :  { %v3644_v18 = vadd.f32 %v1183_v7, %v1119_v32  ;;  %1708 = vmatmul.f32.gmra.mxu0 %v4410_v38  ;;  %v4610_v7 = vld [vmem:[#allocation17_spill] sm:$0xff] }
 0x234   :  { %1445 = vmatmul.f32.gmra.mxu3 %v4609_v46  ;;  %v4412_v60 = vmax.f32 %v4610_v7, 0.0  ;;  %v1568_v46 = vld [vmem:[#allocation8 + $0xf8] sm:$0xff]  ;;  %v4419_v7 = vmax.f32 %v4614_v63, 0.0 }
 0x235   :  { %4607 = vst [vmem:[#allocation36_spill] sm:$0xff] %v3644_v18  ;;  %1380 = vmatmul.f32.gmra.mxu2 %v4608_v58  ;;  %v3661_v58 = vpop.f32.mrf.mxu0  ;;  %1931 = vmatpush.msrb.mxu0 %v1568_v46  ;;  %v1562_v46 = vld [vmem:[#allocation8 + $0xc8] sm:$0xff] }
 0x237   :  { %1932 = vmatpush.msrb.mxu0 %v1566_v36  ;;  %v1592_v36 = vld [vmem:[#allocation8 + $0x1b8] sm:$0xff] }
 0x238   :  { %v1121_v47 = vpop.f32.mrf.mxu2 }
 0x239   :  { %v1122_v32 = vadd.f32 %v1121_v47, %v1057_v49  ;;  %v1186_v38 = vpop.f32.mrf.mxu3  ;;  %v1600_v47 = vld [vmem:[#allocation8 + $0x1f8] sm:$0xff]  ;;  %v4612_v49 = vld [vmem:[#allocation58_spill] sm:$0xff] }
 0x23a   :  { %1776 = vmatmul.f32.gmra.mxu1 %v4413_v2  ;;  %v1596_v2 = vld [vmem:[#allocation8 + $0x1d8] sm:$0xff] }
 0x23b   :  { %v3657_v15 = vadd.f32 %v1186_v38, %v1122_v32  ;;  %1711 = vmatmul.f32.gmra.mxu0 %v4412_v60  ;;  %1996 = vmatpush.msrb.mxu1 %v1600_v47  ;;  %v1641_v38 = vld [vmem:[#allocation8 + $0x340] sm:$0xff]  ;;  %v1598_v32 = vld [vmem:[#allocation8 + $0x1e8] sm:$0xff]  ;;  %v3669_v60 = vpop.f32.mrf.mxu1 }
 0x23c   :  { %1448 = vmatmul.f32.gmra.mxu3 %v4612_v49  ;;  %v1594_v47 = vld [vmem:[#allocation8 + $0x1c8] sm:$0xff]  ;;  %v1607_v49 = vld [vmem:[#allocation8 + $0x230] sm:$0xff] }
 0x23d   :  { %4611 = vst [vmem:[#allocation25_spill] sm:$0xff] %v3657_v15  ;;  %1383 = vmatmul.f32.gmra.mxu2 %v3396_v22  ;;  %1877 = vmatpush.msrb.mxu3 %v1641_v38  ;;  %v1564_v22 = vld [vmem:[#allocation8 + $0xd8] sm:$0xff] }
 0x23e   :  { %1997 = vmatpush.msrb.mxu1 %v1598_v32  ;;  %1933 = vmatpush.msrb.mxu0 %v1564_v22  ;;  %v1560_v38 = vld [vmem:[#allocation8 + $0xb8] sm:$0xff]  ;;  %v3680_v32 = vpop.f32.mrf.mxu0  ;;  %v4616_v22 = vld [vmem:[#allocation61_spill] sm:$0xff] }
 0x23f   :  { %1813 = vmatpush.msrb.mxu2 %v1607_v49  ;;  %v1556_v49 = vld [vmem:[#allocation8 + $0x98] sm:$0xff] }
 0x240   :  { %v3667_v29 = vpop.f32.mrf.mxu2  ;;  %1998 = vmatpush.msrb.mxu1 %v1596_v2  ;;  %1934 = vmatpush.msrb.mxu0 %v1562_v46  ;;  %v1639_v2 = vld [vmem:[#allocation8 + $0x330] sm:$0xff]  ;;  %v4421_v46 = vmax.f32 %v3443_v50, 0.0 }
 0x241   :  { %4613 = vst [vmem:[#allocation27_spill] sm:$0xff] %v3667_v29  ;;  %v3672_v5 = vpop.f32.mrf.mxu3  ;;  %v1590_v29 = vld [vmem:[#allocation8 + $0x1a8] sm:$0xff]  ;;  %1878 = vmatpush.msrb.mxu3 %v1639_v2  ;;  %v1584_v2 = vld [vmem:[#allocation8 + $0x178] sm:$0xff] }
 0x242   :  { %4615 = vst [vmem:[#allocation29_spill] sm:$0xff] %v3672_v5  ;;  %1779 = vmatmul.f32.gmra.mxu1 %v4418_v48  ;;  %v1558_v5 = vld [vmem:[#allocation8 + $0xa8] sm:$0xff]  ;;  %1935 = vmatpush.msrb.mxu0 %v1560_v38  ;;  %v4618_v48 = vld [vmem:[#allocation20_spill] sm:$0xff] }
 0x243   :  { %1714 = vmatmul.f32.gmra.mxu0 %v4419_v7  ;;  %1999 = vmatpush.msrb.mxu1 %v1594_v47  ;;  %v4422_v7 = vmax.f32 %v4618_v48, 0.0  ;;  %v3689_v47 = vpop.f32.mrf.mxu1  ;;  %v1554_v38 = vld [vmem:[#allocation8 + $0x88] sm:$0xff] }
 0x244   :  { %1451 = vmatmul.f32.gmra.mxu3 %v4616_v22  ;;  %1936 = vmatpush.msrb.mxu0 %v1558_v5  ;;  %v1586_v22 = vld [vmem:[#allocation8 + $0x188] sm:$0xff]  ;;  %v1552_v5 = vld [vmem:[#allocation8 + $0x78] sm:$0xff] }
 0x245   :  { %1386 = vmatmul.f32.gmra.mxu2 %v3413_v34  ;;  %2000 = vmatpush.msrb.mxu1 %v1592_v36  ;;  %v1588_v34 = vld [vmem:[#allocation8 + $0x198] sm:$0xff]  ;;  %v1605_v36 = vld [vmem:[#allocation8 + $0x220] sm:$0xff] }
 0x246   :  { %1937 = vmatpush.msrb.mxu0 %v1556_v49  ;;  %1814 = vmatpush.msrb.mxu2 %v1605_v36  ;;  %v1550_v49 = vld [vmem:[#allocation8 + $0x68] sm:$0xff]  ;;  %v1548_v36 = vld [vmem:[#allocation8 + $0x58] sm:$0xff] }
 0x247   :  { %2001 = vmatpush.msrb.mxu1 %v1590_v29  ;;  %v1637_v29 = vld [vmem:[#allocation8 + $0x320] sm:$0xff] }
 0x248   :  { %v3683_v63 = vpop.f32.mrf.mxu2  ;;  %1938 = vmatpush.msrb.mxu0 %v1554_v38  ;;  %1879 = vmatpush.msrb.mxu3 %v1637_v29  ;;  %v1576_v29 = vld [vmem:[#allocation8 + $0x138] sm:$0xff] }
 0x249   :  { %4617 = vst [vmem:[#allocation37_spill] sm:$0xff] %v3683_v63  ;;  %v3686_v37 = vpop.f32.mrf.mxu3  ;;  %2002 = vmatpush.msrb.mxu1 %v1588_v34  ;;  %v3699_v34 = vpop.f32.mrf.mxu0 }
 0x24a   :  { %4619 = vst [vmem:[#allocation28_spill] sm:$0xff] %v3686_v37  ;;  %1782 = vmatmul.f32.gmra.mxu1 %v4421_v46  ;;  %v1582_v37 = vld [vmem:[#allocation8 + $0x168] sm:$0xff]  ;;  %v4620_v46 = vld [vmem:[#allocation19_spill] sm:$0xff]  ;;  %1939 = vmatpush.msrb.mxu0 %v1552_v5  ;;  %v1635_v5 = vld [vmem:[#allocation8 + $0x310] sm:$0xff] }
 0x24b   :  { %1717 = vmatmul.f32.gmra.mxu0 %v4422_v7  ;;  %2003 = vmatpush.msrb.mxu1 %v1586_v22  ;;  %v4425_v7 = vmax.f32 %v4620_v46, 0.0  ;;  %v1578_v22 = vld [vmem:[#allocation8 + $0x148] sm:$0xff]  ;;  %v3707_v38 = vpop.f32.mrf.mxu1 }
 0x24c   :  { %1454 = vmatmul.f32.gmra.mxu3 %v3434_v59  ;;  %v4427_v59 = vmax.f32 %v3458_v41, 0.0  ;;  %1940 = vmatpush.msrb.mxu0 %v1550_v49  ;;  %v1574_v46 = vld [vmem:[#allocation8 + $0x128] sm:$0xff]  ;;  %v4429_v49 = vmax.f32 %v3473_v12, 0.0 }
 0x24d   :  { %1389 = vmatmul.f32.gmra.mxu2 %v3430_v13  ;;  %2004 = vmatpush.msrb.mxu1 %v1584_v2  ;;  %v1580_v13 = vld [vmem:[#allocation8 + $0x158] sm:$0xff]  ;;  %v1603_v2 = vld [vmem:[#allocation8 + $0x210] sm:$0xff]  ;;  %v1538_v12 = vld [vmem:[#allocation8 + $0x8] sm:$0xff] }
 0x24e   :  { %1815 = vmatpush.msrb.mxu2 %v1603_v2  ;;  %1941 = vmatpush.msrb.mxu0 %v1548_v36  ;;  %v1601_v2 = vld [vmem:[#allocation8 + $0x200] sm:$0xff]  ;;  %v1570_v36 = vld [vmem:[#allocation8 + $0x108] sm:$0xff] }
 0x24f   :  { %2005 = vmatpush.msrb.mxu1 %v1582_v37  ;;  %v1546_v37 = vld [vmem:[#allocation8 + $0x48] sm:$0xff]  ;;  %1880 = vmatpush.msrb.mxu3 %v1635_v5  ;;  %v1633_v5 = vld [vmem:[#allocation8 + $0x300] sm:$0xff] }
 0x250   :  { %v3697_v63 = vpop.f32.mrf.mxu2  ;;  %1942 = vmatpush.msrb.mxu0 %v1546_v37  ;;  %1816 = vmatpush.msrb.mxu2 %v1601_v2  ;;  %v1540_v37 = vld [vmem:[#allocation8 + $0x18] sm:$0xff] }
 0x251   :  { %v3702_v50 = vpop.f32.mrf.mxu3  ;;  %2006 = vmatpush.msrb.mxu1 %v1580_v13  ;;  %v4621_v13 = vld [vmem:[#allocation21_spill] sm:$0xff]  ;;  %1881 = vmatpush.msrb.mxu3 %v1633_v5  ;;  %v1664_v2 = vld [vmem:[#allocation8 + $0x3f8] sm:$0xff]  ;;  %v4624_v5 = vld [vmem:[#allocation22_spill] sm:$0xff] }
 0x252   :  { %1785 = vmatmul.f32.gmra.mxu1 %v4427_v59  ;;  %v4428_v41 = vmax.f32 %v4621_v13, 0.0 }
 0x253   :  { %1720 = vmatmul.f32.gmra.mxu0 %v4425_v7  ;;  %2007 = vmatpush.msrb.mxu1 %v1578_v22  ;;  %v3719_v22 = vpop.f32.mrf.mxu0 }
 0x254   :  { %1457 = vmatmul.f32.gmra.mxu3 %v3451_v9  ;;  %v1544_v9 = vld [vmem:[#allocation8 + $0x38] sm:$0xff] }
 0x255   :  { %1392 = vmatmul.f32.gmra.mxu2 %v3447_v3  ;;  %2008 = vmatpush.msrb.mxu1 %v1576_v29  ;;  %v1572_v3 = vld [vmem:[#allocation8 + $0x118] sm:$0xff]  ;;  %v1542_v29 = vld [vmem:[#allocation8 + $0x28] sm:$0xff] }
 0x256   :  { %1943 = vmatpush.msrb.mxu0 %v1544_v9  ;;  %2126 = vmatpush.msra.mxu3 %v1664_v2 }
 0x257   :  { %2009 = vmatpush.msrb.mxu1 %v1574_v46  ;;  %v3726_v46 = vpop.f32.mrf.mxu1 }
 0x258   :  { %v3713_v7 = vpop.f32.mrf.mxu2  ;;  %1944 = vmatpush.msrb.mxu0 %v1542_v29 }
 0x259   :  { %v3716_v59 = vpop.f32.mrf.mxu3  ;;  %2010 = vmatpush.msrb.mxu1 %v1572_v3  ;;  %v4623_v3 = vld [vmem:[#allocation23_spill] sm:$0xff] }
 0x25a   :  { %4622 = vst [vmem:[#allocation30_spill] sm:$0xff] %v3716_v59  ;;  %1788 = vmatmul.f32.gmra.mxu1 %v4429_v49  ;;  %1945 = vmatpush.msrb.mxu0 %v1540_v37  ;;  %v4432_v49 = vmax.f32 %v3490_v51, 0.0  ;;  %v4435_v37 = vmax.f32 %v4624_v5, 0.0 }
 0x25b   :  { %1723 = vmatmul.f32.gmra.mxu0 %v4428_v41  ;;  %2011 = vmatpush.msrb.mxu1 %v1570_v36  ;;  %v4431_v41 = vmax.f32 %v4623_v3, 0.0  ;;  %v3737_v9 = vpop.f32.mrf.mxu0 }
 0x25c   :  { %1460 = vmatmul.f32.gmra.mxu3 %v3468_v28  ;;  %v1632_v28 = vld [vmem:[#allocation8 + $0x2f8] sm:$0xff]  ;;  %1946 = vmatpush.msrb.mxu0 %v1538_v12  ;;  %v1630_v12 = vld [vmem:[#allocation8 + $0x2e8] sm:$0xff] }
 0x25d   :  { %1395 = vmatmul.f32.gmra.mxu2 %v3464_v8 }
 0x25e   :  { %2061 = vmatpush.msra.mxu2 %v1632_v28  ;;  %v1662_v28 = vld [vmem:[#allocation8 + $0x3e8] sm:$0xff] }
 0x25f   :  { %v3745_v29 = vpop.f32.mrf.mxu1  ;;  %2127 = vmatpush.msra.mxu3 %v1662_v28  ;;  %v1660_v28 = vld [vmem:[#allocation8 + $0x3d8] sm:$0xff] }
 0x260   :  { %v3729_v59 = vpop.f32.mrf.mxu2  ;;  %2062 = vmatpush.msra.mxu2 %v1630_v12  ;;  %v3770_v12 = vperm.slane %v3511_v10, 3 }
 0x261   :  { %v3732_v8 = vpop.f32.mrf.mxu3  ;;  %2128 = vmatpush.msra.mxu3 %v1660_v28  ;;  %v1658_v28 = vld [vmem:[#allocation8 + $0x3c8] sm:$0xff] }
 0x262   :  { %1791 = vmatmul.f32.gmra.mxu1 %v4432_v49  ;;  %v4625_v49 = vld [vmem:[#allocation24_spill] sm:$0xff] }
 0x263   :  { %1726 = vmatmul.f32.gmra.mxu0 %v4431_v41  ;;  %v4438_v51 = vmax.f32 %v4625_v49, 0.0  ;;  %v1231_v49 = vadd.f32 %v3542_v52, %v3770_v12  ;;  %v1626_v52 = vld [vmem:[#allocation8 + $0x2c8] sm:$0xff]  ;;  %2129 = vmatpush.msra.mxu3 %v1658_v28  ;;  %v4450_v28 = vmax.f32 %v3578_v62, 0.0 }
 0x264   :  { %1463 = vmatmul.f32.gmra.mxu3 %v3485_v39  ;;  %v3756_v39 = vpop.f32.mrf.mxu0 }
 0x265   :  { %1398 = vmatmul.f32.gmra.mxu2 %v3479_v25  ;;  %v4436_v25 = vmax.f32 %v3507_v42, 0.0 }
 0x268   :  { %v3743_v36 = vpop.f32.mrf.mxu2 }
 0x269   :  { %v3748_v41 = vpop.f32.mrf.mxu3 }
 0x26a   :  { %1794 = vmatmul.f32.gmra.mxu1 %v4436_v25 }
 0x26b   :  { %1729 = vmatmul.f32.gmra.mxu0 %v4435_v37  ;;  %v4440_v37 = vmax.f32 %v3531_v55, 0.0  ;;  %v4627_v55 = vmax.f32 %v3060_v31, 0.0 }
 0x26c   :  { %1466 = vmatmul.f32.gmra.mxu3 %v3500_v33  ;;  %v1628_v33 = vld [vmem:[#allocation8 + $0x2d8] sm:$0xff] }
 0x26d   :  { %1401 = vmatmul.f32.gmra.mxu2 %v3496_v17  ;;  %v3765_v17 = vpop.f32.mrf.mxu1 }
 0x26e   :  { %2063 = vmatpush.msra.mxu2 %v1628_v33  ;;  %v1296_v33 = vadd.f32 %v3571_v43, %v1231_v49  ;;  %v4453_v43 = vmax.f32 %v3563_v19, 0.0 }
 0x270   :  { %v3759_v2 = vpop.f32.mrf.mxu2  ;;  %2064 = vmatpush.msra.mxu2 %v1626_v52  ;;  %v1656_v52 = vld [vmem:[#allocation8 + $0x3b8] sm:$0xff] }
 0x271   :  { %v3762_v3 = vpop.f32.mrf.mxu3  ;;  %2130 = vmatpush.msra.mxu3 %v1656_v52  ;;  %v1654_v52 = vld [vmem:[#allocation8 + $0x3a8] sm:$0xff] }
 0x272   :  { %1797 = vmatmul.f32.gmra.mxu1 %v4440_v37 }
 0x273   :  { %1732 = vmatmul.f32.gmra.mxu0 %v4438_v51  ;;  %v3780_v51 = vpop.f32.mrf.mxu0  ;;  %2131 = vmatpush.msra.mxu3 %v1654_v52  ;;  %v1620_v52 = vld [vmem:[#allocation8 + $0x298] sm:$0xff] }
 0x274   :  { %1469 = vmatmul.f32.gmra.mxu3 %v3522_v53  ;;  %v4628_v53 = vmax.f32 %v3289_v16, 0.0 }
 0x275   :  { %1404 = vmatmul.f32.gmra.mxu2 %v3516_v14  ;;  %v4443_v14 = vmax.f32 %v3546_v27, 0.0  ;;  %v3788_v37 = vpop.f32.mrf.mxu1 }
 0x278   :  { %v3776_v25 = vpop.f32.mrf.mxu2 }
 0x279   :  { %v3782_v10 = vpop.f32.mrf.mxu3 }
 0x27a   :  { %4626 = vst [vmem:[#allocation31_spill] sm:$0xff] %v3782_v10  ;;  %2012 = vmatmul.f32.vlgmr.msrb.gmra.mxu1 %v4628_v53  ;;  %v1234_v10 = vadd.f32 %v3561_v44, %v3770_v12  ;;  %v4630_v44 = vmax.f32 %v3304_v23, 0.0  ;;  %v4631_v23 = vmax.f32 %v4586_v54, 0.0 }
 0x27b   :  { %1947 = vmatmul.f32.vlgmr.msrb.gmra.mxu0 %v4627_v55  ;;  %v3797_v49 = vpop.f32.mrf.mxu0 }
 0x27c   :  { %v1299_v16 = vadd.f32 %v3591_v61, %v1234_v10  ;;  %v1237_v61 = vadd.f32 %v3583_v24, %v3770_v12  ;;  %v4632_v24 = vmax.f32 %v3319_v57, 0.0  ;;  %v4633_v57 = vmax.f32 %v4590_v6, 0.0 }
 0x27d   :  { %1817 = vmatmul.f32.vlgmr.msrb.gmra.mxu2 %v4443_v14  ;;  %v4629_v14 = vmax.f32 %v4581_v21, 0.0 }
 0x280   :  { %v1360_v42 = vpop.f32.mrf.mxu2 }
 0x281   :  { %v1361_v31 = vadd.f32 %v1360_v42, %v1296_v33  ;;  %v1425_v55 = vpop.f32.mrf.mxu3  ;;  %v1624_v42 = vld [vmem:[#allocation8 + $0x2b8] sm:$0xff]  ;;  %v3809_v33 = vpop.f32.mrf.mxu1 }
 0x282   :  { %2015 = vmatmul.f32.gmra.mxu1 %v4630_v44  ;;  %2065 = vmatpush.msra.mxu2 %v1624_v42 }
 0x283   :  { %v3799_v5 = vadd.f32 %v1425_v55, %v1361_v31  ;;  %1950 = vmatmul.f32.gmra.mxu0 %v4629_v14  ;;  %v1302_v55 = vadd.f32 %v3610_v35, %v1237_v61  ;;  %v3821_v44 = vpop.f32.mrf.mxu0  ;;  %v1240_v35 = vadd.f32 %v3603_v20, %v3770_v12  ;;  %v4634_v20 = vmax.f32 %v3334_v0, 0.0 }
 0x285   :  { %v4452_v53 = vmax.f32 %v3799_v5, 0.0  ;;  %1820 = vmatmul.f32.gmra.mxu2 %v4453_v43 }
 0x287   :  { %1882 = vmatmul.f32.vlgmr.msrb.gmra.mxu3 %v4452_v53 }
 0x288   :  { %v1363_v21 = vpop.f32.mrf.mxu2 }
 0x289   :  { %v1364_v10 = vadd.f32 %v1363_v21, %v1299_v16  ;;  %v1428_v14 = vpop.f32.mrf.mxu3  ;;  %v1622_v16 = vld [vmem:[#allocation8 + $0x2a8] sm:$0xff]  ;;  %v3832_v21 = vpop.f32.mrf.mxu1 }
 0x28a   :  { %2018 = vmatmul.f32.gmra.mxu1 %v4632_v24  ;;  %2066 = vmatpush.msra.mxu2 %v1622_v16  ;;  %v1305_v24 = vadd.f32 %v3632_v11, %v1240_v35  ;;  %v1243_v11 = vadd.f32 %v3623_v26, %v3770_v12 }
 0x28b   :  { %v3816_v31 = vadd.f32 %v1428_v14, %v1364_v10  ;;  %1953 = vmatmul.f32.gmra.mxu0 %v4631_v23  ;;  %v4444_v14 = vmax.f32 %v3595_v1, 0.0 }
 0x28c   :  { %2067 = vmatpush.msra.mxu2 %v1620_v52 }
 0x28d   :  { %v4448_v42 = vmax.f32 %v3816_v31, 0.0  ;;  %1823 = vmatmul.f32.gmra.mxu2 %v4450_v28 }
 0x28f   :  { %1885 = vmatmul.f32.gmra.mxu3 %v4448_v42 }
 0x290   :  { %v1366_v54 = vpop.f32.mrf.mxu2 }
 0x291   :  { %v1367_v61 = vadd.f32 %v1366_v54, %v1302_v55  ;;  %v1431_v10 = vpop.f32.mrf.mxu3  ;;  %v3845_v55 = vpop.f32.mrf.mxu0  ;;  %v1652_v54 = vld [vmem:[#allocation8 + $0x398] sm:$0xff] }
 0x292   :  { %2021 = vmatmul.f32.gmra.mxu1 %v4634_v20  ;;  %2132 = vmatpush.msra.mxu3 %v1652_v54  ;;  %v4635_v20 = vld [vmem:[#allocation39_spill] sm:$0xff]  ;;  %v4637_v54 = vld [vmem:[#allocation45_spill] sm:$0xff] }
 0x293   :  { %v3835_v23 = vadd.f32 %v1431_v10, %v1367_v61  ;;  %1956 = vmatmul.f32.gmra.mxu0 %v4633_v57  ;;  %v4446_v10 = vmax.f32 %v3612_v30, 0.0  ;;  %v3852_v57 = vpop.f32.mrf.mxu1  ;;  %v4636_v52 = vmax.f32 %v4635_v20, 0.0  ;;  %v4638_v26 = vmax.f32 %v4637_v54, 0.0  ;;  %v4639_v54 = vld [vmem:[#allocation40_spill] sm:$0xff] }
 0x295   :  { %v4445_v16 = vmax.f32 %v3835_v23, 0.0  ;;  %1826 = vmatmul.f32.gmra.mxu2 %v4444_v14  ;;  %v1308_v14 = vadd.f32 %v3652_v40, %v1243_v11 }
 0x297   :  { %1888 = vmatmul.f32.gmra.mxu3 %v4445_v16 }
 0x298   :  { %v1369_v6 = vpop.f32.mrf.mxu2 }
 0x299   :  { %v1370_v35 = vadd.f32 %v1369_v6, %v1305_v24  ;;  %v1434_v61 = vpop.f32.mrf.mxu3  ;;  %v1618_v24 = vld [vmem:[#allocation8 + $0x288] sm:$0xff]  ;;  %v3868_v40 = vpop.f32.mrf.mxu0 }
 0x29a   :  { %2024 = vmatmul.f32.gmra.mxu1 %v4638_v26  ;;  %2068 = vmatpush.msra.mxu2 %v1618_v24  ;;  %v1650_v6 = vld [vmem:[#allocation8 + $0x388] sm:$0xff]  ;;  %v4640_v26 = vmax.f32 %v4639_v54, 0.0  ;;  %v4643_v54 = vld [vmem:[#allocation55_spill] sm:$0xff] }
 0x29b   :  { %v3854_v0 = vadd.f32 %v1434_v61, %v1370_v35  ;;  %1959 = vmatmul.f32.gmra.mxu0 %v4636_v52  ;;  %2133 = vmatpush.msra.mxu3 %v1650_v6  ;;  %v1246_v61 = vadd.f32 %v3642_v4, %v3770_v12  ;;  %v4449_v52 = vmax.f32 %v3627_v56, 0.0  ;;  %v4641_v4 = vld [vmem:[#allocation48_spill] sm:$0xff] }
 0x29c   :  { %v4642_v42 = vmax.f32 %v4641_v4, 0.0 }
 0x29d   :  { %v4447_v16 = vmax.f32 %v3854_v0, 0.0  ;;  %1829 = vmatmul.f32.gmra.mxu2 %v4446_v10  ;;  %v1311_v24 = vadd.f32 %v3669_v60, %v1246_v61  ;;  %v1249_v60 = vadd.f32 %v3661_v58, %v3770_v12  ;;  %v4647_v58 = vld [vmem:[#allocation52_spill] sm:$0xff] }
 0x29f   :  { %1891 = vmatmul.f32.gmra.mxu3 %v4447_v16  ;;  %v3876_v16 = vpop.f32.mrf.mxu1 }
 0x2a0   :  { %v1372_v35 = vpop.f32.mrf.mxu2 }
 0x2a1   :  { %v1373_v11 = vadd.f32 %v1372_v35, %v1308_v14  ;;  %v1437_v20 = vpop.f32.mrf.mxu3  ;;  %v1616_v14 = vld [vmem:[#allocation8 + $0x278] sm:$0xff]  ;;  %v3890_v4 = vpop.f32.mrf.mxu0 }
 0x2a2   :  { %2027 = vmatmul.f32.gmra.mxu1 %v4642_v42  ;;  %2069 = vmatpush.msra.mxu2 %v1616_v14  ;;  %v1648_v35 = vld [vmem:[#allocation8 + $0x378] sm:$0xff]  ;;  %v4645_v14 = vld [vmem:[#allocation41_spill] sm:$0xff] }
 0x2a3   :  { %v3871_v10 = vadd.f32 %v1437_v20, %v1373_v11  ;;  %1962 = vmatmul.f32.gmra.mxu0 %v4640_v26  ;;  %2134 = vmatpush.msra.mxu3 %v1648_v35  ;;  %v995_v26 = vadd.f32 %v4643_v54, %v3514_v45  ;;  %v4646_v28 = vmax.f32 %v4645_v14, 0.0  ;;  %v4649_v54 = vld [vmem:[#allocation57_spill] sm:$0xff]  ;;  %v4650_v14 = vld [vmem:[#allocation59_spill] sm:$0xff] }
 0x2a5   :  { %v4451_v6 = vmax.f32 %v3871_v10, 0.0  ;;  %1832 = vmatmul.f32.gmra.mxu2 %v4449_v52  ;;  %v4454_v52 = vmax.f32 %v3644_v18, 0.0  ;;  %v1060_v53 = vadd.f32 %v4649_v54, %v995_v26 }
 0x2a7   :  { %1894 = vmatmul.f32.gmra.mxu3 %v4451_v6  ;;  %v1314_v6 = vadd.f32 %v3689_v47, %v1249_v60  ;;  %v3903_v43 = vpop.f32.mrf.mxu1  ;;  %v1252_v47 = vadd.f32 %v3680_v32, %v3770_v12 }
 0x2a8   :  { %v1375_v11 = vpop.f32.mrf.mxu2 }
 0x2a9   :  { %v1376_v61 = vadd.f32 %v1375_v11, %v1311_v24  ;;  %v1440_v20 = vpop.f32.mrf.mxu3  ;;  %v4648_v24 = vmax.f32 %v4647_v58, 0.0  ;;  %v1614_v11 = vld [vmem:[#allocation8 + $0x268] sm:$0xff]  ;;  %v998_v58 = vadd.f32 %v4650_v14, %v3514_v45  ;;  %v1612_v14 = vld [vmem:[#allocation8 + $0x258] sm:$0xff] }
 0x2aa   :  { %2070 = vmatpush.msra.mxu2 %v1614_v11  ;;  %v4651_v11 = vld [vmem:[#allocation27_spill] sm:$0xff] }
 0x2ab   :  { %v3892_v42 = vadd.f32 %v1440_v20, %v1376_v61  ;;  %1965 = vmatmul.f32.gmra.mxu0 %v4646_v28  ;;  %2030 = vmatmul.f32.gmra.mxu1 %v4648_v24  ;;  %v1646_v28 = vld [vmem:[#allocation8 + $0x368] sm:$0xff]  ;;  %v4457_v24 = vmax.f32 %v3657_v15, 0.0  ;;  %v1125_v26 = vadd.f32 %v4651_v11, %v1060_v53  ;;  %v4657_v53 = vld [vmem:[#allocation62_spill] sm:$0xff] }
 0x2ac   :  { %2135 = vmatpush.msra.mxu3 %v1646_v28  ;;  %v3918_v28 = vpop.f32.mrf.mxu0  ;;  %2071 = vmatpush.msra.mxu2 %v1612_v14  ;;  %v4659_v14 = vld [vmem:[#allocation63_spill] sm:$0xff]  ;;  %v4665_v15 = vld [vmem:[#allocation66_spill] sm:$0xff] }
 0x2ad   :  { %4644 = vst [vmem:[#allocation38_spill] sm:$0xff] %v3892_v42  ;;  %v4456_v35 = vmax.f32 %v3892_v42, 0.0  ;;  %1835 = vmatmul.f32.gmra.mxu2 %v4454_v52  ;;  %v4653_v52 = vld [vmem:[#allocation42_spill] sm:$0xff] }
 0x2ae   :  { %v4654_v42 = vmax.f32 %v4653_v52, 0.0 }
 0x2af   :  { %1897 = vmatmul.f32.gmra.mxu3 %v4456_v35  ;;  %v1317_v35 = vadd.f32 %v3707_v38, %v1252_v47  ;;  %v1644_v38 = vld [vmem:[#allocation8 + $0x358] sm:$0xff]  ;;  %v3933_v47 = vpop.f32.mrf.mxu1 }
 0x2b0   :  { %v1378_v61 = vpop.f32.mrf.mxu2  ;;  %2136 = vmatpush.msra.mxu3 %v1644_v38 }
 0x2b1   :  { %v1379_v60 = vadd.f32 %v1378_v61, %v1314_v6  ;;  %v1443_v20 = vpop.f32.mrf.mxu3  ;;  %v4655_v6 = vld [vmem:[#allocation56_spill] sm:$0xff] }
 0x2b2   :  { %v4656_v61 = vmax.f32 %v4655_v6, 0.0 }
 0x2b3   :  { %v3913_v54 = vadd.f32 %v1443_v20, %v1379_v60  ;;  %1968 = vmatmul.f32.gmra.mxu0 %v4654_v42  ;;  %v1063_v60 = vadd.f32 %v4657_v53, %v998_v58  ;;  %v4658_v20 = vld [vmem:[#allocation29_spill] sm:$0xff]  ;;  %v1255_v42 = vadd.f32 %v3699_v34, %v3770_v12 }
 0x2b4   :  { %2033 = vmatmul.f32.gmra.mxu1 %v4656_v61  ;;  %v3927_v11 = vadd.f32 %v4658_v20, %v1125_v26  ;;  %v4660_v26 = vld [vmem:[#allocation37_spill] sm:$0xff] }
 0x2b5   :  { %4652 = vst [vmem:[#allocation32_spill] sm:$0xff] %v3913_v54  ;;  %v4458_v32 = vmax.f32 %v3913_v54, 0.0  ;;  %1838 = vmatmul.f32.gmra.mxu2 %v4457_v24  ;;  %v1001_v24 = vadd.f32 %v4659_v14, %v3514_v45  ;;  %v1128_v53 = vadd.f32 %v4660_v26, %v1063_v60  ;;  %v1320_v38 = vadd.f32 %v3726_v46, %v1255_v42  ;;  %v1610_v14 = vld [vmem:[#allocation8 + $0x248] sm:$0xff]  ;;  %v4666_v60 = vld [vmem:[#allocation28_spill] sm:$0xff] }
 0x2b6   :  { %v1507_v58 = vmax.f32 %v3927_v11, 0.0  ;;  %2072 = vmatpush.msra.mxu2 %v1610_v14  ;;  %v1642_v46 = vld [vmem:[#allocation8 + $0x348] sm:$0xff] }
 0x2b7   :  { %1900 = vmatmul.f32.gmra.mxu3 %v4458_v32  ;;  %v4661_v32 = vld [vmem:[#allocation17_spill] sm:$0xff]  ;;  %v1066_v18 = vadd.f32 %v4665_v15, %v1001_v24 }
 0x2b8   :  { %v1381_v52 = vpop.f32.mrf.mxu2  ;;  %v4662_v54 = vmax.f32 %v4661_v32, 0.0  ;;  %2137 = vmatpush.msra.mxu3 %v1642_v46  ;;  %v1258_v32 = vadd.f32 %v3719_v22, %v3770_v12 }
 0x2b9   :  { %v1382_v6 = vadd.f32 %v1381_v52, %v1317_v35  ;;  %v1446_v61 = vpop.f32.mrf.mxu3  ;;  %v4663_v35 = vld [vmem:[#allocation60_spill] sm:$0xff]  ;;  %v1131_v24 = vadd.f32 %v3697_v63, %v1066_v18  ;;  %v4672_v18 = vld [vmem:[#allocation70_spill] sm:$0xff] }
 0x2ba   :  { %v4664_v52 = vmax.f32 %v4663_v35, 0.0  ;;  %v4667_v35 = vld [vmem:[#allocation65_spill] sm:$0xff]  ;;  %v1323_v46 = vadd.f32 %v3745_v29, %v1258_v32  ;;  %v1261_v32 = vadd.f32 %v3737_v9, %v3770_v12 }
 0x2bb   :  { %v3939_v20 = vadd.f32 %v1446_v61, %v1382_v6  ;;  %1971 = vmatmul.f32.gmra.mxu0 %v4662_v54  ;;  %v3951_v6 = vadd.f32 %v4666_v60, %v1128_v53  ;;  %v3953_v61 = vpop.f32.mrf.mxu0  ;;  %v3963_v53 = vpop.f32.mrf.mxu1  ;;  %v4668_v60 = vld [vmem:[#allocation18_spill] sm:$0xff] }
 0x2bc   :  { %2036 = vmatmul.f32.gmra.mxu1 %v4664_v52  ;;  %v1004_v52 = vadd.f32 %v4667_v35, %v3514_v45  ;;  %v1608_v35 = vld [vmem:[#allocation8 + $0x238] sm:$0xff] }
 0x2bd   :  { %v4462_v34 = vmax.f32 %v3939_v20, 0.0  ;;  %1841 = vmatmul.f32.gmra.mxu2 %v1507_v58  ;;  %v4466_v15 = vmax.f32 %v3951_v6, 0.0 }
 0x2be   :  { %2073 = vmatpush.msra.mxu2 %v1608_v35  ;;  %v1069_v63 = vadd.f32 %v4672_v18, %v1004_v52  ;;  %v4674_v18 = vmax.f32 %v4618_v48, 0.0  ;;  %v1638_v48 = vld [vmem:[#allocation8 + $0x328] sm:$0xff] }
 0x2bf   :  { %1903 = vmatmul.f32.gmra.mxu3 %v4462_v34  ;;  %v4669_v34 = vmax.f32 %v4668_v60, 0.0 }
 0x2c0   :  { %v1384_v54 = vpop.f32.mrf.mxu2 }
 0x2c1   :  { %v1385_v42 = vadd.f32 %v1384_v54, %v1320_v38  ;;  %v1449_v26 = vpop.f32.mrf.mxu3  ;;  %v4670_v38 = vld [vmem:[#allocation64_spill] sm:$0xff] }
 0x2c2   :  { %v4671_v54 = vmax.f32 %v4670_v38, 0.0 }
 0x2c3   :  { %v3965_v14 = vadd.f32 %v1449_v26, %v1385_v42  ;;  %1974 = vmatmul.f32.gmra.mxu0 %v4669_v34  ;;  %v3977_v42 = vadd.f32 %v3702_v50, %v1131_v24  ;;  %v1640_v34 = vld [vmem:[#allocation8 + $0x338] sm:$0xff]  ;;  %v3983_v26 = vpop.f32.mrf.mxu0  ;;  %v1134_v50 = vadd.f32 %v3713_v7, %v1069_v63  ;;  %v4677_v7 = vld [vmem:[#allocation73_spill] sm:$0xff] }
 0x2c4   :  { %2039 = vmatmul.f32.gmra.mxu1 %v4671_v54  ;;  %2138 = vmatpush.msra.mxu3 %v1640_v34  ;;  %v4673_v54 = vld [vmem:[#allocation68_spill] sm:$0xff]  ;;  %v1326_v34 = vadd.f32 %v3765_v17, %v1261_v32  ;;  %v2238_v17 = vld [vmem:[#allocation10 + $0x78] sm:$0xff] }
 0x2c5   :  { %v4463_v22 = vmax.f32 %v3965_v14, 0.0  ;;  %1844 = vmatmul.f32.gmra.mxu2 %v4466_v15  ;;  %v1007_v35 = vadd.f32 %v4673_v54, %v3514_v45  ;;  %v4464_v52 = vmax.f32 %v3977_v42, 0.0  ;;  %v1606_v54 = vld [vmem:[#allocation8 + $0x228] sm:$0xff]  ;;  %2259 = vmatpush.msra.mxu0 %v2238_v17  ;;  %v4680_v17 = vld [vmem:[#allocation19_spill] sm:$0xff] }
 0x2c6   :  { %2074 = vmatpush.msra.mxu2 %v1606_v54  ;;  %2139 = vmatpush.msra.mxu3 %v1638_v48  ;;  %v2236_v48 = vld [vmem:[#allocation10 + $0x68] sm:$0xff]  ;;  %v4681_v15 = vmax.f32 %v4680_v17, 0.0 }
 0x2c7   :  { %1906 = vmatmul.f32.gmra.mxu3 %v4463_v22  ;;  %v3994_v22 = vpop.f32.mrf.mxu1  ;;  %v1072_v63 = vadd.f32 %v4677_v7, %v1007_v35  ;;  %v4679_v35 = vld [vmem:[#allocation72_spill] sm:$0xff] }
 0x2c8   :  { %v1387_v29 = vpop.f32.mrf.mxu2  ;;  %v1010_v54 = vadd.f32 %v4679_v35, %v3514_v45  ;;  %v1604_v35 = vld [vmem:[#allocation8 + $0x218] sm:$0xff] }
 0x2c9   :  { %v1388_v60 = vadd.f32 %v1387_v29, %v1323_v46  ;;  %v1452_v38 = vpop.f32.mrf.mxu3  ;;  %v4675_v46 = vld [vmem:[#allocation67_spill] sm:$0xff]  ;;  %v1137_v7 = vadd.f32 %v3729_v59, %v1072_v63  ;;  %v2235_v59 = vld [vmem:[#allocation10 + $0x60] sm:$0xff]  ;;  %2075 = vmatpush.msra.mxu2 %v1604_v35 }
 0x2ca   :  { %v4676_v29 = vmax.f32 %v4675_v46, 0.0 }
 0x2cb   :  { %v3989_v24 = vadd.f32 %v1452_v38, %v1388_v60  ;;  %1977 = vmatmul.f32.gmra.mxu0 %v4674_v18  ;;  %v4678_v60 = vld [vmem:[#allocation30_spill] sm:$0xff]  ;;  %v1264_v18 = vadd.f32 %v3756_v39, %v3770_v12 }
 0x2cc   :  { %2042 = vmatmul.f32.gmra.mxu1 %v4676_v29  ;;  %v4003_v38 = vadd.f32 %v4678_v60, %v1134_v50  ;;  %v2237_v29 = vld [vmem:[#allocation10 + $0x70] sm:$0xff]  ;;  %v4013_v60 = vpop.f32.mrf.mxu0 }
 0x2cd   :  { %v4465_v9 = vmax.f32 %v3989_v24, 0.0  ;;  %1847 = vmatmul.f32.gmra.mxu2 %v4464_v52  ;;  %2260 = vmatpush.msra.mxu0 %v2237_v29  ;;  %v1329_v39 = vadd.f32 %v3788_v37, %v1264_v18  ;;  %v1636_v37 = vld [vmem:[#allocation8 + $0x318] sm:$0xff] }
 0x2ce   :  { %v4468_v50 = vmax.f32 %v4003_v38, 0.0  ;;  %v2234_v18 = vld [vmem:[#allocation10 + $0x58] sm:$0xff]  ;;  %2140 = vmatpush.msra.mxu3 %v1636_v37 }
 0x2cf   :  { %1909 = vmatmul.f32.gmra.mxu3 %v4465_v9  ;;  %2261 = vmatpush.msra.mxu0 %v2236_v48 }
 0x2d0   :  { %v1390_v32 = vpop.f32.mrf.mxu2 }
 0x2d1   :  { %v1391_v46 = vadd.f32 %v1390_v32, %v1326_v34  ;;  %v1455_v52 = vpop.f32.mrf.mxu3  ;;  %v4682_v32 = vld [vmem:[#allocation69_spill] sm:$0xff]  ;;  %2262 = vmatpush.msra.mxu0 %v2235_v59  ;;  %v4686_v59 = vmax.f32 %v4621_v13, 0.0 }
 0x2d2   :  { %v4683_v29 = vmax.f32 %v4682_v32, 0.0  ;;  %v1267_v32 = vadd.f32 %v3780_v51, %v3770_v12 }
 0x2d3   :  { %v4015_v9 = vadd.f32 %v1455_v52, %v1391_v46  ;;  %1980 = vmatmul.f32.gmra.mxu0 %v4681_v15  ;;  %v4684_v52 = vld [vmem:[#allocation76_spill] sm:$0xff]  ;;  %v4027_v46 = vadd.f32 %v3732_v8, %v1137_v7  ;;  %v4029_v15 = vpop.f32.mrf.mxu1 }
 0x2d4   :  { %2045 = vmatmul.f32.gmra.mxu1 %v4683_v29  ;;  %v1075_v63 = vadd.f32 %v4684_v52, %v1010_v54  ;;  %2263 = vmatpush.msra.mxu0 %v2234_v18  ;;  %v4685_v54 = vld [vmem:[#allocation75_spill] sm:$0xff]  ;;  %v1332_v51 = vadd.f32 %v3809_v33, %v1267_v32  ;;  %v2231_v33 = vld [vmem:[#allocation10 + $0x40] sm:$0xff] }
 0x2d5   :  { %v4467_v34 = vmax.f32 %v4015_v9, 0.0  ;;  %1850 = vmatmul.f32.gmra.mxu2 %v4468_v50  ;;  %v1013_v8 = vadd.f32 %v4685_v54, %v3514_v45  ;;  %v1523_v7 = vmax.f32 %v4027_v46, 0.0  ;;  %v1602_v50 = vld [vmem:[#allocation8 + $0x208] sm:$0xff]  ;;  %v4687_v18 = vld [vmem:[#allocation71_spill] sm:$0xff] }
 0x2d6   :  { %v1140_v35 = vadd.f32 %v3743_v36, %v1075_v63  ;;  %2076 = vmatpush.msra.mxu2 %v1602_v50  ;;  %v2232_v36 = vld [vmem:[#allocation10 + $0x48] sm:$0xff]  ;;  %v4689_v63 = vld [vmem:[#allocation79_spill] sm:$0xff] }
 0x2d7   :  { %1912 = vmatmul.f32.gmra.mxu3 %v4467_v34  ;;  %v2233_v34 = vld [vmem:[#allocation10 + $0x50] sm:$0xff]  ;;  %v1634_v50 = vld [vmem:[#allocation8 + $0x308] sm:$0xff] }
 0x2d8   :  { %v1393_v17 = vpop.f32.mrf.mxu2  ;;  %2264 = vmatpush.msra.mxu0 %v2233_v34  ;;  %v4053_v13 = vadd.f32 %v3748_v41, %v1140_v35  ;;  %2141 = vmatpush.msra.mxu3 %v1634_v50 }
 0x2d9   :  { %v1394_v48 = vadd.f32 %v1393_v17, %v1329_v39  ;;  %v1458_v29 = vpop.f32.mrf.mxu3  ;;  %v4044_v39 = vpop.f32.mrf.mxu0  ;;  %v4688_v17 = vmax.f32 %v4687_v18, 0.0 }
 0x2da   :  { %2265 = vmatpush.msra.mxu0 %v2232_v36  ;;  %v1527_v35 = vmax.f32 %v4053_v13, 0.0  ;;  %v4691_v36 = vld [vmem:[#allocation23_spill] sm:$0xff] }
 0x2db   :  { %v4039_v52 = vadd.f32 %v1458_v29, %v1394_v48  ;;  %1983 = vmatmul.f32.gmra.mxu0 %v4686_v59  ;;  %v1078_v48 = vadd.f32 %v4689_v63, %v1013_v8  ;;  %v1270_v29 = vadd.f32 %v3797_v49, %v3770_v12  ;;  %v4059_v54 = vpop.f32.mrf.mxu1  ;;  %v4690_v8 = vld [vmem:[#allocation78_spill] sm:$0xff]  ;;  %v2230_v63 = vld [vmem:[#allocation10 + $0x38] sm:$0xff]  ;;  %v4692_v50 = vmax.f32 %v4691_v36, 0.0 }
 0x2dc   :  { %2048 = vmatmul.f32.gmra.mxu1 %v4688_v17  ;;  %2266 = vmatpush.msra.mxu0 %v2231_v33  ;;  %v1016_v41 = vadd.f32 %v4690_v8, %v3514_v45  ;;  %v2229_v45 = vld [vmem:[#allocation10 + $0x30] sm:$0xff] }
 0x2dd   :  { %v4469_v37 = vmax.f32 %v4039_v52, 0.0  ;;  %1853 = vmatmul.f32.gmra.mxu2 %v1523_v7  ;;  %v1143_v18 = vadd.f32 %v3759_v2, %v1078_v48  ;;  %v1335_v49 = vadd.f32 %v3832_v21, %v1270_v29  ;;  %v2228_v21 = vld [vmem:[#allocation10 + $0x28] sm:$0xff] }
 0x2de   :  { %2267 = vmatpush.msra.mxu0 %v2230_v63 }
 0x2df   :  { %1915 = vmatmul.f32.gmra.mxu3 %v4469_v37  ;;  %v4077_v48 = vadd.f32 %v3762_v3, %v1143_v18 }
 0x2e0   :  { %v1396_v32 = vpop.f32.mrf.mxu2  ;;  %2268 = vmatpush.msra.mxu0 %v2229_v45 }
 0x2e1   :  { %v1397_v59 = vadd.f32 %v1396_v32, %v1332_v51  ;;  %v1461_v34 = vpop.f32.mrf.mxu3  ;;  %v4693_v51 = vld [vmem:[#allocation74_spill] sm:$0xff]  ;;  %v4474_v63 = vmax.f32 %v4077_v48, 0.0 }
 0x2e2   :  { %v4694_v33 = vmax.f32 %v4693_v51, 0.0  ;;  %v4695_v32 = vld [vmem:[#allocation26_spill] sm:$0xff]  ;;  %2269 = vmatpush.msra.mxu0 %v2228_v21  ;;  %v2226_v21 = vld [vmem:[#allocation10 + $0x18] sm:$0xff] }
 0x2e3   :  { %v4065_v17 = vadd.f32 %v1461_v34, %v1397_v59  ;;  %1986 = vmatmul.f32.gmra.mxu0 %v4692_v50  ;;  %v1081_v2 = vadd.f32 %v4695_v32, %v1016_v41  ;;  %v4079_v59 = vpop.f32.mrf.mxu0  ;;  %v1273_v34 = vadd.f32 %v3821_v44, %v3770_v12  ;;  %v4087_v3 = vpop.f32.mrf.mxu1  ;;  %v2227_v50 = vld [vmem:[#allocation10 + $0x20] sm:$0xff]  ;;  %v4696_v51 = vld [vmem:[#allocation22_spill] sm:$0xff]  ;;  %v4698_v44 = vld [vmem:[#allocation77_spill] sm:$0xff] }
 0x2e4   :  { %2051 = vmatmul.f32.gmra.mxu1 %v4694_v33  ;;  %v4697_v33 = vmax.f32 %v4696_v51, 0.0  ;;  %2270 = vmatpush.msra.mxu0 %v2227_v50 }
 0x2e5   :  { %v1524_v37 = vmax.f32 %v4065_v17, 0.0  ;;  %1856 = vmatmul.f32.gmra.mxu2 %v1527_v35  ;;  %v1146_v41 = vadd.f32 %v3776_v25, %v1081_v2  ;;  %v1338_v45 = vadd.f32 %v3852_v57, %v1273_v34  ;;  %v4700_v25 = vld [vmem:[#allocation31_spill] sm:$0xff]  ;;  %v1276_v57 = vadd.f32 %v3845_v55, %v3770_v12  ;;  %v4703_v12 = vld [vmem:[#allocation80_spill] sm:$0xff] }
 0x2e6   :  { %2271 = vmatpush.msra.mxu0 %v2226_v21  ;;  %v4704_v55 = vmax.f32 %v4703_v12, 0.0 }
 0x2e7   :  { %1918 = vmatmul.f32.gmra.mxu3 %v1524_v37  ;;  %v4100_v2 = vadd.f32 %v4700_v25, %v1146_v41 }
 0x2e8   :  { %v1399_v29 = vpop.f32.mrf.mxu2 }
 0x2e9   :  { %v1400_v8 = vadd.f32 %v1399_v29, %v1335_v49  ;;  %v1464_v36 = vpop.f32.mrf.mxu3  ;;  %v4699_v49 = vmax.f32 %v4698_v44, 0.0  ;;  %v2225_v29 = vld [vmem:[#allocation10 + $0x10] sm:$0xff]  ;;  %v4473_v50 = vmax.f32 %v4100_v2, 0.0  ;;  %v2224_v44 = vld [vmem:[#allocation10 + $0x8] sm:$0xff] }
 0x2ea   :  { %2272 = vmatpush.msra.mxu0 %v2225_v29  ;;  %v2253_v29 = vld [vmem:[#allocation10 + $0xf0] sm:$0xff] }
 0x2eb   :  { %v4089_v18 = vadd.f32 %v1464_v36, %v1400_v8  ;;  %1989 = vmatmul.f32.gmra.mxu0 %v4697_v33  ;;  %v2254_v8 = vld [vmem:[#allocation10 + $0xf8] sm:$0xff]  ;;  %v4106_v34 = vpop.f32.mrf.mxu0  ;;  %v4114_v21 = vpop.f32.mrf.mxu1 }
 0x2ec   :  { %2054 = vmatmul.f32.gmra.mxu1 %v4699_v49  ;;  %v4701_v49 = vld [vmem:[#allocation24_spill] sm:$0xff]  ;;  %2273 = vmatpush.msra.mxu0 %v2224_v44 }
 0x2ed   :  { %v4470_v32 = vmax.f32 %v4089_v18, 0.0  ;;  %1859 = vmatmul.f32.gmra.mxu2 %v4474_v63  ;;  %2324 = vmatpush.msra.mxu1 %v2254_v8  ;;  %v4702_v25 = vmax.f32 %v4701_v49, 0.0  ;;  %v4130_v49 = vld [vmem:[%s4340_s4] sm:$0x3]  ;;  %v4708_v63 = vmax.f32 %v3578_v62, 0.0  ;;  %v4710_v62 = vmax.f32 %v3595_v1, 0.0 }
 0x2ee   :  { %v4136_v12 = vperm.slane %v4130_v49, 0  ;;  %v4733_v17 = vmax.f32 %v4089_v18, 0.0 }
 0x2ef   :  { %1921 = vmatmul.f32.gmra.mxu3 %v4470_v32  ;;  %v1341_v32 = vadd.f32 %v3876_v16, %v1276_v57  ;;  %2325 = vmatpush.msra.mxu1 %v2253_v29 }
 0x2f0   :  { %v1402_v36 = vpop.f32.mrf.mxu2 }
 0x2f1   :  { %v1403_v51 = vadd.f32 %v1402_v36, %v1338_v45  ;;  %v1467_v33 = vpop.f32.mrf.mxu3  ;;  %v2223_v45 = vld [vmem:[#allocation10] sm:$0xff] }
 0x2f2   :  { %2274 = vmatpush.msra.mxu0 %v2223_v45  ;;  %v1689_v45 = vadd.f32 %v3868_v40, %v4136_v12 }
 0x2f3   :  { %v4109_v41 = vadd.f32 %v1467_v33, %v1403_v51  ;;  %1992 = vmatmul.f32.gmra.mxu0 %v4702_v25  ;;  %v4123_v51 = vpop.f32.mrf.mxu0  ;;  %v4705_v25 = vmax.f32 %v3546_v27, 0.0 }
 0x2f4   :  { %2057 = vmatmul.f32.gmra.mxu1 %v4704_v55  ;;  %v1754_v27 = vadd.f32 %v3903_v43, %v1689_v45  ;;  %v2250_v43 = vld [vmem:[#allocation10 + $0xd8] sm:$0xff] }
 0x2f5   :  { %v4472_v8 = vmax.f32 %v4109_v41, 0.0  ;;  %1862 = vmatmul.f32.gmra.mxu2 %v4473_v50 }
 0x2f7   :  { %1924 = vmatmul.f32.gmra.mxu3 %v4472_v8 }
 0x2f8   :  { %v1405_v36 = vpop.f32.mrf.mxu2 }
 0x2f9   :  { %v1406_v16 = vadd.f32 %v1405_v36, %v1341_v32  ;;  %v1470_v57 = vpop.f32.mrf.mxu3  ;;  %v2252_v32 = vld [vmem:[#allocation10 + $0xe8] sm:$0xff]  ;;  %v4706_v36 = vmax.f32 %v3563_v19, 0.0 }
 0x2fa   :  { %2326 = vmatpush.msra.mxu1 %v2252_v32  ;;  %v1692_v32 = vadd.f32 %v3890_v4, %v4136_v12  ;;  %v1695_v4 = vadd.f32 %v3918_v28, %v4136_v12 }
 0x2fb   :  { %v4125_v33 = vadd.f32 %v1470_v57, %v1406_v16  ;;  %v4142_v29 = vpop.f32.mrf.mxu0  ;;  %v4707_v16 = vmax.f32 %v3799_v5, 0.0  ;;  %v2251_v57 = vld [vmem:[#allocation10 + $0xe0] sm:$0xff]  ;;  %v4709_v5 = vmax.f32 %v3816_v31, 0.0  ;;  %v4711_v31 = vmax.f32 %v3835_v23, 0.0 }
 0x2fc   :  { %2327 = vmatpush.msra.mxu1 %v2251_v57  ;;  %v1757_v19 = vadd.f32 %v3933_v47, %v1692_v32  ;;  %v1760_v47 = vadd.f32 %v3963_v53, %v1695_v4  ;;  %v1698_v32 = vadd.f32 %v3953_v61, %v4136_v12  ;;  %v4712_v53 = vmax.f32 %v3612_v30, 0.0 }
 0x2fd   :  { %v4471_v44 = vmax.f32 %v4125_v33, 0.0  ;;  %2077 = vmatmul.f32.vlgmr.msra.gmra.mxu2 %v4705_v25  ;;  %v4713_v23 = vmax.f32 %v3854_v0, 0.0  ;;  %v1701_v61 = vadd.f32 %v3983_v26, %v4136_v12  ;;  %v1704_v26 = vadd.f32 %v4013_v60, %v4136_v12 }
 0x2fe   :  { %2328 = vmatpush.msra.mxu1 %v2250_v43 }
 0x2ff   :  { %1927 = vmatmul.f32.gmra.mxu3 %v4471_v44  ;;  %v1766_v0 = vadd.f32 %v4029_v15, %v1701_v61  ;;  %v4720_v61 = vld [vmem:[#allocation25_spill] sm:$0xff] }
 0x300   :  { %v1818_v55 = vpop.f32.mrf.mxu2 }
 0x301   :  { %v1819_v44 = vadd.f32 %v1818_v55, %v1754_v27 }
 0x305   :  { %2080 = vmatmul.f32.gmra.mxu2 %v4706_v36  ;;  %v4154_v36 = vpop.f32.mrf.mxu0 }
 0x307   :  { %2142 = vmatmul.f32.vlgmr.msra.gmra.mxu3 %v4707_v16 }
 0x308   :  { %v1821_v25 = vpop.f32.mrf.mxu2 }
 0x309   :  { %v1822_v55 = vadd.f32 %v1821_v25, %v1757_v19  ;;  %v1763_v19 = vadd.f32 %v3994_v22, %v1698_v32  ;;  %v4714_v22 = vmax.f32 %v3627_v56, 0.0  ;;  %v4716_v32 = vld [vmem:[#allocation36_spill] sm:$0xff] }
 0x30a   :  { %v1883_v8 = vpop.f32.mrf.mxu3  ;;  %v4717_v15 = vmax.f32 %v4716_v32, 0.0  ;;  %v2244_v32 = vld [vmem:[#allocation10 + $0xa8] sm:$0xff] }
 0x30b   :  { %v1884_v50 = vadd.f32 %v1883_v8, %v1819_v44  ;;  %v2249_v44 = vld [vmem:[#allocation10 + $0xd0] sm:$0xff] }
 0x30c   :  { %2329 = vmatpush.msra.mxu1 %v2249_v44 }
 0x30d   :  { %v2191_v40 = vmax.f32 %v1884_v50, 0.0  ;;  %2083 = vmatmul.f32.gmra.mxu2 %v4708_v63  ;;  %v4163_v63 = vpop.f32.mrf.mxu1  ;;  %v4167_v57 = vpop.f32.mrf.mxu0 }
 0x30f   :  { %2145 = vmatmul.f32.gmra.mxu3 %v4709_v5  ;;  %2275 = vmatmul.f32.vlgmr.msra.gmra.mxu0 %v2191_v40  ;;  %v2248_v5 = vld [vmem:[#allocation10 + $0xc8] sm:$0xff] }
 0x310   :  { %v1824_v45 = vpop.f32.mrf.mxu2  ;;  %2330 = vmatpush.msra.mxu1 %v2248_v5  ;;  %v1707_v5 = vadd.f32 %v4044_v39, %v4136_v12 }
 0x311   :  { %v1825_v25 = vadd.f32 %v1824_v45, %v1760_v47 }
 0x312   :  { %v1886_v27 = vpop.f32.mrf.mxu3 }
 0x313   :  { %v1887_v50 = vadd.f32 %v1886_v27, %v1822_v55 }
 0x315   :  { %v2193_v8 = vmax.f32 %v1887_v50, 0.0  ;;  %2086 = vmatmul.f32.gmra.mxu2 %v4710_v62  ;;  %v4176_v55 = vpop.f32.mrf.mxu1  ;;  %v4180_v4 = vpop.f32.mrf.mxu0  ;;  %v2247_v62 = vld [vmem:[#allocation10 + $0xc0] sm:$0xff] }
 0x316   :  { %2331 = vmatpush.msra.mxu1 %v2247_v62 }
 0x317   :  { %2148 = vmatmul.f32.gmra.mxu3 %v4711_v31  ;;  %2278 = vmatmul.f32.gmra.mxu0 %v2193_v8  ;;  %v4715_v8 = vmax.f32 %v3871_v10, 0.0  ;;  %v1769_v10 = vadd.f32 %v4059_v54, %v1704_v26  ;;  %v1772_v54 = vadd.f32 %v4087_v3, %v1707_v5 }
 0x318   :  { %v1827_v16 = vpop.f32.mrf.mxu2 }
 0x319   :  { %v1828_v45 = vadd.f32 %v1827_v16, %v1763_v19 }
 0x31a   :  { %v1889_v28 = vpop.f32.mrf.mxu3 }
 0x31b   :  { %v1890_v1 = vadd.f32 %v1889_v28, %v1825_v25 }
 0x31d   :  { %v2195_v40 = vmax.f32 %v1890_v1, 0.0  ;;  %2089 = vmatmul.f32.gmra.mxu2 %v4712_v53  ;;  %v4189_v16 = vpop.f32.mrf.mxu1  ;;  %v4191_v28 = vpop.f32.mrf.mxu0  ;;  %v4718_v1 = vld [vmem:[#allocation38_spill] sm:$0xff]  ;;  %v2246_v53 = vld [vmem:[#allocation10 + $0xb8] sm:$0xff] }
 0x31e   :  { %2332 = vmatpush.msra.mxu1 %v2246_v53 }
 0x31f   :  { %2151 = vmatmul.f32.gmra.mxu3 %v4713_v23  ;;  %2281 = vmatmul.f32.gmra.mxu0 %v2195_v40  ;;  %v4719_v40 = vmax.f32 %v4718_v1, 0.0 }
 0x320   :  { %v1830_v43 = vpop.f32.mrf.mxu2 }
 0x321   :  { %v1831_v31 = vadd.f32 %v1830_v43, %v1766_v0 }
 0x322   :  { %v1892_v27 = vpop.f32.mrf.mxu3 }
 0x323   :  { %v1893_v30 = vadd.f32 %v1892_v27, %v1828_v45 }
 0x325   :  { %v2197_v50 = vmax.f32 %v1893_v30, 0.0  ;;  %2092 = vmatmul.f32.gmra.mxu2 %v4714_v22  ;;  %v4200_v45 = vpop.f32.mrf.mxu1  ;;  %v4721_v30 = vmax.f32 %v4720_v61, 0.0  ;;  %v4722_v22 = vld [vmem:[#allocation32_spill] sm:$0xff] }
 0x326   :  { %v4723_v0 = vmax.f32 %v4722_v22, 0.0 }
 0x327   :  { %2154 = vmatmul.f32.gmra.mxu3 %v4715_v8  ;;  %2284 = vmatmul.f32.gmra.mxu0 %v2197_v50  ;;  %v4205_v50 = vpop.f32.mrf.mxu0  ;;  %v2245_v8 = vld [vmem:[#allocation10 + $0xb0] sm:$0xff] }
 0x328   :  { %v1833_v47 = vpop.f32.mrf.mxu2  ;;  %2333 = vmatpush.msra.mxu1 %v2245_v8 }
 0x329   :  { %v1834_v23 = vadd.f32 %v1833_v47, %v1769_v10 }
 0x32a   :  { %v1895_v44 = vpop.f32.mrf.mxu3  ;;  %2334 = vmatpush.msra.mxu1 %v2244_v32 }
 0x32b   :  { %v1896_v25 = vadd.f32 %v1895_v44, %v1831_v31  ;;  %v1710_v31 = vadd.f32 %v4079_v59, %v4136_v12 }
 0x32d   :  { %v2199_v56 = vmax.f32 %v1896_v25, 0.0  ;;  %2095 = vmatmul.f32.gmra.mxu2 %v4717_v15  ;;  %v1775_v3 = vadd.f32 %v4114_v21, %v1710_v31  ;;  %v4214_v25 = vpop.f32.mrf.mxu1  ;;  %v4725_v21 = vmax.f32 %v3951_v6, 0.0  ;;  %v4729_v31 = vmax.f32 %v4003_v38, 0.0 }
 0x32f   :  { %2157 = vmatmul.f32.gmra.mxu3 %v4719_v40  ;;  %2287 = vmatmul.f32.gmra.mxu0 %v2199_v56  ;;  %v4724_v56 = vmax.f32 %v3939_v20, 0.0  ;;  %v4218_v10 = vpop.f32.mrf.mxu0  ;;  %v1713_v40 = vadd.f32 %v4106_v34, %v4136_v12  ;;  %v4726_v20 = vmax.f32 %v3965_v14, 0.0  ;;  %v1716_v34 = vadd.f32 %v4123_v51, %v4136_v12 }
 0x330   :  { %v1836_v19 = vpop.f32.mrf.mxu2  ;;  %v1719_v51 = vadd.f32 %v4142_v29, %v4136_v12  ;;  %v1722_v29 = vadd.f32 %v4154_v36, %v4136_v12  ;;  %v1725_v36 = vadd.f32 %v4167_v57, %v4136_v12  ;;  %v1728_v57 = vadd.f32 %v4180_v4, %v4136_v12 }
 0x331   :  { %v1837_v47 = vadd.f32 %v1836_v19, %v1772_v54  ;;  %v1778_v53 = vadd.f32 %v4163_v63, %v1713_v40  ;;  %v2243_v19 = vld [vmem:[#allocation10 + $0xa0] sm:$0xff]  ;;  %v1781_v14 = vadd.f32 %v4176_v55, %v1716_v34  ;;  %v4728_v63 = vmax.f32 %v3989_v24, 0.0  ;;  %v2242_v54 = vld [vmem:[#allocation10 + $0x98] sm:$0xff] }
 0x332   :  { %v1898_v60 = vpop.f32.mrf.mxu3  ;;  %2335 = vmatpush.msra.mxu1 %v2243_v19  ;;  %v1784_v24 = vadd.f32 %v4189_v16, %v1719_v51  ;;  %v4730_v55 = vmax.f32 %v4015_v9, 0.0  ;;  %v1787_v38 = vadd.f32 %v4200_v45, %v1722_v29  ;;  %v4731_v9 = vmax.f32 %v4039_v52, 0.0  ;;  %v2239_v52 = vld [vmem:[#allocation10 + $0x80] sm:$0xff] }
 0x333   :  { %v1899_v43 = vadd.f32 %v1898_v60, %v1834_v23  ;;  %v1790_v46 = vadd.f32 %v4214_v25, %v1725_v36 }
 0x334   :  { %2336 = vmatpush.msra.mxu1 %v2242_v54 }
 0x335   :  { %v2201_v27 = vmax.f32 %v1899_v43, 0.0  ;;  %2098 = vmatmul.f32.gmra.mxu2 %v4721_v30  ;;  %v1792_v60 = vpop.f32.mrf.mxu1  ;;  %v4727_v30 = vmax.f32 %v3977_v42, 0.0 }
 0x336   :  { %v1793_v25 = vadd.f32 %v1792_v60, %v1728_v57  ;;  %v4735_v60 = vmax.f32 %v4109_v41, 0.0 }
 0x337   :  { %2160 = vmatmul.f32.gmra.mxu3 %v4723_v0  ;;  %2290 = vmatmul.f32.gmra.mxu0 %v2201_v27  ;;  %v4229_v27 = vpop.f32.mrf.mxu0 }
 0x338   :  { %v1839_v62 = vpop.f32.mrf.mxu2 }
 0x339   :  { %v1840_v1 = vadd.f32 %v1839_v62, %v1775_v3 }
 0x33a   :  { %v1901_v39 = vpop.f32.mrf.mxu3 }
 0x33b   :  { %v1902_v44 = vadd.f32 %v1901_v39, %v1837_v47 }
 0x33d   :  { %v2203_v26 = vmax.f32 %v1902_v44, 0.0  ;;  %2101 = vmatmul.f32.gmra.mxu2 %v1507_v58  ;;  %v1795_v62 = vpop.f32.mrf.mxu1  ;;  %v2241_v44 = vld [vmem:[#allocation10 + $0x90] sm:$0xff] }
 0x33e   :  { %2337 = vmatpush.msra.mxu1 %v2241_v44 }
 0x33f   :  { %2163 = vmatmul.f32.gmra.mxu3 %v4724_v56  ;;  %2293 = vmatmul.f32.gmra.mxu0 %v2203_v26  ;;  %v4238_v39 = vpop.f32.mrf.mxu0 }
 0x340   :  { %v1842_v15 = vpop.f32.mrf.mxu2 }
 0x341   :  { %v1843_v5 = vadd.f32 %v1842_v15, %v1778_v53 }
 0x342   :  { %v1904_v59 = vpop.f32.mrf.mxu3 }
 0x343   :  { %v1905_v11 = vadd.f32 %v1904_v59, %v1840_v1  ;;  %v2240_v59 = vld [vmem:[#allocation10 + $0x88] sm:$0xff] }
 0x344   :  { %2338 = vmatpush.msra.mxu1 %v2240_v59 }
 0x345   :  { %v2205_v58 = vmax.f32 %v1905_v11, 0.0  ;;  %2104 = vmatmul.f32.gmra.mxu2 %v4725_v21  ;;  %v1798_v15 = vpop.f32.mrf.mxu1 }
 0x346   :  { %2339 = vmatpush.msra.mxu1 %v2239_v52 }
 0x347   :  { %2166 = vmatmul.f32.gmra.mxu3 %v4726_v20  ;;  %2296 = vmatmul.f32.gmra.mxu0 %v2205_v58  ;;  %v4250_v16 = vpop.f32.mrf.mxu0 }
 0x348   :  { %v1845_v23 = vpop.f32.mrf.mxu2 }
 0x349   :  { %v1846_v0 = vadd.f32 %v1845_v23, %v1781_v14 }
 0x34a   :  { %v1907_v43 = vpop.f32.mrf.mxu3 }
 0x34b   :  { %v1908_v61 = vadd.f32 %v1907_v43, %v1843_v5 }
 0x34d   :  { %v2207_v6 = vmax.f32 %v1908_v61, 0.0  ;;  %2107 = vmatmul.f32.gmra.mxu2 %v4727_v30 }
 0x34f   :  { %2169 = vmatmul.f32.gmra.mxu3 %v4728_v63  ;;  %2299 = vmatmul.f32.gmra.mxu0 %v2207_v6  ;;  %v4261_v20 = vpop.f32.mrf.mxu0  ;;  %v1731_v6 = vadd.f32 %v4191_v28, %v4136_v12  ;;  %v4734_v63 = vmax.f32 %v4100_v2, 0.0  ;;  %v4282_v2 = vperm.slane %v4130_v49, 1 }
 0x350   :  { %v1848_v22 = vpop.f32.mrf.mxu2 }
 0x351   :  { %v1849_v3 = vadd.f32 %v1848_v22, %v1784_v24 }
 0x352   :  { %v1910_v8 = vpop.f32.mrf.mxu3 }
 0x353   :  { %v1911_v47 = vadd.f32 %v1910_v8, %v1846_v0  ;;  %v1734_v0 = vadd.f32 %v4205_v50, %v4136_v12 }
 0x355   :  { %v2209_v42 = vmax.f32 %v1911_v47, 0.0  ;;  %2110 = vmatmul.f32.gmra.mxu2 %v4729_v31 }
 0x357   :  { %2172 = vmatmul.f32.gmra.mxu3 %v4730_v55  ;;  %2302 = vmatmul.f32.gmra.mxu0 %v2209_v42  ;;  %v4271_v30 = vpop.f32.mrf.mxu0  ;;  %v1799_v42 = vadd.f32 %v1798_v15, %v1734_v0  ;;  %v1949_v55 = vadd.f32 %v4218_v10, %v4282_v2 }
 0x358   :  { %v1851_v26 = vpop.f32.mrf.mxu2 }
 0x359   :  { %v1852_v11 = vadd.f32 %v1851_v26, %v1787_v38 }
 0x35a   :  { %v1913_v56 = vpop.f32.mrf.mxu3 }
 0x35b   :  { %v1914_v32 = vadd.f32 %v1913_v56, %v1849_v3 }
 0x35d   :  { %v2211_v1 = vmax.f32 %v1914_v32, 0.0  ;;  %2113 = vmatmul.f32.gmra.mxu2 %v1523_v7  ;;  %v2013_v7 = vpop.f32.mrf.mxu1 }
 0x35e   :  { %v2014_v26 = vadd.f32 %v2013_v7, %v1949_v55 }
 0x35f   :  { %2175 = vmatmul.f32.gmra.mxu3 %v4731_v9  ;;  %2305 = vmatmul.f32.gmra.mxu0 %v2211_v1  ;;  %v4279_v51 = vpop.f32.mrf.mxu0 }
 0x360   :  { %v1854_v40 = vpop.f32.mrf.mxu2 }
 0x361   :  { %v1855_v19 = vadd.f32 %v1854_v40, %v1790_v46  ;;  %v1955_v40 = vadd.f32 %v4238_v39, %v4282_v2  ;;  %v1961_v39 = vadd.f32 %v4261_v20, %v4282_v2 }
 0x362   :  { %v1916_v58 = vpop.f32.mrf.mxu3 }
 0x363   :  { %v1917_v21 = vadd.f32 %v1916_v58, %v1852_v11 }
 0x365   :  { %v2213_v53 = vmax.f32 %v1917_v21, 0.0  ;;  %2116 = vmatmul.f32.gmra.mxu2 %v1527_v35  ;;  %v4732_v35 = vmax.f32 %v4077_v48, 0.0  ;;  %v2016_v43 = vpop.f32.mrf.mxu1  ;;  %v1796_v48 = vadd.f32 %v1795_v62, %v1731_v6  ;;  %v4736_v62 = vmax.f32 %v4125_v33, 0.0 }
 0x366   :  { %v1952_v33 = vadd.f32 %v4229_v27, %v4282_v2  ;;  %v1958_v27 = vadd.f32 %v4250_v16, %v4282_v2  ;;  %v1964_v6 = vadd.f32 %v4271_v30, %v4282_v2 }
 0x367   :  { %2178 = vmatmul.f32.gmra.mxu3 %v1524_v37  ;;  %2308 = vmatmul.f32.gmra.mxu0 %v2213_v53  ;;  %v1969_v3 = vpop.f32.mrf.mxu0 }
 0x368   :  { %v1857_v45 = vpop.f32.mrf.mxu2  ;;  %v2017_v1 = vadd.f32 %v2016_v43, %v1952_v33 }
 0x369   :  { %v1858_v34 = vadd.f32 %v1857_v45, %v1793_v25 }
 0x36a   :  { %v1919_v23 = vpop.f32.mrf.mxu3 }
 0x36b   :  { %v1920_v5 = vadd.f32 %v1919_v23, %v1855_v19 }
 0x36d   :  { %v2215_v13 = vmax.f32 %v1920_v5, 0.0  ;;  %2119 = vmatmul.f32.gmra.mxu2 %v4732_v35  ;;  %v2019_v8 = vpop.f32.mrf.mxu1 }
 0x36e   :  { %v2020_v36 = vadd.f32 %v2019_v8, %v1955_v40 }
 0x36f   :  { %2181 = vmatmul.f32.gmra.mxu3 %v4733_v17  ;;  %2311 = vmatmul.f32.gmra.mxu0 %v2215_v13  ;;  %v1972_v52 = vpop.f32.mrf.mxu0 }
 0x370   :  { %v1860_v37 = vpop.f32.mrf.mxu2 }
 0x371   :  { %v1861_v54 = vadd.f32 %v1860_v37, %v1796_v48 }
 0x372   :  { %v1922_v61 = vpop.f32.mrf.mxu3 }
 0x373   :  { %v1923_v4 = vadd.f32 %v1922_v61, %v1858_v34 }
 0x375   :  { %v2217_v14 = vmax.f32 %v1923_v4, 0.0  ;;  %2122 = vmatmul.f32.gmra.mxu2 %v4734_v63  ;;  %v2022_v50 = vpop.f32.mrf.mxu1 }
 0x376   :  { %v2023_v23 = vadd.f32 %v2022_v50, %v1958_v27 }
 0x377   :  { %2184 = vmatmul.f32.gmra.mxu3 %v4735_v60  ;;  %2314 = vmatmul.f32.gmra.mxu0 %v2217_v14  ;;  %v1975_v17 = vpop.f32.mrf.mxu0 }
 0x378   :  { %v1863_v18 = vpop.f32.mrf.mxu2 }
 0x379   :  { %v1864_v31 = vadd.f32 %v1863_v18, %v1799_v42 }
 0x37a   :  { %v1925_v22 = vpop.f32.mrf.mxu3 }
 0x37b   :  { %v1926_v28 = vadd.f32 %v1925_v22, %v1861_v54  ;;  %v1967_v22 = vadd.f32 %v4279_v51, %v4282_v2  ;;  %v1973_v51 = vadd.f32 %v1972_v52, %v4282_v2 }
 0x37d   :  { %v2219_v47 = vmax.f32 %v1926_v28, 0.0  ;;  %v2025_v38 = vpop.f32.mrf.mxu1 }
 0x37e   :  { %v2026_v43 = vadd.f32 %v2025_v38, %v1961_v39 }
 0x37f   :  { %2187 = vmatmul.f32.gmra.mxu3 %v4736_v62  ;;  %2317 = vmatmul.f32.gmra.mxu0 %v2219_v47  ;;  %v1978_v60 = vpop.f32.mrf.mxu0 }
 0x380   :  { %v2078_v41 = vpop.f32.mrf.mxu2 }
 0x381   :  { %v2079_v29 = vadd.f32 %v2078_v41, %v2014_v26 }
 0x382   :  { %v1928_v24 = vpop.f32.mrf.mxu3 }
 0x383   :  { %v1929_v12 = vadd.f32 %v1928_v24, %v1864_v31  ;;  %v1970_v31 = vadd.f32 %v1969_v3, %v4282_v2  ;;  %v1976_v3 = vadd.f32 %v1975_v17, %v4282_v2 }
 0x385   :  { %v2221_v44 = vmax.f32 %v1929_v12, 0.0  ;;  %v2028_v53 = vpop.f32.mrf.mxu1 }
 0x386   :  { %v2029_v48 = vadd.f32 %v2028_v53, %v1964_v6  ;;  %v1979_v53 = vadd.f32 %v1978_v60, %v4282_v2 }
 0x387   :  { %2320 = vmatmul.f32.gmra.mxu0 %v2221_v44  ;;  %v1981_v62 = vpop.f32.mrf.mxu0 }
 0x388   :  { %v2081_v56 = vpop.f32.mrf.mxu2 }
 0x389   :  { %v2082_v59 = vadd.f32 %v2081_v56, %v2017_v1 }
 0x38a   :  { %v2143_v49 = vpop.f32.mrf.mxu3 }
 0x38b   :  { %v2144_v32 = vadd.f32 %v2143_v49, %v2079_v29 }
 0x38d   :  { %v2192_v15 = vmax.f32 %v2144_v32, 0.0  ;;  %v2031_v35 = vpop.f32.mrf.mxu1 }
 0x38e   :  { %v2032_v28 = vadd.f32 %v2031_v35, %v1967_v22 }
 0x38f   :  { %2340 = vmatmul.f32.vlgmr.msra.gmra.mxu1 %v2192_v15  ;;  %v1984_v29 = vpop.f32.mrf.mxu0 }
 0x390   :  { %v2084_v9 = vpop.f32.mrf.mxu2 }
 0x391   :  { %v2085_v46 = vadd.f32 %v2084_v9, %v2020_v36 }
 0x392   :  { %v2146_v10 = vpop.f32.mrf.mxu3 }
 0x393   :  { %v2147_v11 = vadd.f32 %v2146_v10, %v2082_v59 }
 0x395   :  { %v2194_v58 = vmax.f32 %v2147_v11, 0.0  ;;  %v2034_v14 = vpop.f32.mrf.mxu1 }
 0x396   :  { %v2035_v12 = vadd.f32 %v2034_v14, %v1970_v31 }
 0x397   :  { %2343 = vmatmul.f32.gmra.mxu1 %v2194_v58  ;;  %v1987_v10 = vpop.f32.mrf.mxu0 }
 0x398   :  { %v2087_v21 = vpop.f32.mrf.mxu2 }
 0x399   :  { %v2088_v5 = vadd.f32 %v2087_v21, %v2023_v23 }
 0x39a   :  { %v2149_v7 = vpop.f32.mrf.mxu3 }
 0x39b   :  { %v2150_v45 = vadd.f32 %v2149_v7, %v2085_v46 }
 0x39d   :  { %v2196_v19 = vmax.f32 %v2150_v45, 0.0  ;;  %v2037_v47 = vpop.f32.mrf.mxu1 }
 0x39e   :  { %v2038_v32 = vadd.f32 %v2037_v47, %v1973_v51 }
 0x39f   :  { %2346 = vmatmul.f32.gmra.mxu1 %v2196_v19  ;;  %v1990_v45 = vpop.f32.mrf.mxu0 }
 0x3a0   :  { %v2090_v57 = vpop.f32.mrf.mxu2  ;;  %v1991_v47 = vadd.f32 %v1990_v45, %v4282_v2 }
 0x3a1   :  { %v2091_v61 = vadd.f32 %v2090_v57, %v2026_v43 }
 0x3a2   :  { %v2152_v13 = vpop.f32.mrf.mxu3 }
 0x3a3   :  { %v2153_v25 = vadd.f32 %v2152_v13, %v2088_v5  ;;  %v1982_v5 = vadd.f32 %v1981_v62, %v4282_v2 }
 0x3a5   :  { %v2198_v37 = vmax.f32 %v2153_v25, 0.0  ;;  %v2040_v44 = vpop.f32.mrf.mxu1 }
 0x3a6   :  { %v2041_v11 = vadd.f32 %v2040_v44, %v1976_v3 }
 0x3a7   :  { %2349 = vmatmul.f32.gmra.mxu1 %v2198_v37  ;;  %v1993_v37 = vpop.f32.mrf.mxu0 }
 0x3a8   :  { %v2093_v34 = vpop.f32.mrf.mxu2 }
 0x3a9   :  { %v2094_v20 = vadd.f32 %v2093_v34, %v2029_v48 }
 0x3aa   :  { %v2155_v16 = vpop.f32.mrf.mxu3 }
 0x3ab   :  { %v2156_v4 = vadd.f32 %v2155_v16, %v2091_v61  ;;  %v1985_v61 = vadd.f32 %v1984_v29, %v4282_v2 }
 0x3ad   :  { %v2200_v63 = vmax.f32 %v2156_v4, 0.0  ;;  %v2043_v9 = vpop.f32.mrf.mxu1 }
 0x3ae   :  { %v2044_v52 = vadd.f32 %v2043_v9, %v1979_v53 }
 0x3af   :  { %2352 = vmatmul.f32.gmra.mxu1 %v2200_v63  ;;  %v2276_v63 = vpop.f32.mrf.mxu0 }
 0x3b0   :  { %v2096_v18 = vpop.f32.mrf.mxu2 }
 0x3b1   :  { %v2097_v30 = vadd.f32 %v2096_v18, %v2032_v28 }
 0x3b2   :  { %v2158_v54 = vpop.f32.mrf.mxu3 }
 0x3b3   :  { %v2159_v0 = vadd.f32 %v2158_v54, %v2094_v20  ;;  %v1988_v20 = vadd.f32 %v1987_v10, %v4282_v2 }
 0x3b5   :  { %v2202_v8 = vmax.f32 %v2159_v0, 0.0  ;;  %v2046_v7 = vpop.f32.mrf.mxu1 }
 0x3b6   :  { %v2047_v35 = vadd.f32 %v2046_v7, %v1982_v5 }
 0x3b7   :  { %2355 = vmatmul.f32.gmra.mxu1 %v2202_v8 }
 0x3b8   :  { %v2099_v42 = vpop.f32.mrf.mxu2 }
 0x3b9   :  { %v2100_v26 = vadd.f32 %v2099_v42, %v2035_v12 }
 0x3ba   :  { %v2161_v41 = vpop.f32.mrf.mxu3 }
 0x3bb   :  { %v2162_v24 = vadd.f32 %v2161_v41, %v2097_v30  ;;  %v2279_v30 = vpop.f32.mrf.mxu0 }
 0x3bd   :  { %v2204_v55 = vmax.f32 %v2162_v24, 0.0  ;;  %v2049_v25 = vpop.f32.mrf.mxu1 }
 0x3be   :  { %v2050_v4 = vadd.f32 %v2049_v25, %v1985_v61 }
 0x3bf   :  { %2358 = vmatmul.f32.gmra.mxu1 %v2204_v55 }
 0x3c0   :  { %v2102_v50 = vpop.f32.mrf.mxu2 }
 0x3c1   :  { %v2103_v1 = vadd.f32 %v2102_v50, %v2038_v32  ;;  %v1994_v50 = vadd.f32 %v1993_v37, %v4282_v2 }
 0x3c2   :  { %v2164_v56 = vpop.f32.mrf.mxu3 }
 0x3c3   :  { %v2165_v49 = vadd.f32 %v2164_v56, %v2100_v26  ;;  %v2282_v51 = vpop.f32.mrf.mxu0 }
 0x3c5   :  { %v2206_v33 = vmax.f32 %v2165_v49, 0.0  ;;  %v2052_v14 = vpop.f32.mrf.mxu1 }
 0x3c6   :  { %v2053_v0 = vadd.f32 %v2052_v14, %v1988_v20 }
 0x3c7   :  { %2361 = vmatmul.f32.gmra.mxu1 %v2206_v33 }
 0x3c8   :  { %v2105_v15 = vpop.f32.mrf.mxu2 }
 0x3c9   :  { %v2106_v36 = vadd.f32 %v2105_v15, %v2041_v11 }
 0x3ca   :  { %v2167_v38 = vpop.f32.mrf.mxu3 }
 0x3cb   :  { %v2168_v59 = vadd.f32 %v2167_v38, %v2103_v1  ;;  %v4312_v38 = vld [vmem:[%s4342_s6] ss:$0 sm:$0xff]  ;;  %v2285_v3 = vpop.f32.mrf.mxu0  ;;  %s2699_s6 = smov [#allocation11]  }
 0x3cc   :  { %v2277_v2 = vadd.f32 %v4312_v38, %v2276_v63  ;;  %v2286_v7 = vadd.f32 %v4312_v38, %v2285_v3  ;;  %s2409_s30 = sshll.u32 %s2699_s6, 4  ;;  %s2410_s30 = int_to_ptr.vmem [resolvable:$true] %s2409_s30 }
 0x3cd   :  { %v2208_v40 = vmax.f32 %v2168_v59, 0.0  ;;  %v2055_v42 = vpop.f32.mrf.mxu1 }
 0x3ce   :  { %v2056_v24 = vadd.f32 %v2055_v42, %v1991_v47 }
 0x3cf   :  { %2364 = vmatmul.f32.gmra.mxu1 %v2208_v40  ;;  %v2280_v40 = vadd.f32 %v4312_v38, %v2279_v30 }
 0x3d0   :  { %v2108_v58 = vpop.f32.mrf.mxu2 }
 0x3d1   :  { %v2109_v23 = vadd.f32 %v2108_v58, %v2044_v52 }
 0x3d2   :  { %v2170_v21 = vpop.f32.mrf.mxu3 }
 0x3d3   :  { %v2171_v46 = vadd.f32 %v2170_v21, %v2106_v36  ;;  %v2288_v10 = vpop.f32.mrf.mxu0  ;;  %v2283_v36 = vadd.f32 %v4312_v38, %v2282_v51 }
 0x3d5   :  { %v2210_v27 = vmax.f32 %v2171_v46, 0.0  ;;  %v2058_v26 = vpop.f32.mrf.mxu1 }
 0x3d6   :  { %v2059_v49 = vadd.f32 %v2058_v26, %v1994_v50 }
 0x3d7   :  { %2367 = vmatmul.f32.gmra.mxu1 %v2210_v27 }
 0x3d8   :  { %v2111_v19 = vpop.f32.mrf.mxu2 }
 0x3d9   :  { %v2112_v43 = vadd.f32 %v2111_v19, %v2047_v35  ;;  %v2289_v19 = vadd.f32 %v4312_v38, %v2288_v10 }
 0x3da   :  { %v2173_v57 = vpop.f32.mrf.mxu3 }
 0x3db   :  { %v2174_v13 = vadd.f32 %v2173_v57, %v2109_v23  ;;  %v2291_v21 = vpop.f32.mrf.mxu0 }
 0x3dd   :  { %v2212_v39 = vmax.f32 %v2174_v13, 0.0  ;;  %v2292_v13 = vadd.f32 %v4312_v38, %v2291_v21 }
 0x3df   :  { %2370 = vmatmul.f32.gmra.mxu1 %v2212_v39 }
 0x3e0   :  { %v2114_v17 = vpop.f32.mrf.mxu2 }
 0x3e1   :  { %v2115_v48 = vadd.f32 %v2114_v17, %v2050_v4 }
 0x3e2   :  { %v2176_v34 = vpop.f32.mrf.mxu3 }
 0x3e3   :  { %v2177_v16 = vadd.f32 %v2176_v34, %v2112_v43  ;;  %v2294_v45 = vpop.f32.mrf.mxu0 }
 0x3e4   :  { %v2295_v17 = vadd.f32 %v4312_v38, %v2294_v45 }
 0x3e5   :  { %v2214_v6 = vmax.f32 %v2177_v16, 0.0 }
 0x3e7   :  { %2373 = vmatmul.f32.gmra.mxu1 %v2214_v6 }
 0x3e8   :  { %v2117_v60 = vpop.f32.mrf.mxu2 }
 0x3e9   :  { %v2118_v8 = vadd.f32 %v2117_v60, %v2053_v0 }
 0x3ea   :  { %v2179_v18 = vpop.f32.mrf.mxu3 }
 0x3eb   :  { %v2180_v54 = vadd.f32 %v2179_v18, %v2115_v48  ;;  %v2297_v5 = vpop.f32.mrf.mxu0 }
 0x3ec   :  { %v2298_v34 = vadd.f32 %v4312_v38, %v2297_v5 }
 0x3ed   :  { %v2216_v22 = vmax.f32 %v2180_v54, 0.0 }
 0x3ef   :  { %2376 = vmatmul.f32.gmra.mxu1 %v2216_v22 }
 0x3f0   :  { %v2120_v41 = vpop.f32.mrf.mxu2 }
 0x3f1   :  { %v2121_v55 = vadd.f32 %v2120_v41, %v2056_v24 }
 0x3f2   :  { %v2182_v28 = vpop.f32.mrf.mxu3 }
 0x3f3   :  { %v2183_v62 = vadd.f32 %v2182_v28, %v2118_v8  ;;  %v2300_v25 = vpop.f32.mrf.mxu0 }
 0x3f4   :  { %v2301_v4 = vadd.f32 %v4312_v38, %v2300_v25 }
 0x3f5   :  { %v2218_v31 = vmax.f32 %v2183_v62, 0.0 }
 0x3f7   :  { %2379 = vmatmul.f32.gmra.mxu1 %v2218_v31 }
 0x3f8   :  { %v2123_v29 = vpop.f32.mrf.mxu2 }
 0x3f9   :  { %v2124_v33 = vadd.f32 %v2123_v29, %v2059_v49 }
 0x3fa   :  { %v2185_v12 = vpop.f32.mrf.mxu3 }
 0x3fb   :  { %v2186_v44 = vadd.f32 %v2185_v12, %v2121_v55  ;;  %v2303_v61 = vpop.f32.mrf.mxu0 }
 0x3fc   :  { %v2304_v60 = vadd.f32 %v4312_v38, %v2303_v61 }
 0x3fd   :  { %v2220_v56 = vmax.f32 %v2186_v44, 0.0 }
 0x3ff   :  { %2382 = vmatmul.f32.gmra.mxu1 %v2220_v56 }
 0x402   :  { %v2188_v32 = vpop.f32.mrf.mxu3 }
 0x403   :  { %v2189_v15 = vadd.f32 %v2188_v32, %v2124_v33  ;;  %v2306_v48 = vpop.f32.mrf.mxu0 }
 0x404   :  { %v2307_v22 = vadd.f32 %v4312_v38, %v2306_v48 }
 0x405   :  { %v2222_v1 = vmax.f32 %v2189_v15, 0.0 }
 0x407   :  { %2385 = vmatmul.f32.gmra.mxu1 %v2222_v1 }
 0x40b   :  { %v2309_v54 = vpop.f32.mrf.mxu0 }
 0x40c   :  { %v2341_v9 = vpop.f32.mrf.mxu1  ;;  %v2310_v47 = vadd.f32 %v4312_v38, %v2309_v54 }
 0x40d   :  { %v2342_v59 = vadd.f32 %v2341_v9, %v2277_v2 }
 0x40f   :  { %2389 = vst [vmem:[#allocation11] sm:$0xff] %v2342_v59 }
 0x413   :  { %v2312_v28 = vpop.f32.mrf.mxu0 }
 0x414   :  { %v2344_v11 = vpop.f32.mrf.mxu1  ;;  %v2313_v30 = vadd.f32 %v4312_v38, %v2312_v28 }
 0x415   :  { %v2345_v58 = vadd.f32 %v2344_v11, %v2280_v40 }
 0x417   :  { %2390 = vst [vmem:[#allocation11 + $0x8] sm:$0xff] %v2345_v58 }
 0x41b   :  { %v2315_v41 = vpop.f32.mrf.mxu0 }
 0x41c   :  { %v2347_v53 = vpop.f32.mrf.mxu1  ;;  %v2316_v55 = vadd.f32 %v4312_v38, %v2315_v41 }
 0x41d   :  { %v2348_v46 = vadd.f32 %v2347_v53, %v2283_v36 }
 0x41f   :  { %2391 = vst [vmem:[#allocation11 + $0x10] sm:$0xff] %v2348_v46 }
 0x423   :  { %v2318_v44 = vpop.f32.mrf.mxu0 }
 0x424   :  { %v2350_v27 = vpop.f32.mrf.mxu1  ;;  %v2319_v26 = vadd.f32 %v4312_v38, %v2318_v44 }
 0x425   :  { %v2351_v52 = vadd.f32 %v2350_v27, %v2286_v7 }
 0x427   :  { %2392 = vst [vmem:[#allocation11 + $0x18] sm:$0xff] %v2351_v52 }
 0x42b   :  { %v2321_v29 = vpop.f32.mrf.mxu0 }
 0x42c   :  { %v2353_v23 = vpop.f32.mrf.mxu1  ;;  %v2322_v49 = vadd.f32 %v4312_v38, %v2321_v29 }
 0x42d   :  { %v2354_v57 = vadd.f32 %v2353_v23, %v2289_v19 }
 0x42f   :  { %2393 = vst [vmem:[#allocation11 + $0x20] sm:$0xff] %v2354_v57 }
 0x434   :  { %v2356_v39 = vpop.f32.mrf.mxu1 }
 0x435   :  { %v2357_v35 = vadd.f32 %v2356_v39, %v2292_v13 }
 0x437   :  { %2394 = vst [vmem:[#allocation11 + $0x28] sm:$0xff] %v2357_v35 }
 0x43c   :  { %v2359_v37 = vpop.f32.mrf.mxu1 }
 0x43d   :  { %v2360_v43 = vadd.f32 %v2359_v37, %v2295_v17 }
 0x43f   :  { %2395 = vst [vmem:[#allocation11 + $0x30] sm:$0xff] %v2360_v43 }
 0x444   :  { %v2362_v16 = vpop.f32.mrf.mxu1 }
 0x445   :  { %v2363_v6 = vadd.f32 %v2362_v16, %v2298_v34 }
 0x447   :  { %2396 = vst [vmem:[#allocation11 + $0x38] sm:$0xff] %v2363_v6 }
 0x44c   :  { %v2365_v14 = vpop.f32.mrf.mxu1 }
 0x44d   :  { %v2366_v63 = vadd.f32 %v2365_v14, %v2301_v4 }
 0x44f   :  { %2397 = vst [vmem:[#allocation11 + $0x40] sm:$0xff] %v2366_v63 }
 0x454   :  { %v2368_v18 = vpop.f32.mrf.mxu1 }
 0x455   :  { %v2369_v20 = vadd.f32 %v2368_v18, %v2304_v60 }
 0x457   :  { %2398 = vst [vmem:[#allocation11 + $0x48] sm:$0xff] %v2369_v20 }
 0x45c   :  { %v2371_v0 = vpop.f32.mrf.mxu1 }
 0x45d   :  { %v2372_v8 = vadd.f32 %v2371_v0, %v2307_v22 }
 0x45f   :  { %2399 = vst [vmem:[#allocation11 + $0x50] sm:$0xff] %v2372_v8 }
 0x464   :  { %v2374_v42 = vpop.f32.mrf.mxu1 }
 0x465   :  { %v2375_v62 = vadd.f32 %v2374_v42, %v2310_v47 }
 0x467   :  { %2400 = vst [vmem:[#allocation11 + $0x58] sm:$0xff] %v2375_v62 }
 0x46c   :  { %v2377_v31 = vpop.f32.mrf.mxu1 }
 0x46d   :  { %v2378_v24 = vadd.f32 %v2377_v31, %v2313_v30 }
 0x46f   :  { %2401 = vst [vmem:[#allocation11 + $0x60] sm:$0xff] %v2378_v24 }
 0x474   :  { %v2380_v12 = vpop.f32.mrf.mxu1 }
 0x475   :  { %v2381_v50 = vadd.f32 %v2380_v12, %v2316_v55 }
 0x477   :  { %2402 = vst [vmem:[#allocation11 + $0x68] sm:$0xff] %v2381_v50 }
 0x47c   :  { %v2383_v56 = vpop.f32.mrf.mxu1 }
 0x47d   :  { %v2384_v51 = vadd.f32 %v2383_v56, %v2319_v26 }
 0x47f   :  { %2403 = vst [vmem:[#allocation11 + $0x70] sm:$0xff] %v2384_v51 }
 0x484   :  { %v2386_v33 = vpop.f32.mrf.mxu1 }
 0x485   :  { %v2387_v32 = vadd.f32 %v2386_v33, %v2322_v49 }
 0x487   :  { %2404 = vst [vmem:[#allocation11 + $0x78] sm:$0xff] %v2387_v32 }
 0x488   :  { %2417 = dma.vmem_to_hbm [thread:$0]  %s2410_s30, 2048, %s2412_s10, [#allocation4], %s2697_s27, %s2697_s27, %s2698_s28  }
 0x489   :  { %2686 = dma.done.wait [#allocation4], 2048  }
 0x48a   :  { %2687 = vsyncadd [#allocation4], 4294965248 }
 0x48b   :  { %2422 = vsyncpa [#allocation3], 1 }
 0x48c   :  { %2423 = vsyncpa [#allocation6], 1 }
 0x48d   :  { %2424 = vsyncpa [#allocation9], 1 }
 0x48e   :  { %2425 = vsyncpa [#allocation4], 1 }

</bundles_post_ra>
